<compile_context>
chip_gen: v7x
topology: tpu7x:2x2x1
jax: 0.10.0
libtpu: 0.0.40
codegen_flags: <defaults>
</compile_context>

<pallas_src>
import math
import functools

import jax
import jax.numpy as jnp
from jax import lax
from jax.experimental import pallas as pl
from jax.experimental.pallas import tpu as pltpu


# ----------------------------------------------------------------------------
# In-kernel elementwise helpers.
# ----------------------------------------------------------------------------
_SQRT1_2 = 0.7071067811865476


def _erf_approx(x):
    # Abramowitz & Stegun 7.1.26, |abs err| <= 1.5e-7; the divide is replaced
    # by an EUP approx reciprocal (separate VLIW slot, ~2e-4 rel err).
    a1, a2, a3, a4, a5 = 0.254829592, -0.284496736, 1.421413741, -1.453152027, 1.061405429
    p = 0.3275911
    ax = jnp.abs(x)
    t = pl.reciprocal(1.0 + p * ax, approx=True)
    poly = ((((a5 * t + a4) * t + a3) * t + a2) * t + a1) * t
    y = 1.0 - poly * jnp.exp(-ax * ax)
    return jnp.where(x >= 0, y, -y)


def _gelu_exact(x):
    # nn.GELU() default is the exact (erf-based) GELU.
    return 0.5 * x * (1.0 + _erf_approx(x * _SQRT1_2))


# ----------------------------------------------------------------------------
# Fused conv3x3 (pad=1) + bias + GELU kernel.
#   xp : (B, H+2, W+2, Cin)  bf16   (halo-padded activation)
#   w9 : (9, Cin, N)         bf16   (tap-major folded weight; N = Cout*r*r,
#                                    columns ordered (i, j, c) so PixelShuffle
#                                    is a cheap C-minor transpose afterwards)
#   b  : (1, N)              f32
#   y  : (B, H, W, N)        bf16
# Grid = (B,): one batch image per step (whole image resident in VMEM).
# TODO(synk): for large resolutions, tile rows with a halo DMA
# (memory_space=pl.ANY + make_async_copy) instead of one whole-image block
# and the statically unrolled row loop.
# ----------------------------------------------------------------------------
def _conv3x3_gelu_kernel(x_ref, w_ref, b_ref, o_ref, *, H, W):
    n = o_ref.shape[3]
    bias = b_ref[...]                         # (1, N) f32, loaded once
    # Hoist the 9 (Cin, N) weight slabs out of the row loop.
    wts = [w_ref[t] for t in range(9)]
    for h in range(H):                        # static unroll (small H here)
        acc = bias                            # accumulator starts from bias
        for kh in range(3):
            for kw in range(3):
                tap = x_ref[0, h + kh, kw:kw + W, :]           # (W, Cin) bf16
                acc = acc + jnp.dot(tap, wts[kh * 3 + kw],
                                    preferred_element_type=jnp.float32)
        o_ref[0, h] = _gelu_exact(acc).astype(o_ref.dtype)     # (W, N)


def conv3x3_gelu(xp, w9, b, out_dtype=jnp.bfloat16):
    B, Hp, Wp, Cin = xp.shape
    H, W = Hp - 2, Wp - 2
    N = w9.shape[2]
    kernel = functools.partial(_conv3x3_gelu_kernel, H=H, W=W)
    return pl.pallas_call(
        kernel,
        out_shape=jax.ShapeDtypeStruct((B, H, W, N), out_dtype),
        grid_spec=pltpu.PrefetchScalarGridSpec(
            num_scalar_prefetch=0,
            grid=(B,),
            in_specs=[
                pl.BlockSpec((1, Hp, Wp, Cin), lambda bi: (bi, 0, 0, 0)),
                pl.BlockSpec((9, Cin, N), lambda bi: (0, 0, 0)),
                pl.BlockSpec((1, N), lambda bi: (0, 0)),
            ],
            out_specs=pl.BlockSpec((1, H, W, N), lambda bi: (bi, 0, 0, 0)),
        ),
        compiler_params=pltpu.CompilerParams(
            dimension_semantics=("parallel",),
        ),
    )(xp, w9, b)


# ----------------------------------------------------------------------------
# Head: 1x1 conv (C -> 3, padded to 8 rows) + sigmoid / (tanh+1)/2, transposed
# so pixels sit on the lane dim and the result is already channel-major (NCHW).
#   x  : (B, M, C)   bf16    (M = H*W pixels)
#   w8 : (8, C)      bf16    (rows 3..7 zero)
#   b8 : (8, 1)      f32     (rows 3..7 zero)
#   out: (B, 8, M)   f32
# ----------------------------------------------------------------------------
def _head_kernel(x_ref, w_ref, b_ref, o_ref, *, sigmoid):
    x = x_ref[0]                                        # (tm, C) bf16
    # (8, C) . (tm, C)^T contraction on C -> (8, tm): pixels on the lane dim.
    s = lax.dot_general(w_ref[...], x,
                        dimension_numbers=(((1,), (1,)), ((), ())),
                        preferred_element_type=jnp.float32)
    s = s + b_ref[...]                                  # (8, 1) broadcast
    if sigmoid:
        r = 1.0 / (1.0 + jnp.exp(-s))                   # exact sigmoid
    else:
        r = (jnp.tanh(s) + 1.0) * 0.5
    o_ref[0] = r


def head_1x1(x_nhwc, w8, b8, sigmoid):
    B, H, W, C = x_nhwc.shape
    M = H * W
    xf = x_nhwc.reshape(B, M, C)
    # Pixel tile: lane-dense output rows; single tile unless M is large.
    # TODO(synk): handle ragged large M (pad M to a tile multiple).
    tm = 512 if (M > 512 and M % 512 == 0) else M
    out = pl.pallas_call(
        functools.partial(_head_kernel, sigmoid=sigmoid),
        out_shape=jax.ShapeDtypeStruct((B, 8, M), jnp.float32),
        grid_spec=pltpu.PrefetchScalarGridSpec(
            num_scalar_prefetch=0,
            grid=(B, M // tm),
            in_specs=[
                pl.BlockSpec((1, tm, C), lambda bi, mi: (bi, mi, 0)),
                pl.BlockSpec((8, C), lambda bi, mi: (0, 0)),
                pl.BlockSpec((8, 1), lambda bi, mi: (0, 0)),
            ],
            out_specs=pl.BlockSpec((1, 8, tm), lambda bi, mi: (bi, 0, mi)),
        ),
        compiler_params=pltpu.CompilerParams(
            dimension_semantics=("parallel", "parallel"),
        ),
    )(xf, w8, b8)
    return out[:, :3, :].reshape(B, 3, H, W)            # already NCHW


# ----------------------------------------------------------------------------
# Host-side glue (pure data movement, kept minimal).
# ----------------------------------------------------------------------------
def pixel_shuffle_permuted(x, r):
    """PixelShuffle for weight columns already ordered (i, j, c): keeps the
    channel dim minor so the transpose never touches the lane dim.
    TODO(synk): fuse the shuffle + next-layer halo pad into the conv kernel's
    output stores to remove this activation round trip."""
    if r == 1:
        return x
    B, H, W, Cr2 = x.shape
    C = Cr2 // (r * r)
    x = x.reshape(B, H, W, r, r, C)
    x = x.transpose(0, 1, 3, 2, 4, 5)                    # (B, H, r, W, r, C)
    return x.reshape(B, H * r, W * r, C)


def positional_encoding(pos, lbase, levels):
    pe = []
    for i in range(levels):
        t = pos * (lbase ** i) * math.pi
        pe += [jnp.sin(t), jnp.cos(t)]
    return jnp.stack(pe, 1)                              # (B, 2*levels)


def stem_forward(x, stem):
    # M = batch (tiny): a pallas_call per layer is pure overhead here, so the
    # stem MLP runs as plain XLA (exact erf GELU, matching nn.GELU()).
    for w, b in stem:
        x = jax.nn.gelu(x @ w + b, approximate=False)
    return x


# ----------------------------------------------------------------------------
# NeRV forward.
# ----------------------------------------------------------------------------
def nerv_forward(pos, params, cfg):
    x = positional_encoding(pos, cfg["lbase"], cfg["levels"])
    x = stem_forward(x, params["stem"])
    B = pos.shape[0]
    # PyTorch: x.view(B, fc_dim, fc_h, fc_w) (NCHW) -> NHWC, bf16 activations.
    x = x.reshape(B, cfg["fc_dim"], cfg["fc_h"], cfg["fc_w"]).transpose(0, 2, 3, 1)
    x = x.astype(jnp.bfloat16)
    frames = []
    for (w9, b, stride), head_p in zip(params["layers"], params["heads"]):
        xp = jnp.pad(x, ((0, 0), (1, 1), (1, 1), (0, 0)))          # conv halo
        y = conv3x3_gelu(xp, w9.astype(jnp.bfloat16), b, out_dtype=jnp.bfloat16)
        x = pixel_shuffle_permuted(y, stride)
        if head_p is not None:
            hw8, hb8 = head_p
            frames.append(head_1x1(x, hw8.astype(jnp.bfloat16), hb8,
                                   cfg["sigmoid"]))
    return frames


# Pure-jnp f32 reference (same math, no Pallas, no bf16) for validation.
def nerv_forward_ref(pos, params, cfg):
    x = positional_encoding(pos, cfg["lbase"], cfg["levels"])
    x = stem_forward(x, params["stem"])
    B = pos.shape[0]
    x = x.reshape(B, cfg["fc_dim"], cfg["fc_h"], cfg["fc_w"]).transpose(0, 2, 3, 1)
    frames = []
    for (w9, b, stride), head_p in zip(params["layers"], params["heads"]):
        xp = jnp.pad(x, ((0, 0), (1, 1), (1, 1), (0, 0)))
        Bz, Hp, Wp, _ = xp.shape
        H, W = Hp - 2, Wp - 2
        acc = jnp.zeros((Bz, H, W, w9.shape[2]), jnp.float32) + b.reshape(1, 1, 1, -1)
        for kh in range(3):
            for kw in range(3):
                acc = acc + jnp.einsum("bhwc,cn->bhwn",
                                       xp[:, kh:kh + H, kw:kw + W, :],
                                       w9[kh * 3 + kw])
        y = jax.nn.gelu(acc, approximate=False)
        x = pixel_shuffle_permuted(y, stride)
        if head_p is not None:
            hw8, hb8 = head_p
            s = jnp.einsum("bhwc,nc->bnhw", x, hw8) + hb8[:, 0][None, :, None, None]
            fr = jax.nn.sigmoid(s) if cfg["sigmoid"] else (jnp.tanh(s) + 1.0) * 0.5
            frames.append(fr[:, :3])
    return frames


# ----------------------------------------------------------------------------
# Deterministic parameter construction (mirrors the module __init__ shapes).
# ----------------------------------------------------------------------------
def _init_linear(key, fan_in, fan_out):
    kw, kb = jax.random.split(key)
    s = 1.0 / math.sqrt(fan_in)
    w = jax.random.uniform(kw, (fan_in, fan_out), jnp.float32, -s, s)
    b = jax.random.uniform(kb, (1, fan_out), jnp.float32, -s, s)
    return w, b


def _init_conv3x3_folded(key, cin, cout, r):
    # Equivalent torch layout: weight (cout*r*r, cin, 3, 3) with PixelShuffle
    # channel k = c*r*r + i*r + j. Stored here folded & permuted:
    #   w9[kh*3+kw, ci, (i*r+j)*cout + c] == torch_w[c*r*r + i*r + j, ci, kh, kw]
    # (PixelShuffle channel permutation folded into the column order).
    kw_, kb = jax.random.split(key)
    n = cout * r * r
    s = 1.0 / math.sqrt(cin * 9)
    w = jax.random.uniform(kw_, (9, cin, n), jnp.float32, -s, s)
    b = jax.random.uniform(kb, (1, n), jnp.float32, -s, s)
    return w, b


def _init_head(key, cin):
    # torch 1x1 conv weight (3, cin, 1, 1); padded 3 -> 8 rows for dense stores.
    kw_, kb = jax.random.split(key)
    s = 1.0 / math.sqrt(cin)
    w = jax.random.uniform(kw_, (3, cin), jnp.float32, -s, s)
    b = jax.random.uniform(kb, (3,), jnp.float32, -s, s)
    w8 = jnp.zeros((8, cin), jnp.float32).at[:3].set(w)
    b8 = jnp.zeros((8, 1), jnp.float32).at[:3, 0].set(b)
    return w8, b8


def build_nerv(key,
               stem_dim_num="32_1",
               fc_hw_dim="4_4_16",
               pe_embed="1.25_4",
               stride_list=(2, 2),
               expansion=1.0,
               reduction=2,
               lower_width=8,
               num_blocks=1,
               bias=True,
               sin_res=False,
               sigmoid=True):
    lbase_s, levels_s = pe_embed.split("_")
    lbase, levels = float(lbase_s), int(levels_s)
    embed_length = 2 * levels
    stem_dim, stem_num = [int(x) for x in stem_dim_num.split("_")]
    fc_h, fc_w, fc_dim = [int(x) for x in fc_hw_dim.split("_")]

    cfg = dict(lbase=lbase, levels=levels, fc_h=fc_h, fc_w=fc_w, fc_dim=fc_dim,
               sigmoid=sigmoid)

    keys = iter(jax.random.split(key, 64))

    # stem MLP
    mlp_dims = [embed_length] + [stem_dim] * stem_num + [fc_h * fc_w * fc_dim]
    stem = [_init_linear(next(keys), mlp_dims[i], mlp_dims[i + 1])
            for i in range(len(mlp_dims) - 1)]

    # NervBlocks + heads (same control flow as the PyTorch __init__)
    layers, heads = [], []
    ngf = fc_dim
    for i, stride in enumerate(stride_list):
        if i == 0:
            new_ngf = int(ngf * expansion)
        else:
            new_ngf = max(ngf // (1 if stride == 1 else reduction), lower_width)
        for j in range(num_blocks):
            s = 1 if j else stride
            w, b = _init_conv3x3_folded(next(keys), ngf, new_ngf, s)
            layers.append((w, b, s))
            ngf = new_ngf
        if sin_res and i != len(stride_list) - 1:
            heads.append(None)
        else:
            heads.append(_init_head(next(keys), ngf))

    params = dict(stem=stem, layers=layers, heads=heads)
    return params, cfg


# ----------------------------------------------------------------------------
if __name__ == "__main__":
    key = jax.random.PRNGKey(0)
    kp, kx = jax.random.split(key)

    params, cfg = build_nerv(kp)

    # pos: normalized frame indices, shape (batch,)
    B = 2
    pos = jax.random.uniform(kx, (B,), jnp.float32)

    fwd = jax.jit(lambda p: nerv_forward(p, params, cfg))
    frames = fwd(pos)
    frames = [jax.block_until_ready(f) for f in frames]

    # expected NCHW frame shapes: (2,3,8,8) and (2,3,16,16)
    assert frames[0].shape == (B, 3, 8, 8)
    assert frames[1].shape == (B, 3, 16, 16)
    assert all(bool(jnp.all(jnp.isfinite(f))) for f in frames)

    # Validate against a pure-f32 jnp reference (bf16 MXU operands -> loose tol).
    ref = nerv_forward_ref(pos, params, cfg)
    for f, r in zip(frames, ref):
        assert float(jnp.max(jnp.abs(f - r))) < 3e-2

    print("KERNEL_OK")
</pallas_src>

<mosaic_0001>
module attributes {stable_mosaic.version = 11 : i64} {
  func.func @_conv3x3_gelu_kernel(%arg0: i32, %arg1: memref<1x6x6x16xbf16, #tpu.memory_space<vmem>>, %arg2: memref<9x16x64xbf16, #tpu.memory_space<vmem>>, %arg3: memref<1x64xf32, #tpu.memory_space<vmem>>, %arg4: memref<1x4x4x64xbf16, #tpu.memory_space<vmem>>) attributes {dimension_semantics = [#tpu.dimension_semantics<parallel>], iteration_bounds = array<i64: 2>, scalar_prefetch = 0 : i64, scratch_operands = 0 : i64, tpu.core_type = #tpu.core_type<tc>, window_params = [{transform_indices = @transform_0, window_bounds = array<i64: 1, 6, 6, 16>}, {pipeline_mode = #tpu.pipeline_mode<synchronous>, transform_indices = @transform_1, window_bounds = array<i64: 9, 16, 64>}, {pipeline_mode = #tpu.pipeline_mode<synchronous>, transform_indices = @transform_2, window_bounds = array<i64: 1, 64>}, {transform_indices = @transform_3, window_bounds = array<i64: 1, 4, 4, 64>}]} {
    %c0 = arith.constant 0 : index
    %c0_0 = arith.constant 0 : index
    %0 = vector.load %arg3[%c0, %c0_0] : memref<1x64xf32, #tpu.memory_space<vmem>>, vector<1x64xf32>
    %c0_1 = arith.constant 0 : index
    %c0_2 = arith.constant 0 : index
    %c0_3 = arith.constant 0 : index
    %1 = vector.load %arg2[%c0_1, %c0_2, %c0_3] : memref<9x16x64xbf16, #tpu.memory_space<vmem>>, vector<1x16x64xbf16>
    %2 = vector.shape_cast %1 : vector<1x16x64xbf16> to vector<16x64xbf16>
    %c1 = arith.constant 1 : index
    %c0_4 = arith.constant 0 : index
    %c0_5 = arith.constant 0 : index
    %3 = vector.load %arg2[%c1, %c0_4, %c0_5] : memref<9x16x64xbf16, #tpu.memory_space<vmem>>, vector<1x16x64xbf16>
    %4 = vector.shape_cast %3 : vector<1x16x64xbf16> to vector<16x64xbf16>
    %c2 = arith.constant 2 : index
    %c0_6 = arith.constant 0 : index
    %c0_7 = arith.constant 0 : index
    %5 = vector.load %arg2[%c2, %c0_6, %c0_7] : memref<9x16x64xbf16, #tpu.memory_space<vmem>>, vector<1x16x64xbf16>
    %6 = vector.shape_cast %5 : vector<1x16x64xbf16> to vector<16x64xbf16>
    %c3 = arith.constant 3 : index
    %c0_8 = arith.constant 0 : index
    %c0_9 = arith.constant 0 : index
    %7 = vector.load %arg2[%c3, %c0_8, %c0_9] : memref<9x16x64xbf16, #tpu.memory_space<vmem>>, vector<1x16x64xbf16>
    %8 = vector.shape_cast %7 : vector<1x16x64xbf16> to vector<16x64xbf16>
    %c4 = arith.constant 4 : index
    %c0_10 = arith.constant 0 : index
    %c0_11 = arith.constant 0 : index
    %9 = vector.load %arg2[%c4, %c0_10, %c0_11] : memref<9x16x64xbf16, #tpu.memory_space<vmem>>, vector<1x16x64xbf16>
    %10 = vector.shape_cast %9 : vector<1x16x64xbf16> to vector<16x64xbf16>
    %c5 = arith.constant 5 : index
    %c0_12 = arith.constant 0 : index
    %c0_13 = arith.constant 0 : index
    %11 = vector.load %arg2[%c5, %c0_12, %c0_13] : memref<9x16x64xbf16, #tpu.memory_space<vmem>>, vector<1x16x64xbf16>
    %12 = vector.shape_cast %11 : vector<1x16x64xbf16> to vector<16x64xbf16>
    %c6 = arith.constant 6 : index
    %c0_14 = arith.constant 0 : index
    %c0_15 = arith.constant 0 : index
    %13 = vector.load %arg2[%c6, %c0_14, %c0_15] : memref<9x16x64xbf16, #tpu.memory_space<vmem>>, vector<1x16x64xbf16>
    %14 = vector.shape_cast %13 : vector<1x16x64xbf16> to vector<16x64xbf16>
    %c7 = arith.constant 7 : index
    %c0_16 = arith.constant 0 : index
    %c0_17 = arith.constant 0 : index
    %15 = vector.load %arg2[%c7, %c0_16, %c0_17] : memref<9x16x64xbf16, #tpu.memory_space<vmem>>, vector<1x16x64xbf16>
    %16 = vector.shape_cast %15 : vector<1x16x64xbf16> to vector<16x64xbf16>
    %c8 = arith.constant 8 : index
    %c0_18 = arith.constant 0 : index
    %c0_19 = arith.constant 0 : index
    %17 = vector.load %arg2[%c8, %c0_18, %c0_19] : memref<9x16x64xbf16, #tpu.memory_space<vmem>>, vector<1x16x64xbf16>
    %18 = vector.shape_cast %17 : vector<1x16x64xbf16> to vector<16x64xbf16>
    %c0_20 = arith.constant 0 : index
    %c0_21 = arith.constant 0 : index
    %c0_22 = arith.constant 0 : index
    %c0_23 = arith.constant 0 : index
    %19 = vector.load %arg1[%c0_20, %c0_21, %c0_22, %c0_23] : memref<1x6x6x16xbf16, #tpu.memory_space<vmem>>, vector<1x1x4x16xbf16>
    %20 = vector.shape_cast %19 : vector<1x1x4x16xbf16> to vector<4x16xbf16>
    %cst = arith.constant dense<0.000000e+00> : vector<4x64xf32>
    %21 = tpu.matmul %20, %2, %cst {dimension_numbers = #tpu.dot_dimension_numbers<[1], [0], [0], [1], [0, 0, 1, 1], [], []>} : vector<4x16xbf16>, vector<16x64xbf16>, vector<4x64xf32> -> vector<4x64xf32>
    %22 = vector.broadcast %0 : vector<1x64xf32> to vector<4x64xf32>
    %23 = arith.addf %22, %21 : vector<4x64xf32>
    %c0_24 = arith.constant 0 : index
    %c0_25 = arith.constant 0 : index
    %c1_26 = arith.constant 1 : index
    %c0_27 = arith.constant 0 : index
    %24 = vector.load %arg1[%c0_24, %c0_25, %c1_26, %c0_27] : memref<1x6x6x16xbf16, #tpu.memory_space<vmem>>, vector<1x1x4x16xbf16>
    %25 = vector.shape_cast %24 : vector<1x1x4x16xbf16> to vector<4x16xbf16>
    %cst_28 = arith.constant dense<0.000000e+00> : vector<4x64xf32>
    %26 = tpu.matmul %25, %4, %cst_28 {dimension_numbers = #tpu.dot_dimension_numbers<[1], [0], [0], [1], [0, 0, 1, 1], [], []>} : vector<4x16xbf16>, vector<16x64xbf16>, vector<4x64xf32> -> vector<4x64xf32>
    %27 = arith.addf %23, %26 : vector<4x64xf32>
    %c0_29 = arith.constant 0 : index
    %c0_30 = arith.constant 0 : index
    %c2_31 = arith.constant 2 : index
    %c0_32 = arith.constant 0 : index
    %28 = vector.load %arg1[%c0_29, %c0_30, %c2_31, %c0_32] : memref<1x6x6x16xbf16, #tpu.memory_space<vmem>>, vector<1x1x4x16xbf16>
    %29 = vector.shape_cast %28 : vector<1x1x4x16xbf16> to vector<4x16xbf16>
    %cst_33 = arith.constant dense<0.000000e+00> : vector<4x64xf32>
    %30 = tpu.matmul %29, %6, %cst_33 {dimension_numbers = #tpu.dot_dimension_numbers<[1], [0], [0], [1], [0, 0, 1, 1], [], []>} : vector<4x16xbf16>, vector<16x64xbf16>, vector<4x64xf32> -> vector<4x64xf32>
    %31 = arith.addf %27, %30 : vector<4x64xf32>
    %c0_34 = arith.constant 0 : index
    %c1_35 = arith.constant 1 : index
    %c0_36 = arith.constant 0 : index
    %c0_37 = arith.constant 0 : index
    %32 = vector.load %arg1[%c0_34, %c1_35, %c0_36, %c0_37] : memref<1x6x6x16xbf16, #tpu.memory_space<vmem>>, vector<1x1x4x16xbf16>
    %33 = vector.shape_cast %32 : vector<1x1x4x16xbf16> to vector<4x16xbf16>
    %cst_38 = arith.constant dense<0.000000e+00> : vector<4x64xf32>
    %34 = tpu.matmul %33, %8, %cst_38 {dimension_numbers = #tpu.dot_dimension_numbers<[1], [0], [0], [1], [0, 0, 1, 1], [], []>} : vector<4x16xbf16>, vector<16x64xbf16>, vector<4x64xf32> -> vector<4x64xf32>
    %35 = arith.addf %31, %34 : vector<4x64xf32>
    %c0_39 = arith.constant 0 : index
    %c1_40 = arith.constant 1 : index
    %c1_41 = arith.constant 1 : index
    %c0_42 = arith.constant 0 : index
    %36 = vector.load %arg1[%c0_39, %c1_40, %c1_41, %c0_42] : memref<1x6x6x16xbf16, #tpu.memory_space<vmem>>, vector<1x1x4x16xbf16>
    %37 = vector.shape_cast %36 : vector<1x1x4x16xbf16> to vector<4x16xbf16>
    %cst_43 = arith.constant dense<0.000000e+00> : vector<4x64xf32>
    %38 = tpu.matmul %37, %10, %cst_43 {dimension_numbers = #tpu.dot_dimension_numbers<[1], [0], [0], [1], [0, 0, 1, 1], [], []>} : vector<4x16xbf16>, vector<16x64xbf16>, vector<4x64xf32> -> vector<4x64xf32>
    %39 = arith.addf %35, %38 : vector<4x64xf32>
    %c0_44 = arith.constant 0 : index
    %c1_45 = arith.constant 1 : index
    %c2_46 = arith.constant 2 : index
    %c0_47 = arith.constant 0 : index
    %40 = vector.load %arg1[%c0_44, %c1_45, %c2_46, %c0_47] : memref<1x6x6x16xbf16, #tpu.memory_space<vmem>>, vector<1x1x4x16xbf16>
    %41 = vector.shape_cast %40 : vector<1x1x4x16xbf16> to vector<4x16xbf16>
    %cst_48 = arith.constant dense<0.000000e+00> : vector<4x64xf32>
    %42 = tpu.matmul %41, %12, %cst_48 {dimension_numbers = #tpu.dot_dimension_numbers<[1], [0], [0], [1], [0, 0, 1, 1], [], []>} : vector<4x16xbf16>, vector<16x64xbf16>, vector<4x64xf32> -> vector<4x64xf32>
    %43 = arith.addf %39, %42 : vector<4x64xf32>
    %c0_49 = arith.constant 0 : index
    %c2_50 = arith.constant 2 : index
    %c0_51 = arith.constant 0 : index
    %c0_52 = arith.constant 0 : index
    %44 = vector.load %arg1[%c0_49, %c2_50, %c0_51, %c0_52] : memref<1x6x6x16xbf16, #tpu.memory_space<vmem>>, vector<1x1x4x16xbf16>
    %45 = vector.shape_cast %44 : vector<1x1x4x16xbf16> to vector<4x16xbf16>
    %cst_53 = arith.constant dense<0.000000e+00> : vector<4x64xf32>
    %46 = tpu.matmul %45, %14, %cst_53 {dimension_numbers = #tpu.dot_dimension_numbers<[1], [0], [0], [1], [0, 0, 1, 1], [], []>} : vector<4x16xbf16>, vector<16x64xbf16>, vector<4x64xf32> -> vector<4x64xf32>
    %47 = arith.addf %43, %46 : vector<4x64xf32>
    %c0_54 = arith.constant 0 : index
    %c2_55 = arith.constant 2 : index
    %c1_56 = arith.constant 1 : index
    %c0_57 = arith.constant 0 : index
    %48 = vector.load %arg1[%c0_54, %c2_55, %c1_56, %c0_57] : memref<1x6x6x16xbf16, #tpu.memory_space<vmem>>, vector<1x1x4x16xbf16>
    %49 = vector.shape_cast %48 : vector<1x1x4x16xbf16> to vector<4x16xbf16>
    %cst_58 = arith.constant dense<0.000000e+00> : vector<4x64xf32>
    %50 = tpu.matmul %49, %16, %cst_58 {dimension_numbers = #tpu.dot_dimension_numbers<[1], [0], [0], [1], [0, 0, 1, 1], [], []>} : vector<4x16xbf16>, vector<16x64xbf16>, vector<4x64xf32> -> vector<4x64xf32>
    %51 = arith.addf %47, %50 : vector<4x64xf32>
    %c0_59 = arith.constant 0 : index
    %c2_60 = arith.constant 2 : index
    %c2_61 = arith.constant 2 : index
    %c0_62 = arith.constant 0 : index
    %52 = vector.load %arg1[%c0_59, %c2_60, %c2_61, %c0_62] : memref<1x6x6x16xbf16, #tpu.memory_space<vmem>>, vector<1x1x4x16xbf16>
    %53 = vector.shape_cast %52 : vector<1x1x4x16xbf16> to vector<4x16xbf16>
    %cst_63 = arith.constant dense<0.000000e+00> : vector<4x64xf32>
    %54 = tpu.matmul %53, %18, %cst_63 {dimension_numbers = #tpu.dot_dimension_numbers<[1], [0], [0], [1], [0, 0, 1, 1], [], []>} : vector<4x16xbf16>, vector<16x64xbf16>, vector<4x64xf32> -> vector<4x64xf32>
    %55 = arith.addf %51, %54 : vector<4x64xf32>
    %cst_64 = arith.constant 5.000000e-01 : f32
    %56 = vector.broadcast %cst_64 : f32 to vector<4x64xf32>
    %57 = arith.mulf %56, %55 : vector<4x64xf32>
    %cst_65 = arith.constant 0.707106769 : f32
    %58 = vector.broadcast %cst_65 : f32 to vector<4x64xf32>
    %59 = arith.mulf %55, %58 : vector<4x64xf32>
    %60 = math.absf %59 : vector<4x64xf32>
    %cst_66 = arith.constant 0.327591091 : f32
    %61 = vector.broadcast %cst_66 : f32 to vector<4x64xf32>
    %62 = arith.mulf %61, %60 : vector<4x64xf32>
    %cst_67 = arith.constant 1.000000e+00 : f32
    %63 = vector.broadcast %cst_67 : f32 to vector<4x64xf32>
    %64 = arith.addf %63, %62 : vector<4x64xf32>
    %65 = tpu.reciprocal %64 {approx = true} : vector<4x64xf32> -> vector<4x64xf32>
    %cst_68 = arith.constant 1.06140542 : f32
    %66 = vector.broadcast %cst_68 : f32 to vector<4x64xf32>
    %67 = arith.mulf %66, %65 : vector<4x64xf32>
    %cst_69 = arith.constant -1.45315206 : f32
    %68 = vector.broadcast %cst_69 : f32 to vector<4x64xf32>
    %69 = arith.addf %67, %68 : vector<4x64xf32>
    %70 = arith.mulf %69, %65 : vector<4x64xf32>
    %cst_70 = arith.constant 1.42141378 : f32
    %71 = vector.broadcast %cst_70 : f32 to vector<4x64xf32>
    %72 = arith.addf %70, %71 : vector<4x64xf32>
    %73 = arith.mulf %72, %65 : vector<4x64xf32>
    %cst_71 = arith.constant -0.284496725 : f32
    %74 = vector.broadcast %cst_71 : f32 to vector<4x64xf32>
    %75 = arith.addf %73, %74 : vector<4x64xf32>
    %76 = arith.mulf %75, %65 : vector<4x64xf32>
    %cst_72 = arith.constant 0.254829586 : f32
    %77 = vector.broadcast %cst_72 : f32 to vector<4x64xf32>
    %78 = arith.addf %76, %77 : vector<4x64xf32>
    %79 = arith.mulf %78, %65 : vector<4x64xf32>
    %cst_73 = arith.constant 0.000000e+00 : f32
    %80 = vector.broadcast %cst_73 : f32 to vector<4x64xf32>
    %81 = arith.subf %80, %60 : vector<4x64xf32>
    %82 = arith.mulf %81, %60 : vector<4x64xf32>
    %83 = math.exp %82 : vector<4x64xf32>
    %84 = arith.mulf %79, %83 : vector<4x64xf32>
    %cst_74 = arith.constant 1.000000e+00 : f32
    %85 = vector.broadcast %cst_74 : f32 to vector<4x64xf32>
    %86 = arith.subf %85, %84 : vector<4x64xf32>
    %cst_75 = arith.constant 0.000000e+00 : f32
    %87 = vector.broadcast %cst_75 : f32 to vector<4x64xf32>
    %88 = arith.cmpf oge, %59, %87 : vector<4x64xf32>
    %cst_76 = arith.constant 0.000000e+00 : f32
    %89 = vector.broadcast %cst_76 : f32 to vector<4x64xf32>
    %90 = arith.subf %89, %86 : vector<4x64xf32>
    %91 = arith.select %88, %86, %90 : vector<4x64xi1>, vector<4x64xf32>
    %cst_77 = arith.constant 1.000000e+00 : f32
    %92 = vector.broadcast %cst_77 : f32 to vector<4x64xf32>
    %93 = arith.addf %92, %91 : vector<4x64xf32>
    %94 = arith.mulf %57, %93 : vector<4x64xf32>
    %95 = arith.truncf %94 : vector<4x64xf32> to vector<4x64xbf16>
    %c0_78 = arith.constant 0 : index
    %c0_79 = arith.constant 0 : index
    %c0_80 = arith.constant 0 : index
    %c0_81 = arith.constant 0 : index
    %96 = vector.load %arg4[%c0_78, %c0_79, %c0_80, %c0_81] : memref<1x4x4x64xbf16, #tpu.memory_space<vmem>>, vector<1x1x4x64xbf16>
    %97 = vector.shape_cast %96 : vector<1x1x4x64xbf16> to vector<4x64xbf16>
    %98 = vector.shape_cast %95 : vector<4x64xbf16> to vector<1x1x4x64xbf16>
    tpu.vector_store %arg4[%c0_78, %c0_79, %c0_80, %c0_81], %98 {strides = array<i32>} : memref<1x4x4x64xbf16, #tpu.memory_space<vmem>>, vector<1x1x4x64xbf16>,
    %c0_82 = arith.constant 0 : index
    %c1_83 = arith.constant 1 : index
    %c0_84 = arith.constant 0 : index
    %c0_85 = arith.constant 0 : index
    %99 = vector.load %arg1[%c0_82, %c1_83, %c0_84, %c0_85] : memref<1x6x6x16xbf16, #tpu.memory_space<vmem>>, vector<1x1x4x16xbf16>
    %100 = vector.shape_cast %99 : vector<1x1x4x16xbf16> to vector<4x16xbf16>
    %cst_86 = arith.constant dense<0.000000e+00> : vector<4x64xf32>
    %101 = tpu.matmul %100, %2, %cst_86 {dimension_numbers = #tpu.dot_dimension_numbers<[1], [0], [0], [1], [0, 0, 1, 1], [], []>} : vector<4x16xbf16>, vector<16x64xbf16>, vector<4x64xf32> -> vector<4x64xf32>
    %102 = vector.broadcast %0 : vector<1x64xf32> to vector<4x64xf32>
    %103 = arith.addf %102, %101 : vector<4x64xf32>
    %c0_87 = arith.constant 0 : index
    %c1_88 = arith.constant 1 : index
    %c1_89 = arith.constant 1 : index
    %c0_90 = arith.constant 0 : index
    %104 = vector.load %arg1[%c0_87, %c1_88, %c1_89, %c0_90] : memref<1x6x6x16xbf16, #tpu.memory_space<vmem>>, vector<1x1x4x16xbf16>
    %105 = vector.shape_cast %104 : vector<1x1x4x16xbf16> to vector<4x16xbf16>
    %cst_91 = arith.constant dense<0.000000e+00> : vector<4x64xf32>
    %106 = tpu.matmul %105, %4, %cst_91 {dimension_numbers = #tpu.dot_dimension_numbers<[1], [0], [0], [1], [0, 0, 1, 1], [], []>} : vector<4x16xbf16>, vector<16x64xbf16>, vector<4x64xf32> -> vector<4x64xf32>
    %107 = arith.addf %103, %106 : vector<4x64xf32>
    %c0_92 = arith.constant 0 : index
    %c1_93 = arith.constant 1 : index
    %c2_94 = arith.constant 2 : index
    %c0_95 = arith.constant 0 : index
    %108 = vector.load %arg1[%c0_92, %c1_93, %c2_94, %c0_95] : memref<1x6x6x16xbf16, #tpu.memory_space<vmem>>, vector<1x1x4x16xbf16>
    %109 = vector.shape_cast %108 : vector<1x1x4x16xbf16> to vector<4x16xbf16>
    %cst_96 = arith.constant dense<0.000000e+00> : vector<4x64xf32>
    %110 = tpu.matmul %109, %6, %cst_96 {dimension_numbers = #tpu.dot_dimension_numbers<[1], [0], [0], [1], [0, 0, 1, 1], [], []>} : vector<4x16xbf16>, vector<16x64xbf16>, vector<4x64xf32> -> vector<4x64xf32>
    %111 = arith.addf %107, %110 : vector<4x64xf32>
    %c0_97 = arith.constant 0 : index
    %c2_98 = arith.constant 2 : index
    %c0_99 = arith.constant 0 : index
    %c0_100 = arith.constant 0 : index
    %112 = vector.load %arg1[%c0_97, %c2_98, %c0_99, %c0_100] : memref<1x6x6x16xbf16, #tpu.memory_space<vmem>>, vector<1x1x4x16xbf16>
    %113 = vector.shape_cast %112 : vector<1x1x4x16xbf16> to vector<4x16xbf16>
    %cst_101 = arith.constant dense<0.000000e+00> : vector<4x64xf32>
    %114 = tpu.matmul %113, %8, %cst_101 {dimension_numbers = #tpu.dot_dimension_numbers<[1], [0], [0], [1], [0, 0, 1, 1], [], []>} : vector<4x16xbf16>, vector<16x64xbf16>, vector<4x64xf32> -> vector<4x64xf32>
    %115 = arith.addf %111, %114 : vector<4x64xf32>
    %c0_102 = arith.constant 0 : index
    %c2_103 = arith.constant 2 : index
    %c1_104 = arith.constant 1 : index
    %c0_105 = arith.constant 0 : index
    %116 = vector.load %arg1[%c0_102, %c2_103, %c1_104, %c0_105] : memref<1x6x6x16xbf16, #tpu.memory_space<vmem>>, vector<1x1x4x16xbf16>
    %117 = vector.shape_cast %116 : vector<1x1x4x16xbf16> to vector<4x16xbf16>
    %cst_106 = arith.constant dense<0.000000e+00> : vector<4x64xf32>
    %118 = tpu.matmul %117, %10, %cst_106 {dimension_numbers = #tpu.dot_dimension_numbers<[1], [0], [0], [1], [0, 0, 1, 1], [], []>} : vector<4x16xbf16>, vector<16x64xbf16>, vector<4x64xf32> -> vector<4x64xf32>
    %119 = arith.addf %115, %118 : vector<4x64xf32>
    %c0_107 = arith.constant 0 : index
    %c2_108 = arith.constant 2 : index
    %c2_109 = arith.constant 2 : index
    %c0_110 = arith.constant 0 : index
    %120 = vector.load %arg1[%c0_107, %c2_108, %c2_109, %c0_110] : memref<1x6x6x16xbf16, #tpu.memory_space<vmem>>, vector<1x1x4x16xbf16>
    %121 = vector.shape_cast %120 : vector<1x1x4x16xbf16> to vector<4x16xbf16>
    %cst_111 = arith.constant dense<0.000000e+00> : vector<4x64xf32>
    %122 = tpu.matmul %121, %12, %cst_111 {dimension_numbers = #tpu.dot_dimension_numbers<[1], [0], [0], [1], [0, 0, 1, 1], [], []>} : vector<4x16xbf16>, vector<16x64xbf16>, vector<4x64xf32> -> vector<4x64xf32>
    %123 = arith.addf %119, %122 : vector<4x64xf32>
    %c0_112 = arith.constant 0 : index
    %c3_113 = arith.constant 3 : index
    %c0_114 = arith.constant 0 : index
    %c0_115 = arith.constant 0 : index
    %124 = vector.load %arg1[%c0_112, %c3_113, %c0_114, %c0_115] : memref<1x6x6x16xbf16, #tpu.memory_space<vmem>>, vector<1x1x4x16xbf16>
    %125 = vector.shape_cast %124 : vector<1x1x4x16xbf16> to vector<4x16xbf16>
    %cst_116 = arith.constant dense<0.000000e+00> : vector<4x64xf32>
    %126 = tpu.matmul %125, %14, %cst_116 {dimension_numbers = #tpu.dot_dimension_numbers<[1], [0], [0], [1], [0, 0, 1, 1], [], []>} : vector<4x16xbf16>, vector<16x64xbf16>, vector<4x64xf32> -> vector<4x64xf32>
    %127 = arith.addf %123, %126 : vector<4x64xf32>
    %c0_117 = arith.constant 0 : index
    %c3_118 = arith.constant 3 : index
    %c1_119 = arith.constant 1 : index
    %c0_120 = arith.constant 0 : index
    %128 = vector.load %arg1[%c0_117, %c3_118, %c1_119, %c0_120] : memref<1x6x6x16xbf16, #tpu.memory_space<vmem>>, vector<1x1x4x16xbf16>
    %129 = vector.shape_cast %128 : vector<1x1x4x16xbf16> to vector<4x16xbf16>
    %cst_121 = arith.constant dense<0.000000e+00> : vector<4x64xf32>
    %130 = tpu.matmul %129, %16, %cst_121 {dimension_numbers = #tpu.dot_dimension_numbers<[1], [0], [0], [1], [0, 0, 1, 1], [], []>} : vector<4x16xbf16>, vector<16x64xbf16>, vector<4x64xf32> -> vector<4x64xf32>
    %131 = arith.addf %127, %130 : vector<4x64xf32>
    %c0_122 = arith.constant 0 : index
    %c3_123 = arith.constant 3 : index
    %c2_124 = arith.constant 2 : index
    %c0_125 = arith.constant 0 : index
    %132 = vector.load %arg1[%c0_122, %c3_123, %c2_124, %c0_125] : memref<1x6x6x16xbf16, #tpu.memory_space<vmem>>, vector<1x1x4x16xbf16>
    %133 = vector.shape_cast %132 : vector<1x1x4x16xbf16> to vector<4x16xbf16>
    %cst_126 = arith.constant dense<0.000000e+00> : vector<4x64xf32>
    %134 = tpu.matmul %133, %18, %cst_126 {dimension_numbers = #tpu.dot_dimension_numbers<[1], [0], [0], [1], [0, 0, 1, 1], [], []>} : vector<4x16xbf16>, vector<16x64xbf16>, vector<4x64xf32> -> vector<4x64xf32>
    %135 = arith.addf %131, %134 : vector<4x64xf32>
    %cst_127 = arith.constant 5.000000e-01 : f32
    %136 = vector.broadcast %cst_127 : f32 to vector<4x64xf32>
    %137 = arith.mulf %136, %135 : vector<4x64xf32>
    %cst_128 = arith.constant 0.707106769 : f32
    %138 = vector.broadcast %cst_128 : f32 to vector<4x64xf32>
    %139 = arith.mulf %135, %138 : vector<4x64xf32>
    %140 = math.absf %139 : vector<4x64xf32>
    %cst_129 = arith.constant 0.327591091 : f32
    %141 = vector.broadcast %cst_129 : f32 to vector<4x64xf32>
    %142 = arith.mulf %141, %140 : vector<4x64xf32>
    %cst_130 = arith.constant 1.000000e+00 : f32
    %143 = vector.broadcast %cst_130 : f32 to vector<4x64xf32>
    %144 = arith.addf %143, %142 : vector<4x64xf32>
    %145 = tpu.reciprocal %144 {approx = true} : vector<4x64xf32> -> vector<4x64xf32>
    %cst_131 = arith.constant 1.06140542 : f32
    %146 = vector.broadcast %cst_131 : f32 to vector<4x64xf32>
    %147 = arith.mulf %146, %145 : vector<4x64xf32>
    %cst_132 = arith.constant -1.45315206 : f32
    %148 = vector.broadcast %cst_132 : f32 to vector<4x64xf32>
    %149 = arith.addf %147, %148 : vector<4x64xf32>
    %150 = arith.mulf %149, %145 : vector<4x64xf32>
    %cst_133 = arith.constant 1.42141378 : f32
    %151 = vector.broadcast %cst_133 : f32 to vector<4x64xf32>
    %152 = arith.addf %150, %151 : vector<4x64xf32>
    %153 = arith.mulf %152, %145 : vector<4x64xf32>
    %cst_134 = arith.constant -0.284496725 : f32
    %154 = vector.broadcast %cst_134 : f32 to vector<4x64xf32>
    %155 = arith.addf %153, %154 : vector<4x64xf32>
    %156 = arith.mulf %155, %145 : vector<4x64xf32>
    %cst_135 = arith.constant 0.254829586 : f32
    %157 = vector.broadcast %cst_135 : f32 to vector<4x64xf32>
    %158 = arith.addf %156, %157 : vector<4x64xf32>
    %159 = arith.mulf %158, %145 : vector<4x64xf32>
    %cst_136 = arith.constant 0.000000e+00 : f32
    %160 = vector.broadcast %cst_136 : f32 to vector<4x64xf32>
    %161 = arith.subf %160, %140 : vector<4x64xf32>
    %162 = arith.mulf %161, %140 : vector<4x64xf32>
    %163 = math.exp %162 : vector<4x64xf32>
    %164 = arith.mulf %159, %163 : vector<4x64xf32>
    %cst_137 = arith.constant 1.000000e+00 : f32
    %165 = vector.broadcast %cst_137 : f32 to vector<4x64xf32>
    %166 = arith.subf %165, %164 : vector<4x64xf32>
    %cst_138 = arith.constant 0.000000e+00 : f32
    %167 = vector.broadcast %cst_138 : f32 to vector<4x64xf32>
    %168 = arith.cmpf oge, %139, %167 : vector<4x64xf32>
    %cst_139 = arith.constant 0.000000e+00 : f32
    %169 = vector.broadcast %cst_139 : f32 to vector<4x64xf32>
    %170 = arith.subf %169, %166 : vector<4x64xf32>
    %171 = arith.select %168, %166, %170 : vector<4x64xi1>, vector<4x64xf32>
    %cst_140 = arith.constant 1.000000e+00 : f32
    %172 = vector.broadcast %cst_140 : f32 to vector<4x64xf32>
    %173 = arith.addf %172, %171 : vector<4x64xf32>
    %174 = arith.mulf %137, %173 : vector<4x64xf32>
    %175 = arith.truncf %174 : vector<4x64xf32> to vector<4x64xbf16>
    %c0_141 = arith.constant 0 : index
    %c1_142 = arith.constant 1 : index
    %c0_143 = arith.constant 0 : index
    %c0_144 = arith.constant 0 : index
    %176 = vector.load %arg4[%c0_141, %c1_142, %c0_143, %c0_144] : memref<1x4x4x64xbf16, #tpu.memory_space<vmem>>, vector<1x1x4x64xbf16>
    %177 = vector.shape_cast %176 : vector<1x1x4x64xbf16> to vector<4x64xbf16>
    %178 = vector.shape_cast %175 : vector<4x64xbf16> to vector<1x1x4x64xbf16>
    tpu.vector_store %arg4[%c0_141, %c1_142, %c0_143, %c0_144], %178 {strides = array<i32>} : memref<1x4x4x64xbf16, #tpu.memory_space<vmem>>, vector<1x1x4x64xbf16>,
    %c0_145 = arith.constant 0 : index
    %c2_146 = arith.constant 2 : index
    %c0_147 = arith.constant 0 : index
    %c0_148 = arith.constant 0 : index
    %179 = vector.load %arg1[%c0_145, %c2_146, %c0_147, %c0_148] : memref<1x6x6x16xbf16, #tpu.memory_space<vmem>>, vector<1x1x4x16xbf16>
    %180 = vector.shape_cast %179 : vector<1x1x4x16xbf16> to vector<4x16xbf16>
    %cst_149 = arith.constant dense<0.000000e+00> : vector<4x64xf32>
    %181 = tpu.matmul %180, %2, %cst_149 {dimension_numbers = #tpu.dot_dimension_numbers<[1], [0], [0], [1], [0, 0, 1, 1], [], []>} : vector<4x16xbf16>, vector<16x64xbf16>, vector<4x64xf32> -> vector<4x64xf32>
    %182 = vector.broadcast %0 : vector<1x64xf32> to vector<4x64xf32>
    %183 = arith.addf %182, %181 : vector<4x64xf32>
    %c0_150 = arith.constant 0 : index
    %c2_151 = arith.constant 2 : index
    %c1_152 = arith.constant 1 : index
    %c0_153 = arith.constant 0 : index
    %184 = vector.load %arg1[%c0_150, %c2_151, %c1_152, %c0_153] : memref<1x6x6x16xbf16, #tpu.memory_space<vmem>>, vector<1x1x4x16xbf16>
    %185 = vector.shape_cast %184 : vector<1x1x4x16xbf16> to vector<4x16xbf16>
    %cst_154 = arith.constant dense<0.000000e+00> : vector<4x64xf32>
    %186 = tpu.matmul %185, %4, %cst_154 {dimension_numbers = #tpu.dot_dimension_numbers<[1], [0], [0], [1], [0, 0, 1, 1], [], []>} : vector<4x16xbf16>, vector<16x64xbf16>, vector<4x64xf32> -> vector<4x64xf32>
    %187 = arith.addf %183, %186 : vector<4x64xf32>
    %c0_155 = arith.constant 0 : index
    %c2_156 = arith.constant 2 : index
    %c2_157 = arith.constant 2 : index
    %c0_158 = arith.constant 0 : index
    %188 = vector.load %arg1[%c0_155, %c2_156, %c2_157, %c0_158] : memref<1x6x6x16xbf16, #tpu.memory_space<vmem>>, vector<1x1x4x16xbf16>
    %189 = vector.shape_cast %188 : vector<1x1x4x16xbf16> to vector<4x16xbf16>
    %cst_159 = arith.constant dense<0.000000e+00> : vector<4x64xf32>
    %190 = tpu.matmul %189, %6, %cst_159 {dimension_numbers = #tpu.dot_dimension_numbers<[1], [0], [0], [1], [0, 0, 1, 1], [], []>} : vector<4x16xbf16>, vector<16x64xbf16>, vector<4x64xf32> -> vector<4x64xf32>
    %191 = arith.addf %187, %190 : vector<4x64xf32>
    %c0_160 = arith.constant 0 : index
    %c3_161 = arith.constant 3 : index
    %c0_162 = arith.constant 0 : index
    %c0_163 = arith.constant 0 : index
    %192 = vector.load %arg1[%c0_160, %c3_161, %c0_162, %c0_163] : memref<1x6x6x16xbf16, #tpu.memory_space<vmem>>, vector<1x1x4x16xbf16>
    %193 = vector.shape_cast %192 : vector<1x1x4x16xbf16> to vector<4x16xbf16>
    %cst_164 = arith.constant dense<0.000000e+00> : vector<4x64xf32>
    %194 = tpu.matmul %193, %8, %cst_164 {dimension_numbers = #tpu.dot_dimension_numbers<[1], [0], [0], [1], [0, 0, 1, 1], [], []>} : vector<4x16xbf16>, vector<16x64xbf16>, vector<4x64xf32> -> vector<4x64xf32>
    %195 = arith.addf %191, %194 : vector<4x64xf32>
    %c0_165 = arith.constant 0 : index
    %c3_166 = arith.constant 3 : index
    %c1_167 = arith.constant 1 : index
    %c0_168 = arith.constant 0 : index
    %196 = vector.load %arg1[%c0_165, %c3_166, %c1_167, %c0_168] : memref<1x6x6x16xbf16, #tpu.memory_space<vmem>>, vector<1x1x4x16xbf16>
    %197 = vector.shape_cast %196 : vector<1x1x4x16xbf16> to vector<4x16xbf16>
    %cst_169 = arith.constant dense<0.000000e+00> : vector<4x64xf32>
    %198 = tpu.matmul %197, %10, %cst_169 {dimension_numbers = #tpu.dot_dimension_numbers<[1], [0], [0], [1], [0, 0, 1, 1], [], []>} : vector<4x16xbf16>, vector<16x64xbf16>, vector<4x64xf32> -> vector<4x64xf32>
    %199 = arith.addf %195, %198 : vector<4x64xf32>
    %c0_170 = arith.constant 0 : index
    %c3_171 = arith.constant 3 : index
    %c2_172 = arith.constant 2 : index
    %c0_173 = arith.constant 0 : index
    %200 = vector.load %arg1[%c0_170, %c3_171, %c2_172, %c0_173] : memref<1x6x6x16xbf16, #tpu.memory_space<vmem>>, vector<1x1x4x16xbf16>
    %201 = vector.shape_cast %200 : vector<1x1x4x16xbf16> to vector<4x16xbf16>
    %cst_174 = arith.constant dense<0.000000e+00> : vector<4x64xf32>
    %202 = tpu.matmul %201, %12, %cst_174 {dimension_numbers = #tpu.dot_dimension_numbers<[1], [0], [0], [1], [0, 0, 1, 1], [], []>} : vector<4x16xbf16>, vector<16x64xbf16>, vector<4x64xf32> -> vector<4x64xf32>
    %203 = arith.addf %199, %202 : vector<4x64xf32>
    %c0_175 = arith.constant 0 : index
    %c4_176 = arith.constant 4 : index
    %c0_177 = arith.constant 0 : index
    %c0_178 = arith.constant 0 : index
    %204 = vector.load %arg1[%c0_175, %c4_176, %c0_177, %c0_178] : memref<1x6x6x16xbf16, #tpu.memory_space<vmem>>, vector<1x1x4x16xbf16>
    %205 = vector.shape_cast %204 : vector<1x1x4x16xbf16> to vector<4x16xbf16>
    %cst_179 = arith.constant dense<0.000000e+00> : vector<4x64xf32>
    %206 = tpu.matmul %205, %14, %cst_179 {dimension_numbers = #tpu.dot_dimension_numbers<[1], [0], [0], [1], [0, 0, 1, 1], [], []>} : vector<4x16xbf16>, vector<16x64xbf16>, vector<4x64xf32> -> vector<4x64xf32>
    %207 = arith.addf %203, %206 : vector<4x64xf32>
    %c0_180 = arith.constant 0 : index
    %c4_181 = arith.constant 4 : index
    %c1_182 = arith.constant 1 : index
    %c0_183 = arith.constant 0 : index
    %208 = vector.load %arg1[%c0_180, %c4_181, %c1_182, %c0_183] : memref<1x6x6x16xbf16, #tpu.memory_space<vmem>>, vector<1x1x4x16xbf16>
    %209 = vector.shape_cast %208 : vector<1x1x4x16xbf16> to vector<4x16xbf16>
    %cst_184 = arith.constant dense<0.000000e+00> : vector<4x64xf32>
    %210 = tpu.matmul %209, %16, %cst_184 {dimension_numbers = #tpu.dot_dimension_numbers<[1], [0], [0], [1], [0, 0, 1, 1], [], []>} : vector<4x16xbf16>, vector<16x64xbf16>, vector<4x64xf32> -> vector<4x64xf32>
    %211 = arith.addf %207, %210 : vector<4x64xf32>
    %c0_185 = arith.constant 0 : index
    %c4_186 = arith.constant 4 : index
    %c2_187 = arith.constant 2 : index
    %c0_188 = arith.constant 0 : index
    %212 = vector.load %arg1[%c0_185, %c4_186, %c2_187, %c0_188] : memref<1x6x6x16xbf16, #tpu.memory_space<vmem>>, vector<1x1x4x16xbf16>
    %213 = vector.shape_cast %212 : vector<1x1x4x16xbf16> to vector<4x16xbf16>
    %cst_189 = arith.constant dense<0.000000e+00> : vector<4x64xf32>
    %214 = tpu.matmul %213, %18, %cst_189 {dimension_numbers = #tpu.dot_dimension_numbers<[1], [0], [0], [1], [0, 0, 1, 1], [], []>} : vector<4x16xbf16>, vector<16x64xbf16>, vector<4x64xf32> -> vector<4x64xf32>
    %215 = arith.addf %211, %214 : vector<4x64xf32>
    %cst_190 = arith.constant 5.000000e-01 : f32
    %216 = vector.broadcast %cst_190 : f32 to vector<4x64xf32>
    %217 = arith.mulf %216, %215 : vector<4x64xf32>
    %cst_191 = arith.constant 0.707106769 : f32
    %218 = vector.broadcast %cst_191 : f32 to vector<4x64xf32>
    %219 = arith.mulf %215, %218 : vector<4x64xf32>
    %220 = math.absf %219 : vector<4x64xf32>
    %cst_192 = arith.constant 0.327591091 : f32
    %221 = vector.broadcast %cst_192 : f32 to vector<4x64xf32>
    %222 = arith.mulf %221, %220 : vector<4x64xf32>
    %cst_193 = arith.constant 1.000000e+00 : f32
    %223 = vector.broadcast %cst_193 : f32 to vector<4x64xf32>
    %224 = arith.addf %223, %222 : vector<4x64xf32>
    %225 = tpu.reciprocal %224 {approx = true} : vector<4x64xf32> -> vector<4x64xf32>
    %cst_194 = arith.constant 1.06140542 : f32
    %226 = vector.broadcast %cst_194 : f32 to vector<4x64xf32>
    %227 = arith.mulf %226, %225 : vector<4x64xf32>
    %cst_195 = arith.constant -1.45315206 : f32
    %228 = vector.broadcast %cst_195 : f32 to vector<4x64xf32>
    %229 = arith.addf %227, %228 : vector<4x64xf32>
    %230 = arith.mulf %229, %225 : vector<4x64xf32>
    %cst_196 = arith.constant 1.42141378 : f32
    %231 = vector.broadcast %cst_196 : f32 to vector<4x64xf32>
    %232 = arith.addf %230, %231 : vector<4x64xf32>
    %233 = arith.mulf %232, %225 : vector<4x64xf32>
    %cst_197 = arith.constant -0.284496725 : f32
    %234 = vector.broadcast %cst_197 : f32 to vector<4x64xf32>
    %235 = arith.addf %233, %234 : vector<4x64xf32>
    %236 = arith.mulf %235, %225 : vector<4x64xf32>
    %cst_198 = arith.constant 0.254829586 : f32
    %237 = vector.broadcast %cst_198 : f32 to vector<4x64xf32>
    %238 = arith.addf %236, %237 : vector<4x64xf32>
    %239 = arith.mulf %238, %225 : vector<4x64xf32>
    %cst_199 = arith.constant 0.000000e+00 : f32
    %240 = vector.broadcast %cst_199 : f32 to vector<4x64xf32>
    %241 = arith.subf %240, %220 : vector<4x64xf32>
    %242 = arith.mulf %241, %220 : vector<4x64xf32>
    %243 = math.exp %242 : vector<4x64xf32>
    %244 = arith.mulf %239, %243 : vector<4x64xf32>
    %cst_200 = arith.constant 1.000000e+00 : f32
    %245 = vector.broadcast %cst_200 : f32 to vector<4x64xf32>
    %246 = arith.subf %245, %244 : vector<4x64xf32>
    %cst_201 = arith.constant 0.000000e+00 : f32
    %247 = vector.broadcast %cst_201 : f32 to vector<4x64xf32>
    %248 = arith.cmpf oge, %219, %247 : vector<4x64xf32>
    %cst_202 = arith.constant 0.000000e+00 : f32
    %249 = vector.broadcast %cst_202 : f32 to vector<4x64xf32>
    %250 = arith.subf %249, %246 : vector<4x64xf32>
    %251 = arith.select %248, %246, %250 : vector<4x64xi1>, vector<4x64xf32>
    %cst_203 = arith.constant 1.000000e+00 : f32
    %252 = vector.broadcast %cst_203 : f32 to vector<4x64xf32>
    %253 = arith.addf %252, %251 : vector<4x64xf32>
    %254 = arith.mulf %217, %253 : vector<4x64xf32>
    %255 = arith.truncf %254 : vector<4x64xf32> to vector<4x64xbf16>
    %c0_204 = arith.constant 0 : index
    %c2_205 = arith.constant 2 : index
    %c0_206 = arith.constant 0 : index
    %c0_207 = arith.constant 0 : index
    %256 = vector.load %arg4[%c0_204, %c2_205, %c0_206, %c0_207] : memref<1x4x4x64xbf16, #tpu.memory_space<vmem>>, vector<1x1x4x64xbf16>
    %257 = vector.shape_cast %256 : vector<1x1x4x64xbf16> to vector<4x64xbf16>
    %258 = vector.shape_cast %255 : vector<4x64xbf16> to vector<1x1x4x64xbf16>
    tpu.vector_store %arg4[%c0_204, %c2_205, %c0_206, %c0_207], %258 {strides = array<i32>} : memref<1x4x4x64xbf16, #tpu.memory_space<vmem>>, vector<1x1x4x64xbf16>,
    %c0_208 = arith.constant 0 : index
    %c3_209 = arith.constant 3 : index
    %c0_210 = arith.constant 0 : index
    %c0_211 = arith.constant 0 : index
    %259 = vector.load %arg1[%c0_208, %c3_209, %c0_210, %c0_211] : memref<1x6x6x16xbf16, #tpu.memory_space<vmem>>, vector<1x1x4x16xbf16>
    %260 = vector.shape_cast %259 : vector<1x1x4x16xbf16> to vector<4x16xbf16>
    %cst_212 = arith.constant dense<0.000000e+00> : vector<4x64xf32>
    %261 = tpu.matmul %260, %2, %cst_212 {dimension_numbers = #tpu.dot_dimension_numbers<[1], [0], [0], [1], [0, 0, 1, 1], [], []>} : vector<4x16xbf16>, vector<16x64xbf16>, vector<4x64xf32> -> vector<4x64xf32>
    %262 = vector.broadcast %0 : vector<1x64xf32> to vector<4x64xf32>
    %263 = arith.addf %262, %261 : vector<4x64xf32>
    %c0_213 = arith.constant 0 : index
    %c3_214 = arith.constant 3 : index
    %c1_215 = arith.constant 1 : index
    %c0_216 = arith.constant 0 : index
    %264 = vector.load %arg1[%c0_213, %c3_214, %c1_215, %c0_216] : memref<1x6x6x16xbf16, #tpu.memory_space<vmem>>, vector<1x1x4x16xbf16>
    %265 = vector.shape_cast %264 : vector<1x1x4x16xbf16> to vector<4x16xbf16>
    %cst_217 = arith.constant dense<0.000000e+00> : vector<4x64xf32>
    %266 = tpu.matmul %265, %4, %cst_217 {dimension_numbers = #tpu.dot_dimension_numbers<[1], [0], [0], [1], [0, 0, 1, 1], [], []>} : vector<4x16xbf16>, vector<16x64xbf16>, vector<4x64xf32> -> vector<4x64xf32>
    %267 = arith.addf %263, %266 : vector<4x64xf32>
    %c0_218 = arith.constant 0 : index
    %c3_219 = arith.constant 3 : index
    %c2_220 = arith.constant 2 : index
    %c0_221 = arith.constant 0 : index
    %268 = vector.load %arg1[%c0_218, %c3_219, %c2_220, %c0_221] : memref<1x6x6x16xbf16, #tpu.memory_space<vmem>>, vector<1x1x4x16xbf16>
    %269 = vector.shape_cast %268 : vector<1x1x4x16xbf16> to vector<4x16xbf16>
    %cst_222 = arith.constant dense<0.000000e+00> : vector<4x64xf32>
    %270 = tpu.matmul %269, %6, %cst_222 {dimension_numbers = #tpu.dot_dimension_numbers<[1], [0], [0], [1], [0, 0, 1, 1], [], []>} : vector<4x16xbf16>, vector<16x64xbf16>, vector<4x64xf32> -> vector<4x64xf32>
    %271 = arith.addf %267, %270 : vector<4x64xf32>
    %c0_223 = arith.constant 0 : index
    %c4_224 = arith.constant 4 : index
    %c0_225 = arith.constant 0 : index
    %c0_226 = arith.constant 0 : index
    %272 = vector.load %arg1[%c0_223, %c4_224, %c0_225, %c0_226] : memref<1x6x6x16xbf16, #tpu.memory_space<vmem>>, vector<1x1x4x16xbf16>
    %273 = vector.shape_cast %272 : vector<1x1x4x16xbf16> to vector<4x16xbf16>
    %cst_227 = arith.constant dense<0.000000e+00> : vector<4x64xf32>
    %274 = tpu.matmul %273, %8, %cst_227 {dimension_numbers = #tpu.dot_dimension_numbers<[1], [0], [0], [1], [0, 0, 1, 1], [], []>} : vector<4x16xbf16>, vector<16x64xbf16>, vector<4x64xf32> -> vector<4x64xf32>
    %275 = arith.addf %271, %274 : vector<4x64xf32>
    %c0_228 = arith.constant 0 : index
    %c4_229 = arith.constant 4 : index
    %c1_230 = arith.constant 1 : index
    %c0_231 = arith.constant 0 : index
    %276 = vector.load %arg1[%c0_228, %c4_229, %c1_230, %c0_231] : memref<1x6x6x16xbf16, #tpu.memory_space<vmem>>, vector<1x1x4x16xbf16>
    %277 = vector.shape_cast %276 : vector<1x1x4x16xbf16> to vector<4x16xbf16>
    %cst_232 = arith.constant dense<0.000000e+00> : vector<4x64xf32>
    %278 = tpu.matmul %277, %10, %cst_232 {dimension_numbers = #tpu.dot_dimension_numbers<[1], [0], [0], [1], [0, 0, 1, 1], [], []>} : vector<4x16xbf16>, vector<16x64xbf16>, vector<4x64xf32> -> vector<4x64xf32>
    %279 = arith.addf %275, %278 : vector<4x64xf32>
    %c0_233 = arith.constant 0 : index
    %c4_234 = arith.constant 4 : index
    %c2_235 = arith.constant 2 : index
    %c0_236 = arith.constant 0 : index
    %280 = vector.load %arg1[%c0_233, %c4_234, %c2_235, %c0_236] : memref<1x6x6x16xbf16, #tpu.memory_space<vmem>>, vector<1x1x4x16xbf16>
    %281 = vector.shape_cast %280 : vector<1x1x4x16xbf16> to vector<4x16xbf16>
    %cst_237 = arith.constant dense<0.000000e+00> : vector<4x64xf32>
    %282 = tpu.matmul %281, %12, %cst_237 {dimension_numbers = #tpu.dot_dimension_numbers<[1], [0], [0], [1], [0, 0, 1, 1], [], []>} : vector<4x16xbf16>, vector<16x64xbf16>, vector<4x64xf32> -> vector<4x64xf32>
    %283 = arith.addf %279, %282 : vector<4x64xf32>
    %c0_238 = arith.constant 0 : index
    %c5_239 = arith.constant 5 : index
    %c0_240 = arith.constant 0 : index
    %c0_241 = arith.constant 0 : index
    %284 = vector.load %arg1[%c0_238, %c5_239, %c0_240, %c0_241] : memref<1x6x6x16xbf16, #tpu.memory_space<vmem>>, vector<1x1x4x16xbf16>
    %285 = vector.shape_cast %284 : vector<1x1x4x16xbf16> to vector<4x16xbf16>
    %cst_242 = arith.constant dense<0.000000e+00> : vector<4x64xf32>
    %286 = tpu.matmul %285, %14, %cst_242 {dimension_numbers = #tpu.dot_dimension_numbers<[1], [0], [0], [1], [0, 0, 1, 1], [], []>} : vector<4x16xbf16>, vector<16x64xbf16>, vector<4x64xf32> -> vector<4x64xf32>
    %287 = arith.addf %283, %286 : vector<4x64xf32>
    %c0_243 = arith.constant 0 : index
    %c5_244 = arith.constant 5 : index
    %c1_245 = arith.constant 1 : index
    %c0_246 = arith.constant 0 : index
    %288 = vector.load %arg1[%c0_243, %c5_244, %c1_245, %c0_246] : memref<1x6x6x16xbf16, #tpu.memory_space<vmem>>, vector<1x1x4x16xbf16>
    %289 = vector.shape_cast %288 : vector<1x1x4x16xbf16> to vector<4x16xbf16>
    %cst_247 = arith.constant dense<0.000000e+00> : vector<4x64xf32>
    %290 = tpu.matmul %289, %16, %cst_247 {dimension_numbers = #tpu.dot_dimension_numbers<[1], [0], [0], [1], [0, 0, 1, 1], [], []>} : vector<4x16xbf16>, vector<16x64xbf16>, vector<4x64xf32> -> vector<4x64xf32>
    %291 = arith.addf %287, %290 : vector<4x64xf32>
    %c0_248 = arith.constant 0 : index
    %c5_249 = arith.constant 5 : index
    %c2_250 = arith.constant 2 : index
    %c0_251 = arith.constant 0 : index
    %292 = vector.load %arg1[%c0_248, %c5_249, %c2_250, %c0_251] : memref<1x6x6x16xbf16, #tpu.memory_space<vmem>>, vector<1x1x4x16xbf16>
    %293 = vector.shape_cast %292 : vector<1x1x4x16xbf16> to vector<4x16xbf16>
    %cst_252 = arith.constant dense<0.000000e+00> : vector<4x64xf32>
    %294 = tpu.matmul %293, %18, %cst_252 {dimension_numbers = #tpu.dot_dimension_numbers<[1], [0], [0], [1], [0, 0, 1, 1], [], []>} : vector<4x16xbf16>, vector<16x64xbf16>, vector<4x64xf32> -> vector<4x64xf32>
    %295 = arith.addf %291, %294 : vector<4x64xf32>
    %cst_253 = arith.constant 5.000000e-01 : f32
    %296 = vector.broadcast %cst_253 : f32 to vector<4x64xf32>
    %297 = arith.mulf %296, %295 : vector<4x64xf32>
    %cst_254 = arith.constant 0.707106769 : f32
    %298 = vector.broadcast %cst_254 : f32 to vector<4x64xf32>
    %299 = arith.mulf %295, %298 : vector<4x64xf32>
    %300 = math.absf %299 : vector<4x64xf32>
    %cst_255 = arith.constant 0.327591091 : f32
    %301 = vector.broadcast %cst_255 : f32 to vector<4x64xf32>
    %302 = arith.mulf %301, %300 : vector<4x64xf32>
    %cst_256 = arith.constant 1.000000e+00 : f32
    %303 = vector.broadcast %cst_256 : f32 to vector<4x64xf32>
    %304 = arith.addf %303, %302 : vector<4x64xf32>
    %305 = tpu.reciprocal %304 {approx = true} : vector<4x64xf32> -> vector<4x64xf32>
    %cst_257 = arith.constant 1.06140542 : f32
    %306 = vector.broadcast %cst_257 : f32 to vector<4x64xf32>
    %307 = arith.mulf %306, %305 : vector<4x64xf32>
    %cst_258 = arith.constant -1.45315206 : f32
    %308 = vector.broadcast %cst_258 : f32 to vector<4x64xf32>
    %309 = arith.addf %307, %308 : vector<4x64xf32>
    %310 = arith.mulf %309, %305 : vector<4x64xf32>
    %cst_259 = arith.constant 1.42141378 : f32
    %311 = vector.broadcast %cst_259 : f32 to vector<4x64xf32>
    %312 = arith.addf %310, %311 : vector<4x64xf32>
    %313 = arith.mulf %312, %305 : vector<4x64xf32>
    %cst_260 = arith.constant -0.284496725 : f32
    %314 = vector.broadcast %cst_260 : f32 to vector<4x64xf32>
    %315 = arith.addf %313, %314 : vector<4x64xf32>
    %316 = arith.mulf %315, %305 : vector<4x64xf32>
    %cst_261 = arith.constant 0.254829586 : f32
    %317 = vector.broadcast %cst_261 : f32 to vector<4x64xf32>
    %318 = arith.addf %316, %317 : vector<4x64xf32>
    %319 = arith.mulf %318, %305 : vector<4x64xf32>
    %cst_262 = arith.constant 0.000000e+00 : f32
    %320 = vector.broadcast %cst_262 : f32 to vector<4x64xf32>
    %321 = arith.subf %320, %300 : vector<4x64xf32>
    %322 = arith.mulf %321, %300 : vector<4x64xf32>
    %323 = math.exp %322 : vector<4x64xf32>
    %324 = arith.mulf %319, %323 : vector<4x64xf32>
    %cst_263 = arith.constant 1.000000e+00 : f32
    %325 = vector.broadcast %cst_263 : f32 to vector<4x64xf32>
    %326 = arith.subf %325, %324 : vector<4x64xf32>
    %cst_264 = arith.constant 0.000000e+00 : f32
    %327 = vector.broadcast %cst_264 : f32 to vector<4x64xf32>
    %328 = arith.cmpf oge, %299, %327 : vector<4x64xf32>
    %cst_265 = arith.constant 0.000000e+00 : f32
    %329 = vector.broadcast %cst_265 : f32 to vector<4x64xf32>
    %330 = arith.subf %329, %326 : vector<4x64xf32>
    %331 = arith.select %328, %326, %330 : vector<4x64xi1>, vector<4x64xf32>
    %cst_266 = arith.constant 1.000000e+00 : f32
    %332 = vector.broadcast %cst_266 : f32 to vector<4x64xf32>
    %333 = arith.addf %332, %331 : vector<4x64xf32>
    %334 = arith.mulf %297, %333 : vector<4x64xf32>
    %335 = arith.truncf %334 : vector<4x64xf32> to vector<4x64xbf16>
    %c0_267 = arith.constant 0 : index
    %c3_268 = arith.constant 3 : index
    %c0_269 = arith.constant 0 : index
    %c0_270 = arith.constant 0 : index
    %336 = vector.load %arg4[%c0_267, %c3_268, %c0_269, %c0_270] : memref<1x4x4x64xbf16, #tpu.memory_space<vmem>>, vector<1x1x4x64xbf16>
    %337 = vector.shape_cast %336 : vector<1x1x4x64xbf16> to vector<4x64xbf16>
    %338 = vector.shape_cast %335 : vector<4x64xbf16> to vector<1x1x4x64xbf16>
    tpu.vector_store %arg4[%c0_267, %c3_268, %c0_269, %c0_270], %338 {strides = array<i32>} : memref<1x4x4x64xbf16, #tpu.memory_space<vmem>>, vector<1x1x4x64xbf16>,
    return
  }
  func.func @transform_0(%arg0: i32) -> (i32, i32, i32, i32) {
    %c0_i32 = arith.constant 0 : i32
    %c0_i32_0 = arith.constant 0 : i32
    %c0_i32_1 = arith.constant 0 : i32
    %c0_i32_2 = arith.constant 0 : i32
    return %arg0, %c0_i32, %c0_i32_0, %c0_i32_1 : i32, i32, i32, i32
  }
  func.func @transform_1(%arg0: i32) -> (i32, i32, i32) {
    %c0_i32 = arith.constant 0 : i32
    %c0_i32_0 = arith.constant 0 : i32
    %c0_i32_1 = arith.constant 0 : i32
    %c0_i32_2 = arith.constant 0 : i32
    return %c0_i32, %c0_i32_0, %c0_i32_1 : i32, i32, i32
  }
  func.func @transform_2(%arg0: i32) -> (i32, i32) {
    %c0_i32 = arith.constant 0 : i32
    %c0_i32_0 = arith.constant 0 : i32
    %c0_i32_1 = arith.constant 0 : i32
    return %c0_i32, %c0_i32_0 : i32, i32
  }
  func.func @transform_3(%arg0: i32) -> (i32, i32, i32, i32) {
    %c0_i32 = arith.constant 0 : i32
    %c0_i32_0 = arith.constant 0 : i32
    %c0_i32_1 = arith.constant 0 : i32
    %c0_i32_2 = arith.constant 0 : i32
    return %arg0, %c0_i32, %c0_i32_0, %c0_i32_1 : i32, i32, i32, i32
  }
}

module attributes {stable_mosaic.version = 11 : i64} {
  func.func @_head_kernel(%arg0: i32, %arg1: i32, %arg2: memref<1x64x16xbf16, #tpu.memory_space<vmem>>, %arg3: memref<8x16xbf16, #tpu.memory_space<vmem>>, %arg4: memref<8x1xf32, #tpu.memory_space<vmem>>, %arg5: memref<1x8x64xf32, #tpu.memory_space<vmem>>) attributes {dimension_semantics = [#tpu.dimension_semantics<parallel>, #tpu.dimension_semantics<parallel>], iteration_bounds = array<i64: 2, 1>, scalar_prefetch = 0 : i64, scratch_operands = 0 : i64, tpu.core_type = #tpu.core_type<tc>, window_params = [{transform_indices = @transform_0, window_bounds = array<i64: 1, 64, 16>}, {pipeline_mode = #tpu.pipeline_mode<synchronous>, transform_indices = @transform_1, window_bounds = array<i64: 8, 16>}, {pipeline_mode = #tpu.pipeline_mode<synchronous>, transform_indices = @transform_2, window_bounds = array<i64: 8, 1>}, {transform_indices = @transform_3, window_bounds = array<i64: 1, 8, 64>}]} {
    %c0 = arith.constant 0 : index
    %c0_0 = arith.constant 0 : index
    %c0_1 = arith.constant 0 : index
    %0 = vector.load %arg2[%c0, %c0_0, %c0_1] : memref<1x64x16xbf16, #tpu.memory_space<vmem>>, vector<1x64x16xbf16>
    %1 = vector.shape_cast %0 : vector<1x64x16xbf16> to vector<64x16xbf16>
    %c0_2 = arith.constant 0 : index
    %c0_3 = arith.constant 0 : index
    %2 = vector.load %arg3[%c0_2, %c0_3] : memref<8x16xbf16, #tpu.memory_space<vmem>>, vector<8x16xbf16>
    %cst = arith.constant dense<0.000000e+00> : vector<8x64xf32>
    %3 = tpu.matmul %2, %1, %cst {dimension_numbers = #tpu.dot_dimension_numbers<[1], [1], [0], [0], [0, 0, 1, 0], [], []>} : vector<8x16xbf16>, vector<64x16xbf16>, vector<8x64xf32> -> vector<8x64xf32>
    %c0_4 = arith.constant 0 : index
    %c0_5 = arith.constant 0 : index
    %4 = vector.load %arg4[%c0_4, %c0_5] : memref<8x1xf32, #tpu.memory_space<vmem>>, vector<8x1xf32>
    %5 = vector.broadcast %4 : vector<8x1xf32> to vector<8x64xf32>
    %6 = arith.addf %3, %5 : vector<8x64xf32>
    %cst_6 = arith.constant 0.000000e+00 : f32
    %7 = vector.broadcast %cst_6 : f32 to vector<8x64xf32>
    %8 = arith.subf %7, %6 : vector<8x64xf32>
    %9 = math.exp %8 : vector<8x64xf32>
    %cst_7 = arith.constant 1.000000e+00 : f32
    %10 = vector.broadcast %cst_7 : f32 to vector<8x64xf32>
    %11 = arith.addf %10, %9 : vector<8x64xf32>
    %cst_8 = arith.constant 1.000000e+00 : f32
    %12 = vector.broadcast %cst_8 : f32 to vector<8x64xf32>
    %13 = arith.divf %12, %11 : vector<8x64xf32>
    %c0_9 = arith.constant 0 : index
    %c0_10 = arith.constant 0 : index
    %c0_11 = arith.constant 0 : index
    %14 = vector.load %arg5[%c0_9, %c0_10, %c0_11] : memref<1x8x64xf32, #tpu.memory_space<vmem>>, vector<1x8x64xf32>
    %15 = vector.shape_cast %14 : vector<1x8x64xf32> to vector<8x64xf32>
    %16 = vector.shape_cast %13 : vector<8x64xf32> to vector<1x8x64xf32>
    tpu.vector_store %arg5[%c0_9, %c0_10, %c0_11], %16 {strides = array<i32>} : memref<1x8x64xf32, #tpu.memory_space<vmem>>, vector<1x8x64xf32>,
    return
  }
  func.func @transform_0(%arg0: i32, %arg1: i32) -> (i32, i32, i32) {
    %c0_i32 = arith.constant 0 : i32
    %c0_i32_0 = arith.constant 0 : i32
    return %arg0, %arg1, %c0_i32 : i32, i32, i32
  }
  func.func @transform_1(%arg0: i32, %arg1: i32) -> (i32, i32) {
    %c0_i32 = arith.constant 0 : i32
    %c0_i32_0 = arith.constant 0 : i32
    %c0_i32_1 = arith.constant 0 : i32
    return %c0_i32, %c0_i32_0 : i32, i32
  }
  func.func @transform_2(%arg0: i32, %arg1: i32) -> (i32, i32) {
    %c0_i32 = arith.constant 0 : i32
    %c0_i32_0 = arith.constant 0 : i32
    %c0_i32_1 = arith.constant 0 : i32
    return %c0_i32, %c0_i32_0 : i32, i32
  }
  func.func @transform_3(%arg0: i32, %arg1: i32) -> (i32, i32, i32) {
    %c0_i32 = arith.constant 0 : i32
    %c0_i32_0 = arith.constant 0 : i32
    return %arg0, %c0_i32, %arg1 : i32, i32, i32
  }
}

module attributes {stable_mosaic.version = 11 : i64} {
  func.func @_conv3x3_gelu_kernel(%arg0: i32, %arg1: memref<1x10x10x16xbf16, #tpu.memory_space<vmem>>, %arg2: memref<9x16x32xbf16, #tpu.memory_space<vmem>>, %arg3: memref<1x32xf32, #tpu.memory_space<vmem>>, %arg4: memref<1x8x8x32xbf16, #tpu.memory_space<vmem>>) attributes {dimension_semantics = [#tpu.dimension_semantics<parallel>], iteration_bounds = array<i64: 2>, scalar_prefetch = 0 : i64, scratch_operands = 0 : i64, tpu.core_type = #tpu.core_type<tc>, window_params = [{transform_indices = @transform_0, window_bounds = array<i64: 1, 10, 10, 16>}, {pipeline_mode = #tpu.pipeline_mode<synchronous>, transform_indices = @transform_1, window_bounds = array<i64: 9, 16, 32>}, {pipeline_mode = #tpu.pipeline_mode<synchronous>, transform_indices = @transform_2, window_bounds = array<i64: 1, 32>}, {transform_indices = @transform_3, window_bounds = array<i64: 1, 8, 8, 32>}]} {
    %c0 = arith.constant 0 : index
    %c0_0 = arith.constant 0 : index
    %0 = vector.load %arg3[%c0, %c0_0] : memref<1x32xf32, #tpu.memory_space<vmem>>, vector<1x32xf32>
    %c0_1 = arith.constant 0 : index
    %c0_2 = arith.constant 0 : index
    %c0_3 = arith.constant 0 : index
    %1 = vector.load %arg2[%c0_1, %c0_2, %c0_3] : memref<9x16x32xbf16, #tpu.memory_space<vmem>>, vector<1x16x32xbf16>
    %2 = vector.shape_cast %1 : vector<1x16x32xbf16> to vector<16x32xbf16>
    %c1 = arith.constant 1 : index
    %c0_4 = arith.constant 0 : index
    %c0_5 = arith.constant 0 : index
    %3 = vector.load %arg2[%c1, %c0_4, %c0_5] : memref<9x16x32xbf16, #tpu.memory_space<vmem>>, vector<1x16x32xbf16>
    %4 = vector.shape_cast %3 : vector<1x16x32xbf16> to vector<16x32xbf16>
    %c2 = arith.constant 2 : index
    %c0_6 = arith.constant 0 : index
    %c0_7 = arith.constant 0 : index
    %5 = vector.load %arg2[%c2, %c0_6, %c0_7] : memref<9x16x32xbf16, #tpu.memory_space<vmem>>, vector<1x16x32xbf16>
    %6 = vector.shape_cast %5 : vector<1x16x32xbf16> to vector<16x32xbf16>
    %c3 = arith.constant 3 : index
    %c0_8 = arith.constant 0 : index
    %c0_9 = arith.constant 0 : index
    %7 = vector.load %arg2[%c3, %c0_8, %c0_9] : memref<9x16x32xbf16, #tpu.memory_space<vmem>>, vector<1x16x32xbf16>
    %8 = vector.shape_cast %7 : vector<1x16x32xbf16> to vector<16x32xbf16>
    %c4 = arith.constant 4 : index
    %c0_10 = arith.constant 0 : index
    %c0_11 = arith.constant 0 : index
    %9 = vector.load %arg2[%c4, %c0_10, %c0_11] : memref<9x16x32xbf16, #tpu.memory_space<vmem>>, vector<1x16x32xbf16>
    %10 = vector.shape_cast %9 : vector<1x16x32xbf16> to vector<16x32xbf16>
    %c5 = arith.constant 5 : index
    %c0_12 = arith.constant 0 : index
    %c0_13 = arith.constant 0 : index
    %11 = vector.load %arg2[%c5, %c0_12, %c0_13] : memref<9x16x32xbf16, #tpu.memory_space<vmem>>, vector<1x16x32xbf16>
    %12 = vector.shape_cast %11 : vector<1x16x32xbf16> to vector<16x32xbf16>
    %c6 = arith.constant 6 : index
    %c0_14 = arith.constant 0 : index
    %c0_15 = arith.constant 0 : index
    %13 = vector.load %arg2[%c6, %c0_14, %c0_15] : memref<9x16x32xbf16, #tpu.memory_space<vmem>>, vector<1x16x32xbf16>
    %14 = vector.shape_cast %13 : vector<1x16x32xbf16> to vector<16x32xbf16>
    %c7 = arith.constant 7 : index
    %c0_16 = arith.constant 0 : index
    %c0_17 = arith.constant 0 : index
    %15 = vector.load %arg2[%c7, %c0_16, %c0_17] : memref<9x16x32xbf16, #tpu.memory_space<vmem>>, vector<1x16x32xbf16>
    %16 = vector.shape_cast %15 : vector<1x16x32xbf16> to vector<16x32xbf16>
    %c8 = arith.constant 8 : index
    %c0_18 = arith.constant 0 : index
    %c0_19 = arith.constant 0 : index
    %17 = vector.load %arg2[%c8, %c0_18, %c0_19] : memref<9x16x32xbf16, #tpu.memory_space<vmem>>, vector<1x16x32xbf16>
    %18 = vector.shape_cast %17 : vector<1x16x32xbf16> to vector<16x32xbf16>
    %c0_20 = arith.constant 0 : index
    %c0_21 = arith.constant 0 : index
    %c0_22 = arith.constant 0 : index
    %c0_23 = arith.constant 0 : index
    %19 = vector.load %arg1[%c0_20, %c0_21, %c0_22, %c0_23] : memref<1x10x10x16xbf16, #tpu.memory_space<vmem>>, vector<1x1x8x16xbf16>
    %20 = vector.shape_cast %19 : vector<1x1x8x16xbf16> to vector<8x16xbf16>
    %cst = arith.constant dense<0.000000e+00> : vector<8x32xf32>
    %21 = tpu.matmul %20, %2, %cst {dimension_numbers = #tpu.dot_dimension_numbers<[1], [0], [0], [1], [0, 0, 1, 1], [], []>} : vector<8x16xbf16>, vector<16x32xbf16>, vector<8x32xf32> -> vector<8x32xf32>
    %22 = vector.broadcast %0 : vector<1x32xf32> to vector<8x32xf32>
    %23 = arith.addf %22, %21 : vector<8x32xf32>
    %c0_24 = arith.constant 0 : index
    %c0_25 = arith.constant 0 : index
    %c1_26 = arith.constant 1 : index
    %c0_27 = arith.constant 0 : index
    %24 = vector.load %arg1[%c0_24, %c0_25, %c1_26, %c0_27] : memref<1x10x10x16xbf16, #tpu.memory_space<vmem>>, vector<1x1x8x16xbf16>
    %25 = vector.shape_cast %24 : vector<1x1x8x16xbf16> to vector<8x16xbf16>
    %cst_28 = arith.constant dense<0.000000e+00> : vector<8x32xf32>
    %26 = tpu.matmul %25, %4, %cst_28 {dimension_numbers = #tpu.dot_dimension_numbers<[1], [0], [0], [1], [0, 0, 1, 1], [], []>} : vector<8x16xbf16>, vector<16x32xbf16>, vector<8x32xf32> -> vector<8x32xf32>
    %27 = arith.addf %23, %26 : vector<8x32xf32>
    %c0_29 = arith.constant 0 : index
    %c0_30 = arith.constant 0 : index
    %c2_31 = arith.constant 2 : index
    %c0_32 = arith.constant 0 : index
    %28 = vector.load %arg1[%c0_29, %c0_30, %c2_31, %c0_32] : memref<1x10x10x16xbf16, #tpu.memory_space<vmem>>, vector<1x1x8x16xbf16>
    %29 = vector.shape_cast %28 : vector<1x1x8x16xbf16> to vector<8x16xbf16>
    %cst_33 = arith.constant dense<0.000000e+00> : vector<8x32xf32>
    %30 = tpu.matmul %29, %6, %cst_33 {dimension_numbers = #tpu.dot_dimension_numbers<[1], [0], [0], [1], [0, 0, 1, 1], [], []>} : vector<8x16xbf16>, vector<16x32xbf16>, vector<8x32xf32> -> vector<8x32xf32>
    %31 = arith.addf %27, %30 : vector<8x32xf32>
    %c0_34 = arith.constant 0 : index
    %c1_35 = arith.constant 1 : index
    %c0_36 = arith.constant 0 : index
    %c0_37 = arith.constant 0 : index
    %32 = vector.load %arg1[%c0_34, %c1_35, %c0_36, %c0_37] : memref<1x10x10x16xbf16, #tpu.memory_space<vmem>>, vector<1x1x8x16xbf16>
    %33 = vector.shape_cast %32 : vector<1x1x8x16xbf16> to vector<8x16xbf16>
    %cst_38 = arith.constant dense<0.000000e+00> : vector<8x32xf32>
    %34 = tpu.matmul %33, %8, %cst_38 {dimension_numbers = #tpu.dot_dimension_numbers<[1], [0], [0], [1], [0, 0, 1, 1], [], []>} : vector<8x16xbf16>, vector<16x32xbf16>, vector<8x32xf32> -> vector<8x32xf32>
    %35 = arith.addf %31, %34 : vector<8x32xf32>
    %c0_39 = arith.constant 0 : index
    %c1_40 = arith.constant 1 : index
    %c1_41 = arith.constant 1 : index
    %c0_42 = arith.constant 0 : index
    %36 = vector.load %arg1[%c0_39, %c1_40, %c1_41, %c0_42] : memref<1x10x10x16xbf16, #tpu.memory_space<vmem>>, vector<1x1x8x16xbf16>
    %37 = vector.shape_cast %36 : vector<1x1x8x16xbf16> to vector<8x16xbf16>
    %cst_43 = arith.constant dense<0.000000e+00> : vector<8x32xf32>
    %38 = tpu.matmul %37, %10, %cst_43 {dimension_numbers = #tpu.dot_dimension_numbers<[1], [0], [0], [1], [0, 0, 1, 1], [], []>} : vector<8x16xbf16>, vector<16x32xbf16>, vector<8x32xf32> -> vector<8x32xf32>
    %39 = arith.addf %35, %38 : vector<8x32xf32>
    %c0_44 = arith.constant 0 : index
    %c1_45 = arith.constant 1 : index
    %c2_46 = arith.constant 2 : index
    %c0_47 = arith.constant 0 : index
    %40 = vector.load %arg1[%c0_44, %c1_45, %c2_46, %c0_47] : memref<1x10x10x16xbf16, #tpu.memory_space<vmem>>, vector<1x1x8x16xbf16>
    %41 = vector.shape_cast %40 : vector<1x1x8x16xbf16> to vector<8x16xbf16>
    %cst_48 = arith.constant dense<0.000000e+00> : vector<8x32xf32>
    %42 = tpu.matmul %41, %12, %cst_48 {dimension_numbers = #tpu.dot_dimension_numbers<[1], [0], [0], [1], [0, 0, 1, 1], [], []>} : vector<8x16xbf16>, vector<16x32xbf16>, vector<8x32xf32> -> vector<8x32xf32>
    %43 = arith.addf %39, %42 : vector<8x32xf32>
    %c0_49 = arith.constant 0 : index
    %c2_50 = arith.constant 2 : index
    %c0_51 = arith.constant 0 : index
    %c0_52 = arith.constant 0 : index
    %44 = vector.load %arg1[%c0_49, %c2_50, %c0_51, %c0_52] : memref<1x10x10x16xbf16, #tpu.memory_space<vmem>>, vector<1x1x8x16xbf16>
    %45 = vector.shape_cast %44 : vector<1x1x8x16xbf16> to vector<8x16xbf16>
    %cst_53 = arith.constant dense<0.000000e+00> : vector<8x32xf32>
    %46 = tpu.matmul %45, %14, %cst_53 {dimension_numbers = #tpu.dot_dimension_numbers<[1], [0], [0], [1], [0, 0, 1, 1], [], []>} : vector<8x16xbf16>, vector<16x32xbf16>, vector<8x32xf32> -> vector<8x32xf32>
    %47 = arith.addf %43, %46 : vector<8x32xf32>
    %c0_54 = arith.constant 0 : index
    %c2_55 = arith.constant 2 : index
    %c1_56 = arith.constant 1 : index
    %c0_57 = arith.constant 0 : index
    %48 = vector.load %arg1[%c0_54, %c2_55, %c1_56, %c0_57] : memref<1x10x10x16xbf16, #tpu.memory_space<vmem>>, vector<1x1x8x16xbf16>
    %49 = vector.shape_cast %48 : vector<1x1x8x16xbf16> to vector<8x16xbf16>
    %cst_58 = arith.constant dense<0.000000e+00> : vector<8x32xf32>
    %50 = tpu.matmul %49, %16, %cst_58 {dimension_numbers = #tpu.dot_dimension_numbers<[1], [0], [0], [1], [0, 0, 1, 1], [], []>} : vector<8x16xbf16>, vector<16x32xbf16>, vector<8x32xf32> -> vector<8x32xf32>
    %51 = arith.addf %47, %50 : vector<8x32xf32>
    %c0_59 = arith.constant 0 : index
    %c2_60 = arith.constant 2 : index
    %c2_61 = arith.constant 2 : index
    %c0_62 = arith.constant 0 : index
    %52 = vector.load %arg1[%c0_59, %c2_60, %c2_61, %c0_62] : memref<1x10x10x16xbf16, #tpu.memory_space<vmem>>, vector<1x1x8x16xbf16>
    %53 = vector.shape_cast %52 : vector<1x1x8x16xbf16> to vector<8x16xbf16>
    %cst_63 = arith.constant dense<0.000000e+00> : vector<8x32xf32>
    %54 = tpu.matmul %53, %18, %cst_63 {dimension_numbers = #tpu.dot_dimension_numbers<[1], [0], [0], [1], [0, 0, 1, 1], [], []>} : vector<8x16xbf16>, vector<16x32xbf16>, vector<8x32xf32> -> vector<8x32xf32>
    %55 = arith.addf %51, %54 : vector<8x32xf32>
    %cst_64 = arith.constant 5.000000e-01 : f32
    %56 = vector.broadcast %cst_64 : f32 to vector<8x32xf32>
    %57 = arith.mulf %56, %55 : vector<8x32xf32>
    %cst_65 = arith.constant 0.707106769 : f32
    %58 = vector.broadcast %cst_65 : f32 to vector<8x32xf32>
    %59 = arith.mulf %55, %58 : vector<8x32xf32>
    %60 = math.absf %59 : vector<8x32xf32>
    %cst_66 = arith.constant 0.327591091 : f32
    %61 = vector.broadcast %cst_66 : f32 to vector<8x32xf32>
    %62 = arith.mulf %61, %60 : vector<8x32xf32>
    %cst_67 = arith.constant 1.000000e+00 : f32
    %63 = vector.broadcast %cst_67 : f32 to vector<8x32xf32>
    %64 = arith.addf %63, %62 : vector<8x32xf32>
    %65 = tpu.reciprocal %64 {approx = true} : vector<8x32xf32> -> vector<8x32xf32>
    %cst_68 = arith.constant 1.06140542 : f32
    %66 = vector.broadcast %cst_68 : f32 to vector<8x32xf32>
    %67 = arith.mulf %66, %65 : vector<8x32xf32>
    %cst_69 = arith.constant -1.45315206 : f32
    %68 = vector.broadcast %cst_69 : f32 to vector<8x32xf32>
    %69 = arith.addf %67, %68 : vector<8x32xf32>
    %70 = arith.mulf %69, %65 : vector<8x32xf32>
    %cst_70 = arith.constant 1.42141378 : f32
    %71 = vector.broadcast %cst_70 : f32 to vector<8x32xf32>
    %72 = arith.addf %70, %71 : vector<8x32xf32>
    %73 = arith.mulf %72, %65 : vector<8x32xf32>
    %cst_71 = arith.constant -0.284496725 : f32
    %74 = vector.broadcast %cst_71 : f32 to vector<8x32xf32>
    %75 = arith.addf %73, %74 : vector<8x32xf32>
    %76 = arith.mulf %75, %65 : vector<8x32xf32>
    %cst_72 = arith.constant 0.254829586 : f32
    %77 = vector.broadcast %cst_72 : f32 to vector<8x32xf32>
    %78 = arith.addf %76, %77 : vector<8x32xf32>
    %79 = arith.mulf %78, %65 : vector<8x32xf32>
    %cst_73 = arith.constant 0.000000e+00 : f32
    %80 = vector.broadcast %cst_73 : f32 to vector<8x32xf32>
    %81 = arith.subf %80, %60 : vector<8x32xf32>
    %82 = arith.mulf %81, %60 : vector<8x32xf32>
    %83 = math.exp %82 : vector<8x32xf32>
    %84 = arith.mulf %79, %83 : vector<8x32xf32>
    %cst_74 = arith.constant 1.000000e+00 : f32
    %85 = vector.broadcast %cst_74 : f32 to vector<8x32xf32>
    %86 = arith.subf %85, %84 : vector<8x32xf32>
    %cst_75 = arith.constant 0.000000e+00 : f32
    %87 = vector.broadcast %cst_75 : f32 to vector<8x32xf32>
    %88 = arith.cmpf oge, %59, %87 : vector<8x32xf32>
    %cst_76 = arith.constant 0.000000e+00 : f32
    %89 = vector.broadcast %cst_76 : f32 to vector<8x32xf32>
    %90 = arith.subf %89, %86 : vector<8x32xf32>
    %91 = arith.select %88, %86, %90 : vector<8x32xi1>, vector<8x32xf32>
    %cst_77 = arith.constant 1.000000e+00 : f32
    %92 = vector.broadcast %cst_77 : f32 to vector<8x32xf32>
    %93 = arith.addf %92, %91 : vector<8x32xf32>
    %94 = arith.mulf %57, %93 : vector<8x32xf32>
    %95 = arith.truncf %94 : vector<8x32xf32> to vector<8x32xbf16>
    %c0_78 = arith.constant 0 : index
    %c0_79 = arith.constant 0 : index
    %c0_80 = arith.constant 0 : index
    %c0_81 = arith.constant 0 : index
    %96 = vector.load %arg4[%c0_78, %c0_79, %c0_80, %c0_81] : memref<1x8x8x32xbf16, #tpu.memory_space<vmem>>, vector<1x1x8x32xbf16>
    %97 = vector.shape_cast %96 : vector<1x1x8x32xbf16> to vector<8x32xbf16>
    %98 = vector.shape_cast %95 : vector<8x32xbf16> to vector<1x1x8x32xbf16>
    tpu.vector_store %arg4[%c0_78, %c0_79, %c0_80, %c0_81], %98 {strides = array<i32>} : memref<1x8x8x32xbf16, #tpu.memory_space<vmem>>, vector<1x1x8x32xbf16>,
    %c0_82 = arith.constant 0 : index
    %c1_83 = arith.constant 1 : index
    %c0_84 = arith.constant 0 : index
    %c0_85 = arith.constant 0 : index
    %99 = vector.load %arg1[%c0_82, %c1_83, %c0_84, %c0_85] : memref<1x10x10x16xbf16, #tpu.memory_space<vmem>>, vector<1x1x8x16xbf16>
    %100 = vector.shape_cast %99 : vector<1x1x8x16xbf16> to vector<8x16xbf16>
    %cst_86 = arith.constant dense<0.000000e+00> : vector<8x32xf32>
    %101 = tpu.matmul %100, %2, %cst_86 {dimension_numbers = #tpu.dot_dimension_numbers<[1], [0], [0], [1], [0, 0, 1, 1], [], []>} : vector<8x16xbf16>, vector<16x32xbf16>, vector<8x32xf32> -> vector<8x32xf32>
    %102 = vector.broadcast %0 : vector<1x32xf32> to vector<8x32xf32>
    %103 = arith.addf %102, %101 : vector<8x32xf32>
    %c0_87 = arith.constant 0 : index
    %c1_88 = arith.constant 1 : index
    %c1_89 = arith.constant 1 : index
    %c0_90 = arith.constant 0 : index
    %104 = vector.load %arg1[%c0_87, %c1_88, %c1_89, %c0_90] : memref<1x10x10x16xbf16, #tpu.memory_space<vmem>>, vector<1x1x8x16xbf16>
    %105 = vector.shape_cast %104 : vector<1x1x8x16xbf16> to vector<8x16xbf16>
    %cst_91 = arith.constant dense<0.000000e+00> : vector<8x32xf32>
    %106 = tpu.matmul %105, %4, %cst_91 {dimension_numbers = #tpu.dot_dimension_numbers<[1], [0], [0], [1], [0, 0, 1, 1], [], []>} : vector<8x16xbf16>, vector<16x32xbf16>, vector<8x32xf32> -> vector<8x32xf32>
    %107 = arith.addf %103, %106 : vector<8x32xf32>
    %c0_92 = arith.constant 0 : index
    %c1_93 = arith.constant 1 : index
    %c2_94 = arith.constant 2 : index
    %c0_95 = arith.constant 0 : index
    %108 = vector.load %arg1[%c0_92, %c1_93, %c2_94, %c0_95] : memref<1x10x10x16xbf16, #tpu.memory_space<vmem>>, vector<1x1x8x16xbf16>
    %109 = vector.shape_cast %108 : vector<1x1x8x16xbf16> to vector<8x16xbf16>
    %cst_96 = arith.constant dense<0.000000e+00> : vector<8x32xf32>
    %110 = tpu.matmul %109, %6, %cst_96 {dimension_numbers = #tpu.dot_dimension_numbers<[1], [0], [0], [1], [0, 0, 1, 1], [], []>} : vector<8x16xbf16>, vector<16x32xbf16>, vector<8x32xf32> -> vector<8x32xf32>
    %111 = arith.addf %107, %110 : vector<8x32xf32>
    %c0_97 = arith.constant 0 : index
    %c2_98 = arith.constant 2 : index
    %c0_99 = arith.constant 0 : index
    %c0_100 = arith.constant 0 : index
    %112 = vector.load %arg1[%c0_97, %c2_98, %c0_99, %c0_100] : memref<1x10x10x16xbf16, #tpu.memory_space<vmem>>, vector<1x1x8x16xbf16>
    %113 = vector.shape_cast %112 : vector<1x1x8x16xbf16> to vector<8x16xbf16>
    %cst_101 = arith.constant dense<0.000000e+00> : vector<8x32xf32>
    %114 = tpu.matmul %113, %8, %cst_101 {dimension_numbers = #tpu.dot_dimension_numbers<[1], [0], [0], [1], [0, 0, 1, 1], [], []>} : vector<8x16xbf16>, vector<16x32xbf16>, vector<8x32xf32> -> vector<8x32xf32>
    %115 = arith.addf %111, %114 : vector<8x32xf32>
    %c0_102 = arith.constant 0 : index
    %c2_103 = arith.constant 2 : index
    %c1_104 = arith.constant 1 : index
    %c0_105 = arith.constant 0 : index
    %116 = vector.load %arg1[%c0_102, %c2_103, %c1_104, %c0_105] : memref<1x10x10x16xbf16, #tpu.memory_space<vmem>>, vector<1x1x8x16xbf16>
    %117 = vector.shape_cast %116 : vector<1x1x8x16xbf16> to vector<8x16xbf16>
    %cst_106 = arith.constant dense<0.000000e+00> : vector<8x32xf32>
    %118 = tpu.matmul %117, %10, %cst_106 {dimension_numbers = #tpu.dot_dimension_numbers<[1], [0], [0], [1], [0, 0, 1, 1], [], []>} : vector<8x16xbf16>, vector<16x32xbf16>, vector<8x32xf32> -> vector<8x32xf32>
    %119 = arith.addf %115, %118 : vector<8x32xf32>
    %c0_107 = arith.constant 0 : index
    %c2_108 = arith.constant 2 : index
    %c2_109 = arith.constant 2 : index
    %c0_110 = arith.constant 0 : index
    %120 = vector.load %arg1[%c0_107, %c2_108, %c2_109, %c0_110] : memref<1x10x10x16xbf16, #tpu.memory_space<vmem>>, vector<1x1x8x16xbf16>
    %121 = vector.shape_cast %120 : vector<1x1x8x16xbf16> to vector<8x16xbf16>
    %cst_111 = arith.constant dense<0.000000e+00> : vector<8x32xf32>
    %122 = tpu.matmul %121, %12, %cst_111 {dimension_numbers = #tpu.dot_dimension_numbers<[1], [0], [0], [1], [0, 0, 1, 1], [], []>} : vector<8x16xbf16>, vector<16x32xbf16>, vector<8x32xf32> -> vector<8x32xf32>
    %123 = arith.addf %119, %122 : vector<8x32xf32>
    %c0_112 = arith.constant 0 : index
    %c3_113 = arith.constant 3 : index
    %c0_114 = arith.constant 0 : index
    %c0_115 = arith.constant 0 : index
    %124 = vector.load %arg1[%c0_112, %c3_113, %c0_114, %c0_115] : memref<1x10x10x16xbf16, #tpu.memory_space<vmem>>, vector<1x1x8x16xbf16>
    %125 = vector.shape_cast %124 : vector<1x1x8x16xbf16> to vector<8x16xbf16>
    %cst_116 = arith.constant dense<0.000000e+00> : vector<8x32xf32>
    %126 = tpu.matmul %125, %14, %cst_116 {dimension_numbers = #tpu.dot_dimension_numbers<[1], [0], [0], [1], [0, 0, 1, 1], [], []>} : vector<8x16xbf16>, vector<16x32xbf16>, vector<8x32xf32> -> vector<8x32xf32>
    %127 = arith.addf %123, %126 : vector<8x32xf32>
    %c0_117 = arith.constant 0 : index
    %c3_118 = arith.constant 3 : index
    %c1_119 = arith.constant 1 : index
    %c0_120 = arith.constant 0 : index
    %128 = vector.load %arg1[%c0_117, %c3_118, %c1_119, %c0_120] : memref<1x10x10x16xbf16, #tpu.memory_space<vmem>>, vector<1x1x8x16xbf16>
    %129 = vector.shape_cast %128 : vector<1x1x8x16xbf16> to vector<8x16xbf16>
    %cst_121 = arith.constant dense<0.000000e+00> : vector<8x32xf32>
    %130 = tpu.matmul %129, %16, %cst_121 {dimension_numbers = #tpu.dot_dimension_numbers<[1], [0], [0], [1], [0, 0, 1, 1], [], []>} : vector<8x16xbf16>, vector<16x32xbf16>, vector<8x32xf32> -> vector<8x32xf32>
    %131 = arith.addf %127, %130 : vector<8x32xf32>
    %c0_122 = arith.constant 0 : index
    %c3_123 = arith.constant 3 : index
    %c2_124 = arith.constant 2 : index
    %c0_125 = arith.constant 0 : index
    %132 = vector.load %arg1[%c0_122, %c3_123, %c2_124, %c0_125] : memref<1x10x10x16xbf16, #tpu.memory_space<vmem>>, vector<1x1x8x16xbf16>
    %133 = vector.shape_cast %132 : vector<1x1x8x16xbf16> to vector<8x16xbf16>
    %cst_126 = arith.constant dense<0.000000e+00> : vector<8x32xf32>
    %134 = tpu.matmul %133, %18, %cst_126 {dimension_numbers = #tpu.dot_dimension_numbers<[1], [0], [0], [1], [0, 0, 1, 1], [], []>} : vector<8x16xbf16>, vector<16x32xbf16>, vector<8x32xf32> -> vector<8x32xf32>
    %135 = arith.addf %131, %134 : vector<8x32xf32>
    %cst_127 = arith.constant 5.000000e-01 : f32
    %136 = vector.broadcast %cst_127 : f32 to vector<8x32xf32>
    %137 = arith.mulf %136, %135 : vector<8x32xf32>
    %cst_128 = arith.constant 0.707106769 : f32
    %138 = vector.broadcast %cst_128 : f32 to vector<8x32xf32>
    %139 = arith.mulf %135, %138 : vector<8x32xf32>
    %140 = math.absf %139 : vector<8x32xf32>
    %cst_129 = arith.constant 0.327591091 : f32
    %141 = vector.broadcast %cst_129 : f32 to vector<8x32xf32>
    %142 = arith.mulf %141, %140 : vector<8x32xf32>
    %cst_130 = arith.constant 1.000000e+00 : f32
    %143 = vector.broadcast %cst_130 : f32 to vector<8x32xf32>
    %144 = arith.addf %143, %142 : vector<8x32xf32>
    %145 = tpu.reciprocal %144 {approx = true} : vector<8x32xf32> -> vector<8x32xf32>
    %cst_131 = arith.constant 1.06140542 : f32
    %146 = vector.broadcast %cst_131 : f32 to vector<8x32xf32>
    %147 = arith.mulf %146, %145 : vector<8x32xf32>
    %cst_132 = arith.constant -1.45315206 : f32
    %148 = vector.broadcast %cst_132 : f32 to vector<8x32xf32>
    %149 = arith.addf %147, %148 : vector<8x32xf32>
    %150 = arith.mulf %149, %145 : vector<8x32xf32>
    %cst_133 = arith.constant 1.42141378 : f32
    %151 = vector.broadcast %cst_133 : f32 to vector<8x32xf32>
    %152 = arith.addf %150, %151 : vector<8x32xf32>
    %153 = arith.mulf %152, %145 : vector<8x32xf32>
    %cst_134 = arith.constant -0.284496725 : f32
    %154 = vector.broadcast %cst_134 : f32 to vector<8x32xf32>
    %155 = arith.addf %153, %154 : vector<8x32xf32>
    %156 = arith.mulf %155, %145 : vector<8x32xf32>
    %cst_135 = arith.constant 0.254829586 : f32
    %157 = vector.broadcast %cst_135 : f32 to vector<8x32xf32>
    %158 = arith.addf %156, %157 : vector<8x32xf32>
    %159 = arith.mulf %158, %145 : vector<8x32xf32>
    %cst_136 = arith.constant 0.000000e+00 : f32
    %160 = vector.broadcast %cst_136 : f32 to vector<8x32xf32>
    %161 = arith.subf %160, %140 : vector<8x32xf32>
    %162 = arith.mulf %161, %140 : vector<8x32xf32>
    %163 = math.exp %162 : vector<8x32xf32>
    %164 = arith.mulf %159, %163 : vector<8x32xf32>
    %cst_137 = arith.constant 1.000000e+00 : f32
    %165 = vector.broadcast %cst_137 : f32 to vector<8x32xf32>
    %166 = arith.subf %165, %164 : vector<8x32xf32>
    %cst_138 = arith.constant 0.000000e+00 : f32
    %167 = vector.broadcast %cst_138 : f32 to vector<8x32xf32>
    %168 = arith.cmpf oge, %139, %167 : vector<8x32xf32>
    %cst_139 = arith.constant 0.000000e+00 : f32
    %169 = vector.broadcast %cst_139 : f32 to vector<8x32xf32>
    %170 = arith.subf %169, %166 : vector<8x32xf32>
    %171 = arith.select %168, %166, %170 : vector<8x32xi1>, vector<8x32xf32>
    %cst_140 = arith.constant 1.000000e+00 : f32
    %172 = vector.broadcast %cst_140 : f32 to vector<8x32xf32>
    %173 = arith.addf %172, %171 : vector<8x32xf32>
    %174 = arith.mulf %137, %173 : vector<8x32xf32>
    %175 = arith.truncf %174 : vector<8x32xf32> to vector<8x32xbf16>
    %c0_141 = arith.constant 0 : index
    %c1_142 = arith.constant 1 : index
    %c0_143 = arith.constant 0 : index
    %c0_144 = arith.constant 0 : index
    %176 = vector.load %arg4[%c0_141, %c1_142, %c0_143, %c0_144] : memref<1x8x8x32xbf16, #tpu.memory_space<vmem>>, vector<1x1x8x32xbf16>
    %177 = vector.shape_cast %176 : vector<1x1x8x32xbf16> to vector<8x32xbf16>
    %178 = vector.shape_cast %175 : vector<8x32xbf16> to vector<1x1x8x32xbf16>
    tpu.vector_store %arg4[%c0_141, %c1_142, %c0_143, %c0_144], %178 {strides = array<i32>} : memref<1x8x8x32xbf16, #tpu.memory_space<vmem>>, vector<1x1x8x32xbf16>,
    %c0_145 = arith.constant 0 : index
    %c2_146 = arith.constant 2 : index
    %c0_147 = arith.constant 0 : index
    %c0_148 = arith.constant 0 : index
    %179 = vector.load %arg1[%c0_145, %c2_146, %c0_147, %c0_148] : memref<1x10x10x16xbf16, #tpu.memory_space<vmem>>, vector<1x1x8x16xbf16>
    %180 = vector.shape_cast %179 : vector<1x1x8x16xbf16> to vector<8x16xbf16>
    %cst_149 = arith.constant dense<0.000000e+00> : vector<8x32xf32>
    %181 = tpu.matmul %180, %2, %cst_149 {dimension_numbers = #tpu.dot_dimension_numbers<[1], [0], [0], [1], [0, 0, 1, 1], [], []>} : vector<8x16xbf16>, vector<16x32xbf16>, vector<8x32xf32> -> vector<8x32xf32>
    %182 = vector.broadcast %0 : vector<1x32xf32> to vector<8x32xf32>
    %183 = arith.addf %182, %181 : vector<8x32xf32>
    %c0_150 = arith.constant 0 : index
    %c2_151 = arith.constant 2 : index
    %c1_152 = arith.constant 1 : index
    %c0_153 = arith.constant 0 : index
    %184 = vector.load %arg1[%c0_150, %c2_151, %c1_152, %c0_153] : memref<1x10x10x16xbf16, #tpu.memory_space<vmem>>, vector<1x1x8x16xbf16>
    %185 = vector.shape_cast %184 : vector<1x1x8x16xbf16> to vector<8x16xbf16>
    %cst_154 = arith.constant dense<0.000000e+00> : vector<8x32xf32>
    %186 = tpu.matmul %185, %4, %cst_154 {dimension_numbers = #tpu.dot_dimension_numbers<[1], [0], [0], [1], [0, 0, 1, 1], [], []>} : vector<8x16xbf16>, vector<16x32xbf16>, vector<8x32xf32> -> vector<8x32xf32>
    %187 = arith.addf %183, %186 : vector<8x32xf32>
    %c0_155 = arith.constant 0 : index
    %c2_156 = arith.constant 2 : index
    %c2_157 = arith.constant 2 : index
    %c0_158 = arith.constant 0 : index
    %188 = vector.load %arg1[%c0_155, %c2_156, %c2_157, %c0_158] : memref<1x10x10x16xbf16, #tpu.memory_space<vmem>>, vector<1x1x8x16xbf16>
    %189 = vector.shape_cast %188 : vector<1x1x8x16xbf16> to vector<8x16xbf16>
    %cst_159 = arith.constant dense<0.000000e+00> : vector<8x32xf32>
    %190 = tpu.matmul %189, %6, %cst_159 {dimension_numbers = #tpu.dot_dimension_numbers<[1], [0], [0], [1], [0, 0, 1, 1], [], []>} : vector<8x16xbf16>, vector<16x32xbf16>, vector<8x32xf32> -> vector<8x32xf32>
    %191 = arith.addf %187, %190 : vector<8x32xf32>
    %c0_160 = arith.constant 0 : index
    %c3_161 = arith.constant 3 : index
    %c0_162 = arith.constant 0 : index
    %c0_163 = arith.constant 0 : index
    %192 = vector.load %arg1[%c0_160, %c3_161, %c0_162, %c0_163] : memref<1x10x10x16xbf16, #tpu.memory_space<vmem>>, vector<1x1x8x16xbf16>
    %193 = vector.shape_cast %192 : vector<1x1x8x16xbf16> to vector<8x16xbf16>
    %cst_164 = arith.constant dense<0.000000e+00> : vector<8x32xf32>
    %194 = tpu.matmul %193, %8, %cst_164 {dimension_numbers = #tpu.dot_dimension_numbers<[1], [0], [0], [1], [0, 0, 1, 1], [], []>} : vector<8x16xbf16>, vector<16x32xbf16>, vector<8x32xf32> -> vector<8x32xf32>
    %195 = arith.addf %191, %194 : vector<8x32xf32>
    %c0_165 = arith.constant 0 : index
    %c3_166 = arith.constant 3 : index
    %c1_167 = arith.constant 1 : index
    %c0_168 = arith.constant 0 : index
    %196 = vector.load %arg1[%c0_165, %c3_166, %c1_167, %c0_168] : memref<1x10x10x16xbf16, #tpu.memory_space<vmem>>, vector<1x1x8x16xbf16>
    %197 = vector.shape_cast %196 : vector<1x1x8x16xbf16> to vector<8x16xbf16>
    %cst_169 = arith.constant dense<0.000000e+00> : vector<8x32xf32>
    %198 = tpu.matmul %197, %10, %cst_169 {dimension_numbers = #tpu.dot_dimension_numbers<[1], [0], [0], [1], [0, 0, 1, 1], [], []>} : vector<8x16xbf16>, vector<16x32xbf16>, vector<8x32xf32> -> vector<8x32xf32>
    %199 = arith.addf %195, %198 : vector<8x32xf32>
    %c0_170 = arith.constant 0 : index
    %c3_171 = arith.constant 3 : index
    %c2_172 = arith.constant 2 : index
    %c0_173 = arith.constant 0 : index
    %200 = vector.load %arg1[%c0_170, %c3_171, %c2_172, %c0_173] : memref<1x10x10x16xbf16, #tpu.memory_space<vmem>>, vector<1x1x8x16xbf16>
    %201 = vector.shape_cast %200 : vector<1x1x8x16xbf16> to vector<8x16xbf16>
    %cst_174 = arith.constant dense<0.000000e+00> : vector<8x32xf32>
    %202 = tpu.matmul %201, %12, %cst_174 {dimension_numbers = #tpu.dot_dimension_numbers<[1], [0], [0], [1], [0, 0, 1, 1], [], []>} : vector<8x16xbf16>, vector<16x32xbf16>, vector<8x32xf32> -> vector<8x32xf32>
    %203 = arith.addf %199, %202 : vector<8x32xf32>
    %c0_175 = arith.constant 0 : index
    %c4_176 = arith.constant 4 : index
    %c0_177 = arith.constant 0 : index
    %c0_178 = arith.constant 0 : index
    %204 = vector.load %arg1[%c0_175, %c4_176, %c0_177, %c0_178] : memref<1x10x10x16xbf16, #tpu.memory_space<vmem>>, vector<1x1x8x16xbf16>
    %205 = vector.shape_cast %204 : vector<1x1x8x16xbf16> to vector<8x16xbf16>
    %cst_179 = arith.constant dense<0.000000e+00> : vector<8x32xf32>
    %206 = tpu.matmul %205, %14, %cst_179 {dimension_numbers = #tpu.dot_dimension_numbers<[1], [0], [0], [1], [0, 0, 1, 1], [], []>} : vector<8x16xbf16>, vector<16x32xbf16>, vector<8x32xf32> -> vector<8x32xf32>
    %207 = arith.addf %203, %206 : vector<8x32xf32>
    %c0_180 = arith.constant 0 : index
    %c4_181 = arith.constant 4 : index
    %c1_182 = arith.constant 1 : index
    %c0_183 = arith.constant 0 : index
    %208 = vector.load %arg1[%c0_180, %c4_181, %c1_182, %c0_183] : memref<1x10x10x16xbf16, #tpu.memory_space<vmem>>, vector<1x1x8x16xbf16>
    %209 = vector.shape_cast %208 : vector<1x1x8x16xbf16> to vector<8x16xbf16>
    %cst_184 = arith.constant dense<0.000000e+00> : vector<8x32xf32>
    %210 = tpu.matmul %209, %16, %cst_184 {dimension_numbers = #tpu.dot_dimension_numbers<[1], [0], [0], [1], [0, 0, 1, 1], [], []>} : vector<8x16xbf16>, vector<16x32xbf16>, vector<8x32xf32> -> vector<8x32xf32>
    %211 = arith.addf %207, %210 : vector<8x32xf32>
    %c0_185 = arith.constant 0 : index
    %c4_186 = arith.constant 4 : index
    %c2_187 = arith.constant 2 : index
    %c0_188 = arith.constant 0 : index
    %212 = vector.load %arg1[%c0_185, %c4_186, %c2_187, %c0_188] : memref<1x10x10x16xbf16, #tpu.memory_space<vmem>>, vector<1x1x8x16xbf16>
    %213 = vector.shape_cast %212 : vector<1x1x8x16xbf16> to vector<8x16xbf16>
    %cst_189 = arith.constant dense<0.000000e+00> : vector<8x32xf32>
    %214 = tpu.matmul %213, %18, %cst_189 {dimension_numbers = #tpu.dot_dimension_numbers<[1], [0], [0], [1], [0, 0, 1, 1], [], []>} : vector<8x16xbf16>, vector<16x32xbf16>, vector<8x32xf32> -> vector<8x32xf32>
    %215 = arith.addf %211, %214 : vector<8x32xf32>
    %cst_190 = arith.constant 5.000000e-01 : f32
    %216 = vector.broadcast %cst_190 : f32 to vector<8x32xf32>
    %217 = arith.mulf %216, %215 : vector<8x32xf32>
    %cst_191 = arith.constant 0.707106769 : f32
    %218 = vector.broadcast %cst_191 : f32 to vector<8x32xf32>
    %219 = arith.mulf %215, %218 : vector<8x32xf32>
    %220 = math.absf %219 : vector<8x32xf32>
    %cst_192 = arith.constant 0.327591091 : f32
    %221 = vector.broadcast %cst_192 : f32 to vector<8x32xf32>
    %222 = arith.mulf %221, %220 : vector<8x32xf32>
    %cst_193 = arith.constant 1.000000e+00 : f32
    %223 = vector.broadcast %cst_193 : f32 to vector<8x32xf32>
    %224 = arith.addf %223, %222 : vector<8x32xf32>
    %225 = tpu.reciprocal %224 {approx = true} : vector<8x32xf32> -> vector<8x32xf32>
    %cst_194 = arith.constant 1.06140542 : f32
    %226 = vector.broadcast %cst_194 : f32 to vector<8x32xf32>
    %227 = arith.mulf %226, %225 : vector<8x32xf32>
    %cst_195 = arith.constant -1.45315206 : f32
    %228 = vector.broadcast %cst_195 : f32 to vector<8x32xf32>
    %229 = arith.addf %227, %228 : vector<8x32xf32>
    %230 = arith.mulf %229, %225 : vector<8x32xf32>
    %cst_196 = arith.constant 1.42141378 : f32
    %231 = vector.broadcast %cst_196 : f32 to vector<8x32xf32>
    %232 = arith.addf %230, %231 : vector<8x32xf32>
    %233 = arith.mulf %232, %225 : vector<8x32xf32>
    %cst_197 = arith.constant -0.284496725 : f32
    %234 = vector.broadcast %cst_197 : f32 to vector<8x32xf32>
    %235 = arith.addf %233, %234 : vector<8x32xf32>
    %236 = arith.mulf %235, %225 : vector<8x32xf32>
    %cst_198 = arith.constant 0.254829586 : f32
    %237 = vector.broadcast %cst_198 : f32 to vector<8x32xf32>
    %238 = arith.addf %236, %237 : vector<8x32xf32>
    %239 = arith.mulf %238, %225 : vector<8x32xf32>
    %cst_199 = arith.constant 0.000000e+00 : f32
    %240 = vector.broadcast %cst_199 : f32 to vector<8x32xf32>
    %241 = arith.subf %240, %220 : vector<8x32xf32>
    %242 = arith.mulf %241, %220 : vector<8x32xf32>
    %243 = math.exp %242 : vector<8x32xf32>
    %244 = arith.mulf %239, %243 : vector<8x32xf32>
    %cst_200 = arith.constant 1.000000e+00 : f32
    %245 = vector.broadcast %cst_200 : f32 to vector<8x32xf32>
    %246 = arith.subf %245, %244 : vector<8x32xf32>
    %cst_201 = arith.constant 0.000000e+00 : f32
    %247 = vector.broadcast %cst_201 : f32 to vector<8x32xf32>
    %248 = arith.cmpf oge, %219, %247 : vector<8x32xf32>
    %cst_202 = arith.constant 0.000000e+00 : f32
    %249 = vector.broadcast %cst_202 : f32 to vector<8x32xf32>
    %250 = arith.subf %249, %246 : vector<8x32xf32>
    %251 = arith.select %248, %246, %250 : vector<8x32xi1>, vector<8x32xf32>
    %cst_203 = arith.constant 1.000000e+00 : f32
    %252 = vector.broadcast %cst_203 : f32 to vector<8x32xf32>
    %253 = arith.addf %252, %251 : vector<8x32xf32>
    %254 = arith.mulf %217, %253 : vector<8x32xf32>
    %255 = arith.truncf %254 : vector<8x32xf32> to vector<8x32xbf16>
    %c0_204 = arith.constant 0 : index
    %c2_205 = arith.constant 2 : index
    %c0_206 = arith.constant 0 : index
    %c0_207 = arith.constant 0 : index
    %256 = vector.load %arg4[%c0_204, %c2_205, %c0_206, %c0_207] : memref<1x8x8x32xbf16, #tpu.memory_space<vmem>>, vector<1x1x8x32xbf16>
    %257 = vector.shape_cast %256 : vector<1x1x8x32xbf16> to vector<8x32xbf16>
    %258 = vector.shape_cast %255 : vector<8x32xbf16> to vector<1x1x8x32xbf16>
    tpu.vector_store %arg4[%c0_204, %c2_205, %c0_206, %c0_207], %258 {strides = array<i32>} : memref<1x8x8x32xbf16, #tpu.memory_space<vmem>>, vector<1x1x8x32xbf16>,
    %c0_208 = arith.constant 0 : index
    %c3_209 = arith.constant 3 : index
    %c0_210 = arith.constant 0 : index
    %c0_211 = arith.constant 0 : index
    %259 = vector.load %arg1[%c0_208, %c3_209, %c0_210, %c0_211] : memref<1x10x10x16xbf16, #tpu.memory_space<vmem>>, vector<1x1x8x16xbf16>
    %260 = vector.shape_cast %259 : vector<1x1x8x16xbf16> to vector<8x16xbf16>
    %cst_212 = arith.constant dense<0.000000e+00> : vector<8x32xf32>
    %261 = tpu.matmul %260, %2, %cst_212 {dimension_numbers = #tpu.dot_dimension_numbers<[1], [0], [0], [1], [0, 0, 1, 1], [], []>} : vector<8x16xbf16>, vector<16x32xbf16>, vector<8x32xf32> -> vector<8x32xf32>
    %262 = vector.broadcast %0 : vector<1x32xf32> to vector<8x32xf32>
    %263 = arith.addf %262, %261 : vector<8x32xf32>
    %c0_213 = arith.constant 0 : index
    %c3_214 = arith.constant 3 : index
    %c1_215 = arith.constant 1 : index
    %c0_216 = arith.constant 0 : index
    %264 = vector.load %arg1[%c0_213, %c3_214, %c1_215, %c0_216] : memref<1x10x10x16xbf16, #tpu.memory_space<vmem>>, vector<1x1x8x16xbf16>
    %265 = vector.shape_cast %264 : vector<1x1x8x16xbf16> to vector<8x16xbf16>
    %cst_217 = arith.constant dense<0.000000e+00> : vector<8x32xf32>
    %266 = tpu.matmul %265, %4, %cst_217 {dimension_numbers = #tpu.dot_dimension_numbers<[1], [0], [0], [1], [0, 0, 1, 1], [], []>} : vector<8x16xbf16>, vector<16x32xbf16>, vector<8x32xf32> -> vector<8x32xf32>
    %267 = arith.addf %263, %266 : vector<8x32xf32>
    %c0_218 = arith.constant 0 : index
    %c3_219 = arith.constant 3 : index
    %c2_220 = arith.constant 2 : index
    %c0_221 = arith.constant 0 : index
    %268 = vector.load %arg1[%c0_218, %c3_219, %c2_220, %c0_221] : memref<1x10x10x16xbf16, #tpu.memory_space<vmem>>, vector<1x1x8x16xbf16>
    %269 = vector.shape_cast %268 : vector<1x1x8x16xbf16> to vector<8x16xbf16>
    %cst_222 = arith.constant dense<0.000000e+00> : vector<8x32xf32>
    %270 = tpu.matmul %269, %6, %cst_222 {dimension_numbers = #tpu.dot_dimension_numbers<[1], [0], [0], [1], [0, 0, 1, 1], [], []>} : vector<8x16xbf16>, vector<16x32xbf16>, vector<8x32xf32> -> vector<8x32xf32>
    %271 = arith.addf %267, %270 : vector<8x32xf32>
    %c0_223 = arith.constant 0 : index
    %c4_224 = arith.constant 4 : index
    %c0_225 = arith.constant 0 : index
    %c0_226 = arith.constant 0 : index
    %272 = vector.load %arg1[%c0_223, %c4_224, %c0_225, %c0_226] : memref<1x10x10x16xbf16, #tpu.memory_space<vmem>>, vector<1x1x8x16xbf16>
    %273 = vector.shape_cast %272 : vector<1x1x8x16xbf16> to vector<8x16xbf16>
    %cst_227 = arith.constant dense<0.000000e+00> : vector<8x32xf32>
    %274 = tpu.matmul %273, %8, %cst_227 {dimension_numbers = #tpu.dot_dimension_numbers<[1], [0], [0], [1], [0, 0, 1, 1], [], []>} : vector<8x16xbf16>, vector<16x32xbf16>, vector<8x32xf32> -> vector<8x32xf32>
    %275 = arith.addf %271, %274 : vector<8x32xf32>
    %c0_228 = arith.constant 0 : index
    %c4_229 = arith.constant 4 : index
    %c1_230 = arith.constant 1 : index
    %c0_231 = arith.constant 0 : index
    %276 = vector.load %arg1[%c0_228, %c4_229, %c1_230, %c0_231] : memref<1x10x10x16xbf16, #tpu.memory_space<vmem>>, vector<1x1x8x16xbf16>
    %277 = vector.shape_cast %276 : vector<1x1x8x16xbf16> to vector<8x16xbf16>
    %cst_232 = arith.constant dense<0.000000e+00> : vector<8x32xf32>
    %278 = tpu.matmul %277, %10, %cst_232 {dimension_numbers = #tpu.dot_dimension_numbers<[1], [0], [0], [1], [0, 0, 1, 1], [], []>} : vector<8x16xbf16>, vector<16x32xbf16>, vector<8x32xf32> -> vector<8x32xf32>
    %279 = arith.addf %275, %278 : vector<8x32xf32>
    %c0_233 = arith.constant 0 : index
    %c4_234 = arith.constant 4 : index
    %c2_235 = arith.constant 2 : index
    %c0_236 = arith.constant 0 : index
    %280 = vector.load %arg1[%c0_233, %c4_234, %c2_235, %c0_236] : memref<1x10x10x16xbf16, #tpu.memory_space<vmem>>, vector<1x1x8x16xbf16>
    %281 = vector.shape_cast %280 : vector<1x1x8x16xbf16> to vector<8x16xbf16>
    %cst_237 = arith.constant dense<0.000000e+00> : vector<8x32xf32>
    %282 = tpu.matmul %281, %12, %cst_237 {dimension_numbers = #tpu.dot_dimension_numbers<[1], [0], [0], [1], [0, 0, 1, 1], [], []>} : vector<8x16xbf16>, vector<16x32xbf16>, vector<8x32xf32> -> vector<8x32xf32>
    %283 = arith.addf %279, %282 : vector<8x32xf32>
    %c0_238 = arith.constant 0 : index
    %c5_239 = arith.constant 5 : index
    %c0_240 = arith.constant 0 : index
    %c0_241 = arith.constant 0 : index
    %284 = vector.load %arg1[%c0_238, %c5_239, %c0_240, %c0_241] : memref<1x10x10x16xbf16, #tpu.memory_space<vmem>>, vector<1x1x8x16xbf16>
    %285 = vector.shape_cast %284 : vector<1x1x8x16xbf16> to vector<8x16xbf16>
    %cst_242 = arith.constant dense<0.000000e+00> : vector<8x32xf32>
    %286 = tpu.matmul %285, %14, %cst_242 {dimension_numbers = #tpu.dot_dimension_numbers<[1], [0], [0], [1], [0, 0, 1, 1], [], []>} : vector<8x16xbf16>, vector<16x32xbf16>, vector<8x32xf32> -> vector<8x32xf32>
    %287 = arith.addf %283, %286 : vector<8x32xf32>
    %c0_243 = arith.constant 0 : index
    %c5_244 = arith.constant 5 : index
    %c1_245 = arith.constant 1 : index
    %c0_246 = arith.constant 0 : index
    %288 = vector.load %arg1[%c0_243, %c5_244, %c1_245, %c0_246] : memref<1x10x10x16xbf16, #tpu.memory_space<vmem>>, vector<1x1x8x16xbf16>
    %289 = vector.shape_cast %288 : vector<1x1x8x16xbf16> to vector<8x16xbf16>
    %cst_247 = arith.constant dense<0.000000e+00> : vector<8x32xf32>
    %290 = tpu.matmul %289, %16, %cst_247 {dimension_numbers = #tpu.dot_dimension_numbers<[1], [0], [0], [1], [0, 0, 1, 1], [], []>} : vector<8x16xbf16>, vector<16x32xbf16>, vector<8x32xf32> -> vector<8x32xf32>
    %291 = arith.addf %287, %290 : vector<8x32xf32>
    %c0_248 = arith.constant 0 : index
    %c5_249 = arith.constant 5 : index
    %c2_250 = arith.constant 2 : index
    %c0_251 = arith.constant 0 : index
    %292 = vector.load %arg1[%c0_248, %c5_249, %c2_250, %c0_251] : memref<1x10x10x16xbf16, #tpu.memory_space<vmem>>, vector<1x1x8x16xbf16>
    %293 = vector.shape_cast %292 : vector<1x1x8x16xbf16> to vector<8x16xbf16>
    %cst_252 = arith.constant dense<0.000000e+00> : vector<8x32xf32>
    %294 = tpu.matmul %293, %18, %cst_252 {dimension_numbers = #tpu.dot_dimension_numbers<[1], [0], [0], [1], [0, 0, 1, 1], [], []>} : vector<8x16xbf16>, vector<16x32xbf16>, vector<8x32xf32> -> vector<8x32xf32>
    %295 = arith.addf %291, %294 : vector<8x32xf32>
    %cst_253 = arith.constant 5.000000e-01 : f32
    %296 = vector.broadcast %cst_253 : f32 to vector<8x32xf32>
    %297 = arith.mulf %296, %295 : vector<8x32xf32>
    %cst_254 = arith.constant 0.707106769 : f32
    %298 = vector.broadcast %cst_254 : f32 to vector<8x32xf32>
    %299 = arith.mulf %295, %298 : vector<8x32xf32>
    %300 = math.absf %299 : vector<8x32xf32>
    %cst_255 = arith.constant 0.327591091 : f32
    %301 = vector.broadcast %cst_255 : f32 to vector<8x32xf32>
    %302 = arith.mulf %301, %300 : vector<8x32xf32>
    %cst_256 = arith.constant 1.000000e+00 : f32
    %303 = vector.broadcast %cst_256 : f32 to vector<8x32xf32>
    %304 = arith.addf %303, %302 : vector<8x32xf32>
    %305 = tpu.reciprocal %304 {approx = true} : vector<8x32xf32> -> vector<8x32xf32>
    %cst_257 = arith.constant 1.06140542 : f32
    %306 = vector.broadcast %cst_257 : f32 to vector<8x32xf32>
    %307 = arith.mulf %306, %305 : vector<8x32xf32>
    %cst_258 = arith.constant -1.45315206 : f32
    %308 = vector.broadcast %cst_258 : f32 to vector<8x32xf32>
    %309 = arith.addf %307, %308 : vector<8x32xf32>
    %310 = arith.mulf %309, %305 : vector<8x32xf32>
    %cst_259 = arith.constant 1.42141378 : f32
    %311 = vector.broadcast %cst_259 : f32 to vector<8x32xf32>
    %312 = arith.addf %310, %311 : vector<8x32xf32>
    %313 = arith.mulf %312, %305 : vector<8x32xf32>
    %cst_260 = arith.constant -0.284496725 : f32
    %314 = vector.broadcast %cst_260 : f32 to vector<8x32xf32>
    %315 = arith.addf %313, %314 : vector<8x32xf32>
    %316 = arith.mulf %315, %305 : vector<8x32xf32>
    %cst_261 = arith.constant 0.254829586 : f32
    %317 = vector.broadcast %cst_261 : f32 to vector<8x32xf32>
    %318 = arith.addf %316, %317 : vector<8x32xf32>
    %319 = arith.mulf %318, %305 : vector<8x32xf32>
    %cst_262 = arith.constant 0.000000e+00 : f32
    %320 = vector.broadcast %cst_262 : f32 to vector<8x32xf32>
    %321 = arith.subf %320, %300 : vector<8x32xf32>
    %322 = arith.mulf %321, %300 : vector<8x32xf32>
    %323 = math.exp %322 : vector<8x32xf32>
    %324 = arith.mulf %319, %323 : vector<8x32xf32>
    %cst_263 = arith.constant 1.000000e+00 : f32
    %325 = vector.broadcast %cst_263 : f32 to vector<8x32xf32>
    %326 = arith.subf %325, %324 : vector<8x32xf32>
    %cst_264 = arith.constant 0.000000e+00 : f32
    %327 = vector.broadcast %cst_264 : f32 to vector<8x32xf32>
    %328 = arith.cmpf oge, %299, %327 : vector<8x32xf32>
    %cst_265 = arith.constant 0.000000e+00 : f32
    %329 = vector.broadcast %cst_265 : f32 to vector<8x32xf32>
    %330 = arith.subf %329, %326 : vector<8x32xf32>
    %331 = arith.select %328, %326, %330 : vector<8x32xi1>, vector<8x32xf32>
    %cst_266 = arith.constant 1.000000e+00 : f32
    %332 = vector.broadcast %cst_266 : f32 to vector<8x32xf32>
    %333 = arith.addf %332, %331 : vector<8x32xf32>
    %334 = arith.mulf %297, %333 : vector<8x32xf32>
    %335 = arith.truncf %334 : vector<8x32xf32> to vector<8x32xbf16>
    %c0_267 = arith.constant 0 : index
    %c3_268 = arith.constant 3 : index
    %c0_269 = arith.constant 0 : index
    %c0_270 = arith.constant 0 : index
    %336 = vector.load %arg4[%c0_267, %c3_268, %c0_269, %c0_270] : memref<1x8x8x32xbf16, #tpu.memory_space<vmem>>, vector<1x1x8x32xbf16>
    %337 = vector.shape_cast %336 : vector<1x1x8x32xbf16> to vector<8x32xbf16>
    %338 = vector.shape_cast %335 : vector<8x32xbf16> to vector<1x1x8x32xbf16>
    tpu.vector_store %arg4[%c0_267, %c3_268, %c0_269, %c0_270], %338 {strides = array<i32>} : memref<1x8x8x32xbf16, #tpu.memory_space<vmem>>, vector<1x1x8x32xbf16>,
    %c0_271 = arith.constant 0 : index
    %c4_272 = arith.constant 4 : index
    %c0_273 = arith.constant 0 : index
    %c0_274 = arith.constant 0 : index
    %339 = vector.load %arg1[%c0_271, %c4_272, %c0_273, %c0_274] : memref<1x10x10x16xbf16, #tpu.memory_space<vmem>>, vector<1x1x8x16xbf16>
    %340 = vector.shape_cast %339 : vector<1x1x8x16xbf16> to vector<8x16xbf16>
    %cst_275 = arith.constant dense<0.000000e+00> : vector<8x32xf32>
    %341 = tpu.matmul %340, %2, %cst_275 {dimension_numbers = #tpu.dot_dimension_numbers<[1], [0], [0], [1], [0, 0, 1, 1], [], []>} : vector<8x16xbf16>, vector<16x32xbf16>, vector<8x32xf32> -> vector<8x32xf32>
    %342 = vector.broadcast %0 : vector<1x32xf32> to vector<8x32xf32>
    %343 = arith.addf %342, %341 : vector<8x32xf32>
    %c0_276 = arith.constant 0 : index
    %c4_277 = arith.constant 4 : index
    %c1_278 = arith.constant 1 : index
    %c0_279 = arith.constant 0 : index
    %344 = vector.load %arg1[%c0_276, %c4_277, %c1_278, %c0_279] : memref<1x10x10x16xbf16, #tpu.memory_space<vmem>>, vector<1x1x8x16xbf16>
    %345 = vector.shape_cast %344 : vector<1x1x8x16xbf16> to vector<8x16xbf16>
    %cst_280 = arith.constant dense<0.000000e+00> : vector<8x32xf32>
    %346 = tpu.matmul %345, %4, %cst_280 {dimension_numbers = #tpu.dot_dimension_numbers<[1], [0], [0], [1], [0, 0, 1, 1], [], []>} : vector<8x16xbf16>, vector<16x32xbf16>, vector<8x32xf32> -> vector<8x32xf32>
    %347 = arith.addf %343, %346 : vector<8x32xf32>
    %c0_281 = arith.constant 0 : index
    %c4_282 = arith.constant 4 : index
    %c2_283 = arith.constant 2 : index
    %c0_284 = arith.constant 0 : index
    %348 = vector.load %arg1[%c0_281, %c4_282, %c2_283, %c0_284] : memref<1x10x10x16xbf16, #tpu.memory_space<vmem>>, vector<1x1x8x16xbf16>
    %349 = vector.shape_cast %348 : vector<1x1x8x16xbf16> to vector<8x16xbf16>
    %cst_285 = arith.constant dense<0.000000e+00> : vector<8x32xf32>
    %350 = tpu.matmul %349, %6, %cst_285 {dimension_numbers = #tpu.dot_dimension_numbers<[1], [0], [0], [1], [0, 0, 1, 1], [], []>} : vector<8x16xbf16>, vector<16x32xbf16>, vector<8x32xf32> -> vector<8x32xf32>
    %351 = arith.addf %347, %350 : vector<8x32xf32>
    %c0_286 = arith.constant 0 : index
    %c5_287 = arith.constant 5 : index
    %c0_288 = arith.constant 0 : index
    %c0_289 = arith.constant 0 : index
    %352 = vector.load %arg1[%c0_286, %c5_287, %c0_288, %c0_289] : memref<1x10x10x16xbf16, #tpu.memory_space<vmem>>, vector<1x1x8x16xbf16>
    %353 = vector.shape_cast %352 : vector<1x1x8x16xbf16> to vector<8x16xbf16>
    %cst_290 = arith.constant dense<0.000000e+00> : vector<8x32xf32>
    %354 = tpu.matmul %353, %8, %cst_290 {dimension_numbers = #tpu.dot_dimension_numbers<[1], [0], [0], [1], [0, 0, 1, 1], [], []>} : vector<8x16xbf16>, vector<16x32xbf16>, vector<8x32xf32> -> vector<8x32xf32>
    %355 = arith.addf %351, %354 : vector<8x32xf32>
    %c0_291 = arith.constant 0 : index
    %c5_292 = arith.constant 5 : index
    %c1_293 = arith.constant 1 : index
    %c0_294 = arith.constant 0 : index
    %356 = vector.load %arg1[%c0_291, %c5_292, %c1_293, %c0_294] : memref<1x10x10x16xbf16, #tpu.memory_space<vmem>>, vector<1x1x8x16xbf16>
    %357 = vector.shape_cast %356 : vector<1x1x8x16xbf16> to vector<8x16xbf16>
    %cst_295 = arith.constant dense<0.000000e+00> : vector<8x32xf32>
    %358 = tpu.matmul %357, %10, %cst_295 {dimension_numbers = #tpu.dot_dimension_numbers<[1], [0], [0], [1], [0, 0, 1, 1], [], []>} : vector<8x16xbf16>, vector<16x32xbf16>, vector<8x32xf32> -> vector<8x32xf32>
    %359 = arith.addf %355, %358 : vector<8x32xf32>
    %c0_296 = arith.constant 0 : index
    %c5_297 = arith.constant 5 : index
    %c2_298 = arith.constant 2 : index
    %c0_299 = arith.constant 0 : index
    %360 = vector.load %arg1[%c0_296, %c5_297, %c2_298, %c0_299] : memref<1x10x10x16xbf16, #tpu.memory_space<vmem>>, vector<1x1x8x16xbf16>
    %361 = vector.shape_cast %360 : vector<1x1x8x16xbf16> to vector<8x16xbf16>
    %cst_300 = arith.constant dense<0.000000e+00> : vector<8x32xf32>
    %362 = tpu.matmul %361, %12, %cst_300 {dimension_numbers = #tpu.dot_dimension_numbers<[1], [0], [0], [1], [0, 0, 1, 1], [], []>} : vector<8x16xbf16>, vector<16x32xbf16>, vector<8x32xf32> -> vector<8x32xf32>
    %363 = arith.addf %359, %362 : vector<8x32xf32>
    %c0_301 = arith.constant 0 : index
    %c6_302 = arith.constant 6 : index
    %c0_303 = arith.constant 0 : index
    %c0_304 = arith.constant 0 : index
    %364 = vector.load %arg1[%c0_301, %c6_302, %c0_303, %c0_304] : memref<1x10x10x16xbf16, #tpu.memory_space<vmem>>, vector<1x1x8x16xbf16>
    %365 = vector.shape_cast %364 : vector<1x1x8x16xbf16> to vector<8x16xbf16>
    %cst_305 = arith.constant dense<0.000000e+00> : vector<8x32xf32>
    %366 = tpu.matmul %365, %14, %cst_305 {dimension_numbers = #tpu.dot_dimension_numbers<[1], [0], [0], [1], [0, 0, 1, 1], [], []>} : vector<8x16xbf16>, vector<16x32xbf16>, vector<8x32xf32> -> vector<8x32xf32>
    %367 = arith.addf %363, %366 : vector<8x32xf32>
    %c0_306 = arith.constant 0 : index
    %c6_307 = arith.constant 6 : index
    %c1_308 = arith.constant 1 : index
    %c0_309 = arith.constant 0 : index
    %368 = vector.load %arg1[%c0_306, %c6_307, %c1_308, %c0_309] : memref<1x10x10x16xbf16, #tpu.memory_space<vmem>>, vector<1x1x8x16xbf16>
    %369 = vector.shape_cast %368 : vector<1x1x8x16xbf16> to vector<8x16xbf16>
    %cst_310 = arith.constant dense<0.000000e+00> : vector<8x32xf32>
    %370 = tpu.matmul %369, %16, %cst_310 {dimension_numbers = #tpu.dot_dimension_numbers<[1], [0], [0], [1], [0, 0, 1, 1], [], []>} : vector<8x16xbf16>, vector<16x32xbf16>, vector<8x32xf32> -> vector<8x32xf32>
    %371 = arith.addf %367, %370 : vector<8x32xf32>
    %c0_311 = arith.constant 0 : index
    %c6_312 = arith.constant 6 : index
    %c2_313 = arith.constant 2 : index
    %c0_314 = arith.constant 0 : index
    %372 = vector.load %arg1[%c0_311, %c6_312, %c2_313, %c0_314] : memref<1x10x10x16xbf16, #tpu.memory_space<vmem>>, vector<1x1x8x16xbf16>
    %373 = vector.shape_cast %372 : vector<1x1x8x16xbf16> to vector<8x16xbf16>
    %cst_315 = arith.constant dense<0.000000e+00> : vector<8x32xf32>
    %374 = tpu.matmul %373, %18, %cst_315 {dimension_numbers = #tpu.dot_dimension_numbers<[1], [0], [0], [1], [0, 0, 1, 1], [], []>} : vector<8x16xbf16>, vector<16x32xbf16>, vector<8x32xf32> -> vector<8x32xf32>
    %375 = arith.addf %371, %374 : vector<8x32xf32>
    %cst_316 = arith.constant 5.000000e-01 : f32
    %376 = vector.broadcast %cst_316 : f32 to vector<8x32xf32>
    %377 = arith.mulf %376, %375 : vector<8x32xf32>
    %cst_317 = arith.constant 0.707106769 : f32
    %378 = vector.broadcast %cst_317 : f32 to vector<8x32xf32>
    %379 = arith.mulf %375, %378 : vector<8x32xf32>
    %380 = math.absf %379 : vector<8x32xf32>
    %cst_318 = arith.constant 0.327591091 : f32
    %381 = vector.broadcast %cst_318 : f32 to vector<8x32xf32>
    %382 = arith.mulf %381, %380 : vector<8x32xf32>
    %cst_319 = arith.constant 1.000000e+00 : f32
    %383 = vector.broadcast %cst_319 : f32 to vector<8x32xf32>
    %384 = arith.addf %383, %382 : vector<8x32xf32>
    %385 = tpu.reciprocal %384 {approx = true} : vector<8x32xf32> -> vector<8x32xf32>
    %cst_320 = arith.constant 1.06140542 : f32
    %386 = vector.broadcast %cst_320 : f32 to vector<8x32xf32>
    %387 = arith.mulf %386, %385 : vector<8x32xf32>
    %cst_321 = arith.constant -1.45315206 : f32
    %388 = vector.broadcast %cst_321 : f32 to vector<8x32xf32>
    %389 = arith.addf %387, %388 : vector<8x32xf32>
    %390 = arith.mulf %389, %385 : vector<8x32xf32>
    %cst_322 = arith.constant 1.42141378 : f32
    %391 = vector.broadcast %cst_322 : f32 to vector<8x32xf32>
    %392 = arith.addf %390, %391 : vector<8x32xf32>
    %393 = arith.mulf %392, %385 : vector<8x32xf32>
    %cst_323 = arith.constant -0.284496725 : f32
    %394 = vector.broadcast %cst_323 : f32 to vector<8x32xf32>
    %395 = arith.addf %393, %394 : vector<8x32xf32>
    %396 = arith.mulf %395, %385 : vector<8x32xf32>
    %cst_324 = arith.constant 0.254829586 : f32
    %397 = vector.broadcast %cst_324 : f32 to vector<8x32xf32>
    %398 = arith.addf %396, %397 : vector<8x32xf32>
    %399 = arith.mulf %398, %385 : vector<8x32xf32>
    %cst_325 = arith.constant 0.000000e+00 : f32
    %400 = vector.broadcast %cst_325 : f32 to vector<8x32xf32>
    %401 = arith.subf %400, %380 : vector<8x32xf32>
    %402 = arith.mulf %401, %380 : vector<8x32xf32>
    %403 = math.exp %402 : vector<8x32xf32>
    %404 = arith.mulf %399, %403 : vector<8x32xf32>
    %cst_326 = arith.constant 1.000000e+00 : f32
    %405 = vector.broadcast %cst_326 : f32 to vector<8x32xf32>
    %406 = arith.subf %405, %404 : vector<8x32xf32>
    %cst_327 = arith.constant 0.000000e+00 : f32
    %407 = vector.broadcast %cst_327 : f32 to vector<8x32xf32>
    %408 = arith.cmpf oge, %379, %407 : vector<8x32xf32>
    %cst_328 = arith.constant 0.000000e+00 : f32
    %409 = vector.broadcast %cst_328 : f32 to vector<8x32xf32>
    %410 = arith.subf %409, %406 : vector<8x32xf32>
    %411 = arith.select %408, %406, %410 : vector<8x32xi1>, vector<8x32xf32>
    %cst_329 = arith.constant 1.000000e+00 : f32
    %412 = vector.broadcast %cst_329 : f32 to vector<8x32xf32>
    %413 = arith.addf %412, %411 : vector<8x32xf32>
    %414 = arith.mulf %377, %413 : vector<8x32xf32>
    %415 = arith.truncf %414 : vector<8x32xf32> to vector<8x32xbf16>
    %c0_330 = arith.constant 0 : index
    %c4_331 = arith.constant 4 : index
    %c0_332 = arith.constant 0 : index
    %c0_333 = arith.constant 0 : index
    %416 = vector.load %arg4[%c0_330, %c4_331, %c0_332, %c0_333] : memref<1x8x8x32xbf16, #tpu.memory_space<vmem>>, vector<1x1x8x32xbf16>
    %417 = vector.shape_cast %416 : vector<1x1x8x32xbf16> to vector<8x32xbf16>
    %418 = vector.shape_cast %415 : vector<8x32xbf16> to vector<1x1x8x32xbf16>
    tpu.vector_store %arg4[%c0_330, %c4_331, %c0_332, %c0_333], %418 {strides = array<i32>} : memref<1x8x8x32xbf16, #tpu.memory_space<vmem>>, vector<1x1x8x32xbf16>,
    %c0_334 = arith.constant 0 : index
    %c5_335 = arith.constant 5 : index
    %c0_336 = arith.constant 0 : index
    %c0_337 = arith.constant 0 : index
    %419 = vector.load %arg1[%c0_334, %c5_335, %c0_336, %c0_337] : memref<1x10x10x16xbf16, #tpu.memory_space<vmem>>, vector<1x1x8x16xbf16>
    %420 = vector.shape_cast %419 : vector<1x1x8x16xbf16> to vector<8x16xbf16>
    %cst_338 = arith.constant dense<0.000000e+00> : vector<8x32xf32>
    %421 = tpu.matmul %420, %2, %cst_338 {dimension_numbers = #tpu.dot_dimension_numbers<[1], [0], [0], [1], [0, 0, 1, 1], [], []>} : vector<8x16xbf16>, vector<16x32xbf16>, vector<8x32xf32> -> vector<8x32xf32>
    %422 = vector.broadcast %0 : vector<1x32xf32> to vector<8x32xf32>
    %423 = arith.addf %422, %421 : vector<8x32xf32>
    %c0_339 = arith.constant 0 : index
    %c5_340 = arith.constant 5 : index
    %c1_341 = arith.constant 1 : index
    %c0_342 = arith.constant 0 : index
    %424 = vector.load %arg1[%c0_339, %c5_340, %c1_341, %c0_342] : memref<1x10x10x16xbf16, #tpu.memory_space<vmem>>, vector<1x1x8x16xbf16>
    %425 = vector.shape_cast %424 : vector<1x1x8x16xbf16> to vector<8x16xbf16>
    %cst_343 = arith.constant dense<0.000000e+00> : vector<8x32xf32>
    %426 = tpu.matmul %425, %4, %cst_343 {dimension_numbers = #tpu.dot_dimension_numbers<[1], [0], [0], [1], [0, 0, 1, 1], [], []>} : vector<8x16xbf16>, vector<16x32xbf16>, vector<8x32xf32> -> vector<8x32xf32>
    %427 = arith.addf %423, %426 : vector<8x32xf32>
    %c0_344 = arith.constant 0 : index
    %c5_345 = arith.constant 5 : index
    %c2_346 = arith.constant 2 : index
    %c0_347 = arith.constant 0 : index
    %428 = vector.load %arg1[%c0_344, %c5_345, %c2_346, %c0_347] : memref<1x10x10x16xbf16, #tpu.memory_space<vmem>>, vector<1x1x8x16xbf16>
    %429 = vector.shape_cast %428 : vector<1x1x8x16xbf16> to vector<8x16xbf16>
    %cst_348 = arith.constant dense<0.000000e+00> : vector<8x32xf32>
    %430 = tpu.matmul %429, %6, %cst_348 {dimension_numbers = #tpu.dot_dimension_numbers<[1], [0], [0], [1], [0, 0, 1, 1], [], []>} : vector<8x16xbf16>, vector<16x32xbf16>, vector<8x32xf32> -> vector<8x32xf32>
    %431 = arith.addf %427, %430 : vector<8x32xf32>
    %c0_349 = arith.constant 0 : index
    %c6_350 = arith.constant 6 : index
    %c0_351 = arith.constant 0 : index
    %c0_352 = arith.constant 0 : index
    %432 = vector.load %arg1[%c0_349, %c6_350, %c0_351, %c0_352] : memref<1x10x10x16xbf16, #tpu.memory_space<vmem>>, vector<1x1x8x16xbf16>
    %433 = vector.shape_cast %432 : vector<1x1x8x16xbf16> to vector<8x16xbf16>
    %cst_353 = arith.constant dense<0.000000e+00> : vector<8x32xf32>
    %434 = tpu.matmul %433, %8, %cst_353 {dimension_numbers = #tpu.dot_dimension_numbers<[1], [0], [0], [1], [0, 0, 1, 1], [], []>} : vector<8x16xbf16>, vector<16x32xbf16>, vector<8x32xf32> -> vector<8x32xf32>
    %435 = arith.addf %431, %434 : vector<8x32xf32>
    %c0_354 = arith.constant 0 : index
    %c6_355 = arith.constant 6 : index
    %c1_356 = arith.constant 1 : index
    %c0_357 = arith.constant 0 : index
    %436 = vector.load %arg1[%c0_354, %c6_355, %c1_356, %c0_357] : memref<1x10x10x16xbf16, #tpu.memory_space<vmem>>, vector<1x1x8x16xbf16>
    %437 = vector.shape_cast %436 : vector<1x1x8x16xbf16> to vector<8x16xbf16>
    %cst_358 = arith.constant dense<0.000000e+00> : vector<8x32xf32>
    %438 = tpu.matmul %437, %10, %cst_358 {dimension_numbers = #tpu.dot_dimension_numbers<[1], [0], [0], [1], [0, 0, 1, 1], [], []>} : vector<8x16xbf16>, vector<16x32xbf16>, vector<8x32xf32> -> vector<8x32xf32>
    %439 = arith.addf %435, %438 : vector<8x32xf32>
    %c0_359 = arith.constant 0 : index
    %c6_360 = arith.constant 6 : index
    %c2_361 = arith.constant 2 : index
    %c0_362 = arith.constant 0 : index
    %440 = vector.load %arg1[%c0_359, %c6_360, %c2_361, %c0_362] : memref<1x10x10x16xbf16, #tpu.memory_space<vmem>>, vector<1x1x8x16xbf16>
    %441 = vector.shape_cast %440 : vector<1x1x8x16xbf16> to vector<8x16xbf16>
    %cst_363 = arith.constant dense<0.000000e+00> : vector<8x32xf32>
    %442 = tpu.matmul %441, %12, %cst_363 {dimension_numbers = #tpu.dot_dimension_numbers<[1], [0], [0], [1], [0, 0, 1, 1], [], []>} : vector<8x16xbf16>, vector<16x32xbf16>, vector<8x32xf32> -> vector<8x32xf32>
    %443 = arith.addf %439, %442 : vector<8x32xf32>
    %c0_364 = arith.constant 0 : index
    %c7_365 = arith.constant 7 : index
    %c0_366 = arith.constant 0 : index
    %c0_367 = arith.constant 0 : index
    %444 = vector.load %arg1[%c0_364, %c7_365, %c0_366, %c0_367] : memref<1x10x10x16xbf16, #tpu.memory_space<vmem>>, vector<1x1x8x16xbf16>
    %445 = vector.shape_cast %444 : vector<1x1x8x16xbf16> to vector<8x16xbf16>
    %cst_368 = arith.constant dense<0.000000e+00> : vector<8x32xf32>
    %446 = tpu.matmul %445, %14, %cst_368 {dimension_numbers = #tpu.dot_dimension_numbers<[1], [0], [0], [1], [0, 0, 1, 1], [], []>} : vector<8x16xbf16>, vector<16x32xbf16>, vector<8x32xf32> -> vector<8x32xf32>
    %447 = arith.addf %443, %446 : vector<8x32xf32>
    %c0_369 = arith.constant 0 : index
    %c7_370 = arith.constant 7 : index
    %c1_371 = arith.constant 1 : index
    %c0_372 = arith.constant 0 : index
    %448 = vector.load %arg1[%c0_369, %c7_370, %c1_371, %c0_372] : memref<1x10x10x16xbf16, #tpu.memory_space<vmem>>, vector<1x1x8x16xbf16>
    %449 = vector.shape_cast %448 : vector<1x1x8x16xbf16> to vector<8x16xbf16>
    %cst_373 = arith.constant dense<0.000000e+00> : vector<8x32xf32>
    %450 = tpu.matmul %449, %16, %cst_373 {dimension_numbers = #tpu.dot_dimension_numbers<[1], [0], [0], [1], [0, 0, 1, 1], [], []>} : vector<8x16xbf16>, vector<16x32xbf16>, vector<8x32xf32> -> vector<8x32xf32>
    %451 = arith.addf %447, %450 : vector<8x32xf32>
    %c0_374 = arith.constant 0 : index
    %c7_375 = arith.constant 7 : index
    %c2_376 = arith.constant 2 : index
    %c0_377 = arith.constant 0 : index
    %452 = vector.load %arg1[%c0_374, %c7_375, %c2_376, %c0_377] : memref<1x10x10x16xbf16, #tpu.memory_space<vmem>>, vector<1x1x8x16xbf16>
    %453 = vector.shape_cast %452 : vector<1x1x8x16xbf16> to vector<8x16xbf16>
    %cst_378 = arith.constant dense<0.000000e+00> : vector<8x32xf32>
    %454 = tpu.matmul %453, %18, %cst_378 {dimension_numbers = #tpu.dot_dimension_numbers<[1], [0], [0], [1], [0, 0, 1, 1], [], []>} : vector<8x16xbf16>, vector<16x32xbf16>, vector<8x32xf32> -> vector<8x32xf32>
    %455 = arith.addf %451, %454 : vector<8x32xf32>
    %cst_379 = arith.constant 5.000000e-01 : f32
    %456 = vector.broadcast %cst_379 : f32 to vector<8x32xf32>
    %457 = arith.mulf %456, %455 : vector<8x32xf32>
    %cst_380 = arith.constant 0.707106769 : f32
    %458 = vector.broadcast %cst_380 : f32 to vector<8x32xf32>
    %459 = arith.mulf %455, %458 : vector<8x32xf32>
    %460 = math.absf %459 : vector<8x32xf32>
    %cst_381 = arith.constant 0.327591091 : f32
    %461 = vector.broadcast %cst_381 : f32 to vector<8x32xf32>
    %462 = arith.mulf %461, %460 : vector<8x32xf32>
    %cst_382 = arith.constant 1.000000e+00 : f32
    %463 = vector.broadcast %cst_382 : f32 to vector<8x32xf32>
    %464 = arith.addf %463, %462 : vector<8x32xf32>
    %465 = tpu.reciprocal %464 {approx = true} : vector<8x32xf32> -> vector<8x32xf32>
    %cst_383 = arith.constant 1.06140542 : f32
    %466 = vector.broadcast %cst_383 : f32 to vector<8x32xf32>
    %467 = arith.mulf %466, %465 : vector<8x32xf32>
    %cst_384 = arith.constant -1.45315206 : f32
    %468 = vector.broadcast %cst_384 : f32 to vector<8x32xf32>
    %469 = arith.addf %467, %468 : vector<8x32xf32>
    %470 = arith.mulf %469, %465 : vector<8x32xf32>
    %cst_385 = arith.constant 1.42141378 : f32
    %471 = vector.broadcast %cst_385 : f32 to vector<8x32xf32>
    %472 = arith.addf %470, %471 : vector<8x32xf32>
    %473 = arith.mulf %472, %465 : vector<8x32xf32>
    %cst_386 = arith.constant -0.284496725 : f32
    %474 = vector.broadcast %cst_386 : f32 to vector<8x32xf32>
    %475 = arith.addf %473, %474 : vector<8x32xf32>
    %476 = arith.mulf %475, %465 : vector<8x32xf32>
    %cst_387 = arith.constant 0.254829586 : f32
    %477 = vector.broadcast %cst_387 : f32 to vector<8x32xf32>
    %478 = arith.addf %476, %477 : vector<8x32xf32>
    %479 = arith.mulf %478, %465 : vector<8x32xf32>
    %cst_388 = arith.constant 0.000000e+00 : f32
    %480 = vector.broadcast %cst_388 : f32 to vector<8x32xf32>
    %481 = arith.subf %480, %460 : vector<8x32xf32>
    %482 = arith.mulf %481, %460 : vector<8x32xf32>
    %483 = math.exp %482 : vector<8x32xf32>
    %484 = arith.mulf %479, %483 : vector<8x32xf32>
    %cst_389 = arith.constant 1.000000e+00 : f32
    %485 = vector.broadcast %cst_389 : f32 to vector<8x32xf32>
    %486 = arith.subf %485, %484 : vector<8x32xf32>
    %cst_390 = arith.constant 0.000000e+00 : f32
    %487 = vector.broadcast %cst_390 : f32 to vector<8x32xf32>
    %488 = arith.cmpf oge, %459, %487 : vector<8x32xf32>
    %cst_391 = arith.constant 0.000000e+00 : f32
    %489 = vector.broadcast %cst_391 : f32 to vector<8x32xf32>
    %490 = arith.subf %489, %486 : vector<8x32xf32>
    %491 = arith.select %488, %486, %490 : vector<8x32xi1>, vector<8x32xf32>
    %cst_392 = arith.constant 1.000000e+00 : f32
    %492 = vector.broadcast %cst_392 : f32 to vector<8x32xf32>
    %493 = arith.addf %492, %491 : vector<8x32xf32>
    %494 = arith.mulf %457, %493 : vector<8x32xf32>
    %495 = arith.truncf %494 : vector<8x32xf32> to vector<8x32xbf16>
    %c0_393 = arith.constant 0 : index
    %c5_394 = arith.constant 5 : index
    %c0_395 = arith.constant 0 : index
    %c0_396 = arith.constant 0 : index
    %496 = vector.load %arg4[%c0_393, %c5_394, %c0_395, %c0_396] : memref<1x8x8x32xbf16, #tpu.memory_space<vmem>>, vector<1x1x8x32xbf16>
    %497 = vector.shape_cast %496 : vector<1x1x8x32xbf16> to vector<8x32xbf16>
    %498 = vector.shape_cast %495 : vector<8x32xbf16> to vector<1x1x8x32xbf16>
    tpu.vector_store %arg4[%c0_393, %c5_394, %c0_395, %c0_396], %498 {strides = array<i32>} : memref<1x8x8x32xbf16, #tpu.memory_space<vmem>>, vector<1x1x8x32xbf16>,
    %c0_397 = arith.constant 0 : index
    %c6_398 = arith.constant 6 : index
    %c0_399 = arith.constant 0 : index
    %c0_400 = arith.constant 0 : index
    %499 = vector.load %arg1[%c0_397, %c6_398, %c0_399, %c0_400] : memref<1x10x10x16xbf16, #tpu.memory_space<vmem>>, vector<1x1x8x16xbf16>
    %500 = vector.shape_cast %499 : vector<1x1x8x16xbf16> to vector<8x16xbf16>
    %cst_401 = arith.constant dense<0.000000e+00> : vector<8x32xf32>
    %501 = tpu.matmul %500, %2, %cst_401 {dimension_numbers = #tpu.dot_dimension_numbers<[1], [0], [0], [1], [0, 0, 1, 1], [], []>} : vector<8x16xbf16>, vector<16x32xbf16>, vector<8x32xf32> -> vector<8x32xf32>
    %502 = vector.broadcast %0 : vector<1x32xf32> to vector<8x32xf32>
    %503 = arith.addf %502, %501 : vector<8x32xf32>
    %c0_402 = arith.constant 0 : index
    %c6_403 = arith.constant 6 : index
    %c1_404 = arith.constant 1 : index
    %c0_405 = arith.constant 0 : index
    %504 = vector.load %arg1[%c0_402, %c6_403, %c1_404, %c0_405] : memref<1x10x10x16xbf16, #tpu.memory_space<vmem>>, vector<1x1x8x16xbf16>
    %505 = vector.shape_cast %504 : vector<1x1x8x16xbf16> to vector<8x16xbf16>
    %cst_406 = arith.constant dense<0.000000e+00> : vector<8x32xf32>
    %506 = tpu.matmul %505, %4, %cst_406 {dimension_numbers = #tpu.dot_dimension_numbers<[1], [0], [0], [1], [0, 0, 1, 1], [], []>} : vector<8x16xbf16>, vector<16x32xbf16>, vector<8x32xf32> -> vector<8x32xf32>
    %507 = arith.addf %503, %506 : vector<8x32xf32>
    %c0_407 = arith.constant 0 : index
    %c6_408 = arith.constant 6 : index
    %c2_409 = arith.constant 2 : index
    %c0_410 = arith.constant 0 : index
    %508 = vector.load %arg1[%c0_407, %c6_408, %c2_409, %c0_410] : memref<1x10x10x16xbf16, #tpu.memory_space<vmem>>, vector<1x1x8x16xbf16>
    %509 = vector.shape_cast %508 : vector<1x1x8x16xbf16> to vector<8x16xbf16>
    %cst_411 = arith.constant dense<0.000000e+00> : vector<8x32xf32>
    %510 = tpu.matmul %509, %6, %cst_411 {dimension_numbers = #tpu.dot_dimension_numbers<[1], [0], [0], [1], [0, 0, 1, 1], [], []>} : vector<8x16xbf16>, vector<16x32xbf16>, vector<8x32xf32> -> vector<8x32xf32>
    %511 = arith.addf %507, %510 : vector<8x32xf32>
    %c0_412 = arith.constant 0 : index
    %c7_413 = arith.constant 7 : index
    %c0_414 = arith.constant 0 : index
    %c0_415 = arith.constant 0 : index
    %512 = vector.load %arg1[%c0_412, %c7_413, %c0_414, %c0_415] : memref<1x10x10x16xbf16, #tpu.memory_space<vmem>>, vector<1x1x8x16xbf16>
    %513 = vector.shape_cast %512 : vector<1x1x8x16xbf16> to vector<8x16xbf16>
    %cst_416 = arith.constant dense<0.000000e+00> : vector<8x32xf32>
    %514 = tpu.matmul %513, %8, %cst_416 {dimension_numbers = #tpu.dot_dimension_numbers<[1], [0], [0], [1], [0, 0, 1, 1], [], []>} : vector<8x16xbf16>, vector<16x32xbf16>, vector<8x32xf32> -> vector<8x32xf32>
    %515 = arith.addf %511, %514 : vector<8x32xf32>
    %c0_417 = arith.constant 0 : index
    %c7_418 = arith.constant 7 : index
    %c1_419 = arith.constant 1 : index
    %c0_420 = arith.constant 0 : index
    %516 = vector.load %arg1[%c0_417, %c7_418, %c1_419, %c0_420] : memref<1x10x10x16xbf16, #tpu.memory_space<vmem>>, vector<1x1x8x16xbf16>
    %517 = vector.shape_cast %516 : vector<1x1x8x16xbf16> to vector<8x16xbf16>
    %cst_421 = arith.constant dense<0.000000e+00> : vector<8x32xf32>
    %518 = tpu.matmul %517, %10, %cst_421 {dimension_numbers = #tpu.dot_dimension_numbers<[1], [0], [0], [1], [0, 0, 1, 1], [], []>} : vector<8x16xbf16>, vector<16x32xbf16>, vector<8x32xf32> -> vector<8x32xf32>
    %519 = arith.addf %515, %518 : vector<8x32xf32>
    %c0_422 = arith.constant 0 : index
    %c7_423 = arith.constant 7 : index
    %c2_424 = arith.constant 2 : index
    %c0_425 = arith.constant 0 : index
    %520 = vector.load %arg1[%c0_422, %c7_423, %c2_424, %c0_425] : memref<1x10x10x16xbf16, #tpu.memory_space<vmem>>, vector<1x1x8x16xbf16>
    %521 = vector.shape_cast %520 : vector<1x1x8x16xbf16> to vector<8x16xbf16>
    %cst_426 = arith.constant dense<0.000000e+00> : vector<8x32xf32>
    %522 = tpu.matmul %521, %12, %cst_426 {dimension_numbers = #tpu.dot_dimension_numbers<[1], [0], [0], [1], [0, 0, 1, 1], [], []>} : vector<8x16xbf16>, vector<16x32xbf16>, vector<8x32xf32> -> vector<8x32xf32>
    %523 = arith.addf %519, %522 : vector<8x32xf32>
    %c0_427 = arith.constant 0 : index
    %c8_428 = arith.constant 8 : index
    %c0_429 = arith.constant 0 : index
    %c0_430 = arith.constant 0 : index
    %524 = vector.load %arg1[%c0_427, %c8_428, %c0_429, %c0_430] : memref<1x10x10x16xbf16, #tpu.memory_space<vmem>>, vector<1x1x8x16xbf16>
    %525 = vector.shape_cast %524 : vector<1x1x8x16xbf16> to vector<8x16xbf16>
    %cst_431 = arith.constant dense<0.000000e+00> : vector<8x32xf32>
    %526 = tpu.matmul %525, %14, %cst_431 {dimension_numbers = #tpu.dot_dimension_numbers<[1], [0], [0], [1], [0, 0, 1, 1], [], []>} : vector<8x16xbf16>, vector<16x32xbf16>, vector<8x32xf32> -> vector<8x32xf32>
    %527 = arith.addf %523, %526 : vector<8x32xf32>
    %c0_432 = arith.constant 0 : index
    %c8_433 = arith.constant 8 : index
    %c1_434 = arith.constant 1 : index
    %c0_435 = arith.constant 0 : index
    %528 = vector.load %arg1[%c0_432, %c8_433, %c1_434, %c0_435] : memref<1x10x10x16xbf16, #tpu.memory_space<vmem>>, vector<1x1x8x16xbf16>
    %529 = vector.shape_cast %528 : vector<1x1x8x16xbf16> to vector<8x16xbf16>
    %cst_436 = arith.constant dense<0.000000e+00> : vector<8x32xf32>
    %530 = tpu.matmul %529, %16, %cst_436 {dimension_numbers = #tpu.dot_dimension_numbers<[1], [0], [0], [1], [0, 0, 1, 1], [], []>} : vector<8x16xbf16>, vector<16x32xbf16>, vector<8x32xf32> -> vector<8x32xf32>
    %531 = arith.addf %527, %530 : vector<8x32xf32>
    %c0_437 = arith.constant 0 : index
    %c8_438 = arith.constant 8 : index
    %c2_439 = arith.constant 2 : index
    %c0_440 = arith.constant 0 : index
    %532 = vector.load %arg1[%c0_437, %c8_438, %c2_439, %c0_440] : memref<1x10x10x16xbf16, #tpu.memory_space<vmem>>, vector<1x1x8x16xbf16>
    %533 = vector.shape_cast %532 : vector<1x1x8x16xbf16> to vector<8x16xbf16>
    %cst_441 = arith.constant dense<0.000000e+00> : vector<8x32xf32>
    %534 = tpu.matmul %533, %18, %cst_441 {dimension_numbers = #tpu.dot_dimension_numbers<[1], [0], [0], [1], [0, 0, 1, 1], [], []>} : vector<8x16xbf16>, vector<16x32xbf16>, vector<8x32xf32> -> vector<8x32xf32>
    %535 = arith.addf %531, %534 : vector<8x32xf32>
    %cst_442 = arith.constant 5.000000e-01 : f32
    %536 = vector.broadcast %cst_442 : f32 to vector<8x32xf32>
    %537 = arith.mulf %536, %535 : vector<8x32xf32>
    %cst_443 = arith.constant 0.707106769 : f32
    %538 = vector.broadcast %cst_443 : f32 to vector<8x32xf32>
    %539 = arith.mulf %535, %538 : vector<8x32xf32>
    %540 = math.absf %539 : vector<8x32xf32>
    %cst_444 = arith.constant 0.327591091 : f32
    %541 = vector.broadcast %cst_444 : f32 to vector<8x32xf32>
    %542 = arith.mulf %541, %540 : vector<8x32xf32>
    %cst_445 = arith.constant 1.000000e+00 : f32
    %543 = vector.broadcast %cst_445 : f32 to vector<8x32xf32>
    %544 = arith.addf %543, %542 : vector<8x32xf32>
    %545 = tpu.reciprocal %544 {approx = true} : vector<8x32xf32> -> vector<8x32xf32>
    %cst_446 = arith.constant 1.06140542 : f32
    %546 = vector.broadcast %cst_446 : f32 to vector<8x32xf32>
    %547 = arith.mulf %546, %545 : vector<8x32xf32>
    %cst_447 = arith.constant -1.45315206 : f32
    %548 = vector.broadcast %cst_447 : f32 to vector<8x32xf32>
    %549 = arith.addf %547, %548 : vector<8x32xf32>
    %550 = arith.mulf %549, %545 : vector<8x32xf32>
    %cst_448 = arith.constant 1.42141378 : f32
    %551 = vector.broadcast %cst_448 : f32 to vector<8x32xf32>
    %552 = arith.addf %550, %551 : vector<8x32xf32>
    %553 = arith.mulf %552, %545 : vector<8x32xf32>
    %cst_449 = arith.constant -0.284496725 : f32
    %554 = vector.broadcast %cst_449 : f32 to vector<8x32xf32>
    %555 = arith.addf %553, %554 : vector<8x32xf32>
    %556 = arith.mulf %555, %545 : vector<8x32xf32>
    %cst_450 = arith.constant 0.254829586 : f32
    %557 = vector.broadcast %cst_450 : f32 to vector<8x32xf32>
    %558 = arith.addf %556, %557 : vector<8x32xf32>
    %559 = arith.mulf %558, %545 : vector<8x32xf32>
    %cst_451 = arith.constant 0.000000e+00 : f32
    %560 = vector.broadcast %cst_451 : f32 to vector<8x32xf32>
    %561 = arith.subf %560, %540 : vector<8x32xf32>
    %562 = arith.mulf %561, %540 : vector<8x32xf32>
    %563 = math.exp %562 : vector<8x32xf32>
    %564 = arith.mulf %559, %563 : vector<8x32xf32>
    %cst_452 = arith.constant 1.000000e+00 : f32
    %565 = vector.broadcast %cst_452 : f32 to vector<8x32xf32>
    %566 = arith.subf %565, %564 : vector<8x32xf32>
    %cst_453 = arith.constant 0.000000e+00 : f32
    %567 = vector.broadcast %cst_453 : f32 to vector<8x32xf32>
    %568 = arith.cmpf oge, %539, %567 : vector<8x32xf32>
    %cst_454 = arith.constant 0.000000e+00 : f32
    %569 = vector.broadcast %cst_454 : f32 to vector<8x32xf32>
    %570 = arith.subf %569, %566 : vector<8x32xf32>
    %571 = arith.select %568, %566, %570 : vector<8x32xi1>, vector<8x32xf32>
    %cst_455 = arith.constant 1.000000e+00 : f32
    %572 = vector.broadcast %cst_455 : f32 to vector<8x32xf32>
    %573 = arith.addf %572, %571 : vector<8x32xf32>
    %574 = arith.mulf %537, %573 : vector<8x32xf32>
    %575 = arith.truncf %574 : vector<8x32xf32> to vector<8x32xbf16>
    %c0_456 = arith.constant 0 : index
    %c6_457 = arith.constant 6 : index
    %c0_458 = arith.constant 0 : index
    %c0_459 = arith.constant 0 : index
    %576 = vector.load %arg4[%c0_456, %c6_457, %c0_458, %c0_459] : memref<1x8x8x32xbf16, #tpu.memory_space<vmem>>, vector<1x1x8x32xbf16>
    %577 = vector.shape_cast %576 : vector<1x1x8x32xbf16> to vector<8x32xbf16>
    %578 = vector.shape_cast %575 : vector<8x32xbf16> to vector<1x1x8x32xbf16>
    tpu.vector_store %arg4[%c0_456, %c6_457, %c0_458, %c0_459], %578 {strides = array<i32>} : memref<1x8x8x32xbf16, #tpu.memory_space<vmem>>, vector<1x1x8x32xbf16>,
    %c0_460 = arith.constant 0 : index
    %c7_461 = arith.constant 7 : index
    %c0_462 = arith.constant 0 : index
    %c0_463 = arith.constant 0 : index
    %579 = vector.load %arg1[%c0_460, %c7_461, %c0_462, %c0_463] : memref<1x10x10x16xbf16, #tpu.memory_space<vmem>>, vector<1x1x8x16xbf16>
    %580 = vector.shape_cast %579 : vector<1x1x8x16xbf16> to vector<8x16xbf16>
    %cst_464 = arith.constant dense<0.000000e+00> : vector<8x32xf32>
    %581 = tpu.matmul %580, %2, %cst_464 {dimension_numbers = #tpu.dot_dimension_numbers<[1], [0], [0], [1], [0, 0, 1, 1], [], []>} : vector<8x16xbf16>, vector<16x32xbf16>, vector<8x32xf32> -> vector<8x32xf32>
    %582 = vector.broadcast %0 : vector<1x32xf32> to vector<8x32xf32>
    %583 = arith.addf %582, %581 : vector<8x32xf32>
    %c0_465 = arith.constant 0 : index
    %c7_466 = arith.constant 7 : index
    %c1_467 = arith.constant 1 : index
    %c0_468 = arith.constant 0 : index
    %584 = vector.load %arg1[%c0_465, %c7_466, %c1_467, %c0_468] : memref<1x10x10x16xbf16, #tpu.memory_space<vmem>>, vector<1x1x8x16xbf16>
    %585 = vector.shape_cast %584 : vector<1x1x8x16xbf16> to vector<8x16xbf16>
    %cst_469 = arith.constant dense<0.000000e+00> : vector<8x32xf32>
    %586 = tpu.matmul %585, %4, %cst_469 {dimension_numbers = #tpu.dot_dimension_numbers<[1], [0], [0], [1], [0, 0, 1, 1], [], []>} : vector<8x16xbf16>, vector<16x32xbf16>, vector<8x32xf32> -> vector<8x32xf32>
    %587 = arith.addf %583, %586 : vector<8x32xf32>
    %c0_470 = arith.constant 0 : index
    %c7_471 = arith.constant 7 : index
    %c2_472 = arith.constant 2 : index
    %c0_473 = arith.constant 0 : index
    %588 = vector.load %arg1[%c0_470, %c7_471, %c2_472, %c0_473] : memref<1x10x10x16xbf16, #tpu.memory_space<vmem>>, vector<1x1x8x16xbf16>
    %589 = vector.shape_cast %588 : vector<1x1x8x16xbf16> to vector<8x16xbf16>
    %cst_474 = arith.constant dense<0.000000e+00> : vector<8x32xf32>
    %590 = tpu.matmul %589, %6, %cst_474 {dimension_numbers = #tpu.dot_dimension_numbers<[1], [0], [0], [1], [0, 0, 1, 1], [], []>} : vector<8x16xbf16>, vector<16x32xbf16>, vector<8x32xf32> -> vector<8x32xf32>
    %591 = arith.addf %587, %590 : vector<8x32xf32>
    %c0_475 = arith.constant 0 : index
    %c8_476 = arith.constant 8 : index
    %c0_477 = arith.constant 0 : index
    %c0_478 = arith.constant 0 : index
    %592 = vector.load %arg1[%c0_475, %c8_476, %c0_477, %c0_478] : memref<1x10x10x16xbf16, #tpu.memory_space<vmem>>, vector<1x1x8x16xbf16>
    %593 = vector.shape_cast %592 : vector<1x1x8x16xbf16> to vector<8x16xbf16>
    %cst_479 = arith.constant dense<0.000000e+00> : vector<8x32xf32>
    %594 = tpu.matmul %593, %8, %cst_479 {dimension_numbers = #tpu.dot_dimension_numbers<[1], [0], [0], [1], [0, 0, 1, 1], [], []>} : vector<8x16xbf16>, vector<16x32xbf16>, vector<8x32xf32> -> vector<8x32xf32>
    %595 = arith.addf %591, %594 : vector<8x32xf32>
    %c0_480 = arith.constant 0 : index
    %c8_481 = arith.constant 8 : index
    %c1_482 = arith.constant 1 : index
    %c0_483 = arith.constant 0 : index
    %596 = vector.load %arg1[%c0_480, %c8_481, %c1_482, %c0_483] : memref<1x10x10x16xbf16, #tpu.memory_space<vmem>>, vector<1x1x8x16xbf16>
    %597 = vector.shape_cast %596 : vector<1x1x8x16xbf16> to vector<8x16xbf16>
    %cst_484 = arith.constant dense<0.000000e+00> : vector<8x32xf32>
    %598 = tpu.matmul %597, %10, %cst_484 {dimension_numbers = #tpu.dot_dimension_numbers<[1], [0], [0], [1], [0, 0, 1, 1], [], []>} : vector<8x16xbf16>, vector<16x32xbf16>, vector<8x32xf32> -> vector<8x32xf32>
    %599 = arith.addf %595, %598 : vector<8x32xf32>
    %c0_485 = arith.constant 0 : index
    %c8_486 = arith.constant 8 : index
    %c2_487 = arith.constant 2 : index
    %c0_488 = arith.constant 0 : index
    %600 = vector.load %arg1[%c0_485, %c8_486, %c2_487, %c0_488] : memref<1x10x10x16xbf16, #tpu.memory_space<vmem>>, vector<1x1x8x16xbf16>
    %601 = vector.shape_cast %600 : vector<1x1x8x16xbf16> to vector<8x16xbf16>
    %cst_489 = arith.constant dense<0.000000e+00> : vector<8x32xf32>
    %602 = tpu.matmul %601, %12, %cst_489 {dimension_numbers = #tpu.dot_dimension_numbers<[1], [0], [0], [1], [0, 0, 1, 1], [], []>} : vector<8x16xbf16>, vector<16x32xbf16>, vector<8x32xf32> -> vector<8x32xf32>
    %603 = arith.addf %599, %602 : vector<8x32xf32>
    %c0_490 = arith.constant 0 : index
    %c9 = arith.constant 9 : index
    %c0_491 = arith.constant 0 : index
    %c0_492 = arith.constant 0 : index
    %604 = vector.load %arg1[%c0_490, %c9, %c0_491, %c0_492] : memref<1x10x10x16xbf16, #tpu.memory_space<vmem>>, vector<1x1x8x16xbf16>
    %605 = vector.shape_cast %604 : vector<1x1x8x16xbf16> to vector<8x16xbf16>
    %cst_493 = arith.constant dense<0.000000e+00> : vector<8x32xf32>
    %606 = tpu.matmul %605, %14, %cst_493 {dimension_numbers = #tpu.dot_dimension_numbers<[1], [0], [0], [1], [0, 0, 1, 1], [], []>} : vector<8x16xbf16>, vector<16x32xbf16>, vector<8x32xf32> -> vector<8x32xf32>
    %607 = arith.addf %603, %606 : vector<8x32xf32>
    %c0_494 = arith.constant 0 : index
    %c9_495 = arith.constant 9 : index
    %c1_496 = arith.constant 1 : index
    %c0_497 = arith.constant 0 : index
    %608 = vector.load %arg1[%c0_494, %c9_495, %c1_496, %c0_497] : memref<1x10x10x16xbf16, #tpu.memory_space<vmem>>, vector<1x1x8x16xbf16>
    %609 = vector.shape_cast %608 : vector<1x1x8x16xbf16> to vector<8x16xbf16>
    %cst_498 = arith.constant dense<0.000000e+00> : vector<8x32xf32>
    %610 = tpu.matmul %609, %16, %cst_498 {dimension_numbers = #tpu.dot_dimension_numbers<[1], [0], [0], [1], [0, 0, 1, 1], [], []>} : vector<8x16xbf16>, vector<16x32xbf16>, vector<8x32xf32> -> vector<8x32xf32>
    %611 = arith.addf %607, %610 : vector<8x32xf32>
    %c0_499 = arith.constant 0 : index
    %c9_500 = arith.constant 9 : index
    %c2_501 = arith.constant 2 : index
    %c0_502 = arith.constant 0 : index
    %612 = vector.load %arg1[%c0_499, %c9_500, %c2_501, %c0_502] : memref<1x10x10x16xbf16, #tpu.memory_space<vmem>>, vector<1x1x8x16xbf16>
    %613 = vector.shape_cast %612 : vector<1x1x8x16xbf16> to vector<8x16xbf16>
    %cst_503 = arith.constant dense<0.000000e+00> : vector<8x32xf32>
    %614 = tpu.matmul %613, %18, %cst_503 {dimension_numbers = #tpu.dot_dimension_numbers<[1], [0], [0], [1], [0, 0, 1, 1], [], []>} : vector<8x16xbf16>, vector<16x32xbf16>, vector<8x32xf32> -> vector<8x32xf32>
    %615 = arith.addf %611, %614 : vector<8x32xf32>
    %cst_504 = arith.constant 5.000000e-01 : f32
    %616 = vector.broadcast %cst_504 : f32 to vector<8x32xf32>
    %617 = arith.mulf %616, %615 : vector<8x32xf32>
    %cst_505 = arith.constant 0.707106769 : f32
    %618 = vector.broadcast %cst_505 : f32 to vector<8x32xf32>
    %619 = arith.mulf %615, %618 : vector<8x32xf32>
    %620 = math.absf %619 : vector<8x32xf32>
    %cst_506 = arith.constant 0.327591091 : f32
    %621 = vector.broadcast %cst_506 : f32 to vector<8x32xf32>
    %622 = arith.mulf %621, %620 : vector<8x32xf32>
    %cst_507 = arith.constant 1.000000e+00 : f32
    %623 = vector.broadcast %cst_507 : f32 to vector<8x32xf32>
    %624 = arith.addf %623, %622 : vector<8x32xf32>
    %625 = tpu.reciprocal %624 {approx = true} : vector<8x32xf32> -> vector<8x32xf32>
    %cst_508 = arith.constant 1.06140542 : f32
    %626 = vector.broadcast %cst_508 : f32 to vector<8x32xf32>
    %627 = arith.mulf %626, %625 : vector<8x32xf32>
    %cst_509 = arith.constant -1.45315206 : f32
    %628 = vector.broadcast %cst_509 : f32 to vector<8x32xf32>
    %629 = arith.addf %627, %628 : vector<8x32xf32>
    %630 = arith.mulf %629, %625 : vector<8x32xf32>
    %cst_510 = arith.constant 1.42141378 : f32
    %631 = vector.broadcast %cst_510 : f32 to vector<8x32xf32>
    %632 = arith.addf %630, %631 : vector<8x32xf32>
    %633 = arith.mulf %632, %625 : vector<8x32xf32>
    %cst_511 = arith.constant -0.284496725 : f32
    %634 = vector.broadcast %cst_511 : f32 to vector<8x32xf32>
    %635 = arith.addf %633, %634 : vector<8x32xf32>
    %636 = arith.mulf %635, %625 : vector<8x32xf32>
    %cst_512 = arith.constant 0.254829586 : f32
    %637 = vector.broadcast %cst_512 : f32 to vector<8x32xf32>
    %638 = arith.addf %636, %637 : vector<8x32xf32>
    %639 = arith.mulf %638, %625 : vector<8x32xf32>
    %cst_513 = arith.constant 0.000000e+00 : f32
    %640 = vector.broadcast %cst_513 : f32 to vector<8x32xf32>
    %641 = arith.subf %640, %620 : vector<8x32xf32>
    %642 = arith.mulf %641, %620 : vector<8x32xf32>
    %643 = math.exp %642 : vector<8x32xf32>
    %644 = arith.mulf %639, %643 : vector<8x32xf32>
    %cst_514 = arith.constant 1.000000e+00 : f32
    %645 = vector.broadcast %cst_514 : f32 to vector<8x32xf32>
    %646 = arith.subf %645, %644 : vector<8x32xf32>
    %cst_515 = arith.constant 0.000000e+00 : f32
    %647 = vector.broadcast %cst_515 : f32 to vector<8x32xf32>
    %648 = arith.cmpf oge, %619, %647 : vector<8x32xf32>
    %cst_516 = arith.constant 0.000000e+00 : f32
    %649 = vector.broadcast %cst_516 : f32 to vector<8x32xf32>
    %650 = arith.subf %649, %646 : vector<8x32xf32>
    %651 = arith.select %648, %646, %650 : vector<8x32xi1>, vector<8x32xf32>
    %cst_517 = arith.constant 1.000000e+00 : f32
    %652 = vector.broadcast %cst_517 : f32 to vector<8x32xf32>
    %653 = arith.addf %652, %651 : vector<8x32xf32>
    %654 = arith.mulf %617, %653 : vector<8x32xf32>
    %655 = arith.truncf %654 : vector<8x32xf32> to vector<8x32xbf16>
    %c0_518 = arith.constant 0 : index
    %c7_519 = arith.constant 7 : index
    %c0_520 = arith.constant 0 : index
    %c0_521 = arith.constant 0 : index
    %656 = vector.load %arg4[%c0_518, %c7_519, %c0_520, %c0_521] : memref<1x8x8x32xbf16, #tpu.memory_space<vmem>>, vector<1x1x8x32xbf16>
    %657 = vector.shape_cast %656 : vector<1x1x8x32xbf16> to vector<8x32xbf16>
    %658 = vector.shape_cast %655 : vector<8x32xbf16> to vector<1x1x8x32xbf16>
    tpu.vector_store %arg4[%c0_518, %c7_519, %c0_520, %c0_521], %658 {strides = array<i32>} : memref<1x8x8x32xbf16, #tpu.memory_space<vmem>>, vector<1x1x8x32xbf16>,
    return
  }
  func.func @transform_0(%arg0: i32) -> (i32, i32, i32, i32) {
    %c0_i32 = arith.constant 0 : i32
    %c0_i32_0 = arith.constant 0 : i32
    %c0_i32_1 = arith.constant 0 : i32
    %c0_i32_2 = arith.constant 0 : i32
    return %arg0, %c0_i32, %c0_i32_0, %c0_i32_1 : i32, i32, i32, i32
  }
  func.func @transform_1(%arg0: i32) -> (i32, i32, i32) {
    %c0_i32 = arith.constant 0 : i32
    %c0_i32_0 = arith.constant 0 : i32
    %c0_i32_1 = arith.constant 0 : i32
    %c0_i32_2 = arith.constant 0 : i32
    return %c0_i32, %c0_i32_0, %c0_i32_1 : i32, i32, i32
  }
  func.func @transform_2(%arg0: i32) -> (i32, i32) {
    %c0_i32 = arith.constant 0 : i32
    %c0_i32_0 = arith.constant 0 : i32
    %c0_i32_1 = arith.constant 0 : i32
    return %c0_i32, %c0_i32_0 : i32, i32
  }
  func.func @transform_3(%arg0: i32) -> (i32, i32, i32, i32) {
    %c0_i32 = arith.constant 0 : i32
    %c0_i32_0 = arith.constant 0 : i32
    %c0_i32_1 = arith.constant 0 : i32
    %c0_i32_2 = arith.constant 0 : i32
    return %arg0, %c0_i32, %c0_i32_0, %c0_i32_1 : i32, i32, i32, i32
  }
}

module attributes {stable_mosaic.version = 11 : i64} {
  func.func @_head_kernel(%arg0: i32, %arg1: i32, %arg2: memref<1x256x8xbf16, #tpu.memory_space<vmem>>, %arg3: memref<8x8xbf16, #tpu.memory_space<vmem>>, %arg4: memref<8x1xf32, #tpu.memory_space<vmem>>, %arg5: memref<1x8x256xf32, #tpu.memory_space<vmem>>) attributes {dimension_semantics = [#tpu.dimension_semantics<parallel>, #tpu.dimension_semantics<parallel>], iteration_bounds = array<i64: 2, 1>, scalar_prefetch = 0 : i64, scratch_operands = 0 : i64, tpu.core_type = #tpu.core_type<tc>, window_params = [{transform_indices = @transform_0, window_bounds = array<i64: 1, 256, 8>}, {pipeline_mode = #tpu.pipeline_mode<synchronous>, transform_indices = @transform_1, window_bounds = array<i64: 8, 8>}, {pipeline_mode = #tpu.pipeline_mode<synchronous>, transform_indices = @transform_2, window_bounds = array<i64: 8, 1>}, {transform_indices = @transform_3, window_bounds = array<i64: 1, 8, 256>}]} {
    %c0 = arith.constant 0 : index
    %c0_0 = arith.constant 0 : index
    %c0_1 = arith.constant 0 : index
    %0 = vector.load %arg2[%c0, %c0_0, %c0_1] : memref<1x256x8xbf16, #tpu.memory_space<vmem>>, vector<1x256x8xbf16>
    %1 = vector.shape_cast %0 : vector<1x256x8xbf16> to vector<256x8xbf16>
    %c0_2 = arith.constant 0 : index
    %c0_3 = arith.constant 0 : index
    %2 = vector.load %arg3[%c0_2, %c0_3] : memref<8x8xbf16, #tpu.memory_space<vmem>>, vector<8x8xbf16>
    %cst = arith.constant dense<0.000000e+00> : vector<8x256xf32>
    %3 = tpu.matmul %2, %1, %cst {dimension_numbers = #tpu.dot_dimension_numbers<[1], [1], [0], [0], [0, 0, 1, 0], [], []>} : vector<8x8xbf16>, vector<256x8xbf16>, vector<8x256xf32> -> vector<8x256xf32>
    %c0_4 = arith.constant 0 : index
    %c0_5 = arith.constant 0 : index
    %4 = vector.load %arg4[%c0_4, %c0_5] : memref<8x1xf32, #tpu.memory_space<vmem>>, vector<8x1xf32>
    %5 = vector.broadcast %4 : vector<8x1xf32> to vector<8x256xf32>
    %6 = arith.addf %3, %5 : vector<8x256xf32>
    %cst_6 = arith.constant 0.000000e+00 : f32
    %7 = vector.broadcast %cst_6 : f32 to vector<8x256xf32>
    %8 = arith.subf %7, %6 : vector<8x256xf32>
    %9 = math.exp %8 : vector<8x256xf32>
    %cst_7 = arith.constant 1.000000e+00 : f32
    %10 = vector.broadcast %cst_7 : f32 to vector<8x256xf32>
    %11 = arith.addf %10, %9 : vector<8x256xf32>
    %cst_8 = arith.constant 1.000000e+00 : f32
    %12 = vector.broadcast %cst_8 : f32 to vector<8x256xf32>
    %13 = arith.divf %12, %11 : vector<8x256xf32>
    %c0_9 = arith.constant 0 : index
    %c0_10 = arith.constant 0 : index
    %c0_11 = arith.constant 0 : index
    %14 = vector.load %arg5[%c0_9, %c0_10, %c0_11] : memref<1x8x256xf32, #tpu.memory_space<vmem>>, vector<1x8x256xf32>
    %15 = vector.shape_cast %14 : vector<1x8x256xf32> to vector<8x256xf32>
    %16 = vector.shape_cast %13 : vector<8x256xf32> to vector<1x8x256xf32>
    tpu.vector_store %arg5[%c0_9, %c0_10, %c0_11], %16 {strides = array<i32>} : memref<1x8x256xf32, #tpu.memory_space<vmem>>, vector<1x8x256xf32>,
    return
  }
  func.func @transform_0(%arg0: i32, %arg1: i32) -> (i32, i32, i32) {
    %c0_i32 = arith.constant 0 : i32
    %c0_i32_0 = arith.constant 0 : i32
    return %arg0, %arg1, %c0_i32 : i32, i32, i32
  }
  func.func @transform_1(%arg0: i32, %arg1: i32) -> (i32, i32) {
    %c0_i32 = arith.constant 0 : i32
    %c0_i32_0 = arith.constant 0 : i32
    %c0_i32_1 = arith.constant 0 : i32
    return %c0_i32, %c0_i32_0 : i32, i32
  }
  func.func @transform_2(%arg0: i32, %arg1: i32) -> (i32, i32) {
    %c0_i32 = arith.constant 0 : i32
    %c0_i32_0 = arith.constant 0 : i32
    %c0_i32_1 = arith.constant 0 : i32
    return %c0_i32, %c0_i32_0 : i32, i32
  }
  func.func @transform_3(%arg0: i32, %arg1: i32) -> (i32, i32, i32) {
    %c0_i32 = arith.constant 0 : i32
    %c0_i32_0 = arith.constant 0 : i32
    return %arg0, %c0_i32, %arg1 : i32, i32, i32
  }
}

</mosaic_0001>

<bundles_post_ra>
// kernel: _lambda_.5
= control target key start
LH: loop header
LB: loop body
LE: loop exit
PB: predicated region body
PF: predicated region fallthrough
CT: control target
= control target key end

     0   :  { %s498_s12 = smov 0   ;;  %s500_s13 = smov 0   ;;  %s546_s0 = inlined_call_operand.vmem [shape: bf16[2,64,16], index: 0, kind: input, shape index: {}]   ;;  %s547_s1 = inlined_call_operand.vmem [shape: bf16[8,16], index: 1, kind: input, shape index: {}]   ;;  %s548_s2 = inlined_call_operand.vmem [shape: f32[8,1], index: 2, kind: input, shape index: {}]   ;;  %s549_s3 = inlined_call_operand.vmem [shape: f32[2,8,64], index: 3, kind: output, shape index: {}]  }
   0x1   :  { %s502_s14 = smov 0  }
   0x2 LB: > { %s25_s15 = sadd.s32 1, %s469_s13  ;;  %p386_p0 = scmp.ge.s32.totalorder %s473_s14, 1  ;;  %s473_s14 = sphi %s502_s14, %s13_s14   ;;  %s469_s13 = sphi %s500_s13, %s551_s13   ;;  %s465_s12 = sphi %s498_s12, %s550_s12  }
   0x3   : > { %p27_p1 = scmp.ge.s32.totalorder %s25_s15, 2  ;;  %p158_p2 = scmp.lt.s32.totalorder %s473_s14, 3 }
   0x5   : > { %s553_s15 = smov (%p27_p1, %s25_s15), 0  ;;  %p159_p3 = pnand %p386_p0, %p158_p2 }
   0x6   : > { %p189_p4 = scmp.lt.s32.totalorder (!%p159_p3), %s465_s12, 1  ;;  %v475_v0 = vmov (!%p159_p3), 0.0   ;;  %vm476_vm0 = vmmov (!%p159_p3), 0   ;;  %v215_v1 = vld [vmem:[%s548_s2] sm:$0xff] (!%p159_p3)  ;;  %v477_v2 = vmov (!%p159_p3), 0   ;;  %vm241_vm1 = vcmask (!%p159_p3), 130048  }
   0x7   : > { %162 = sbr.rel (%p159_p3) target bundleno = 293 (0x125), region = 32  ;;  %403 = vmatprep.subr.bf16.mxu0 (!%p159_p3), %v475_v0  ;;  %411 = vmatprep.mubr.msk.bf16.mxu0 (!%p159_p3), %vm476_vm0, %v475_v0  ;;  %v214_v11 = vld [vmem:[%s547_s1] sm:$0xf] (!%p159_p3)  ;;  %vm303_vm2 = vcmask (!%p159_p3), 523264  }
   0x8   : > { %442 = vset.pattern.permute.xlu0 (!%p159_p3), %v477_v2 }
   0x9   : > { %218 = vperm.xlu0 (!%p159_p3), %442, %v215_v1  }
   0xe   : > { %s555_s12 = smov (!%p189_p4, %s465_s12), 1 }
   0xf   : > { %s397_s18 = sshll.u32 %s555_s12, 5  ;;  %s389_s24 = sshll.u32 %s555_s12, 3 }
  0x10   : > { %s196_s21 = scalar_lea.vmem %s546_s0, %s397_s18  ;;  %s204_s27 = scalar_lea.vmem %s549_s3, %s389_s24 }
  0x11   : > { %v443_v3 = vld [vmem:[%s196_s21] sm:$0xff]   ;;  %v444_v5 = vld [vmem:[%s196_s21 + $0x8] sm:$0xff]   ;;  %v445_v7 = vld [vmem:[%s196_s21 + $0x10] sm:$0xff]  }
  0x12   : > { %v246_v4 = vsel %vm241_vm1, %v443_v3, 0  ;;  %v249_v6 = vsel %vm241_vm1, %v444_v5, 0  ;;  %v252_v8 = vsel %vm241_vm1, %v445_v7, 0  ;;  %v446_v9 = vld [vmem:[%s196_s21 + $0x18] sm:$0xff]  }
  0x13   : > { %404 = vmatpush3.bf16.xpose.msra.mxu0 %v246_v4  ;;  %v255_v10 = vsel %vm241_vm1, %v446_v9, 0 }
  0x14   : > { %405 = vmatprep.subr.bf16.mxu0 %v475_v0 }
  0x1b   : > { %406 = vmatpush3.bf16.xpose.msra.mxu0 %v249_v6 }
  0x1c   : > { %407 = vmatprep.subr.bf16.mxu0 %v475_v0 }
  0x23   : > { %408 = vmatpush3.bf16.xpose.msra.mxu0 %v252_v8 }
  0x24   : > { %409 = vmatprep.subr.bf16.mxu0 %v475_v0 }
  0x2b   : > { %410 = vmatpush3.bf16.xpose.msra.mxu0 %v255_v10 }
  0x32   : > { %412 = vmatmul.mubr.msk.bf16.vlgmr.msra.gmra.mrb[0].mxu0 %vm241_vm1, %v214_v11 }
  0x88   : > { %v219_v12 = vpop.permute.xlu0 %218 }
 0x105   : > { %v291_v13 = vpop.f32.mrb[0].mxu0 }
 0x106   : > { %v292_v14 = vadd.f32 %v291_v13, %v219_v12  ;;  %v413_v15 = vpop.f32.mrb[1].mxu0 }
 0x107   : > { %v294_v16 = vpop.f32.mrb[2].mxu0 }
 0x108   : > { %v297_v17 = vsub.f32 0.0, %v292_v14  ;;  %v414_v18 = vpop.f32.mrb[3].mxu0 }
 0x10a   : > { %v298_v19 = vmul.f32 1.442695, %v297_v17 }
 0x10c   : > { %447 = vpow2.f32 %v298_v19 }
 0x116   : > { %v448_v20 = vpop.eup %447 }
 0x117   : > { %v300_v21 = vadd.f32 1.0, %v448_v20 }
 0x119   : > { %449 = vrcp.f32 %v300_v21 }
 0x123   : > { %v450_v22 = vpop.eup %449 }
 0x124   : > { %304 = vst.msk [vmem:[%s204_s27] sm:$0xff] %vm303_vm2, %v450_v22 }
 0x125 PF: > { %s13_s14 = sadd.s32 1, %s473_s14   ;;  %s550_s12 = smov %s469_s13 }
 0x126   : > { %p10_p5 = scmp.ge.s32.totalorder %s13_s14, 4   ;;  %s551_s13 = smov %s553_s15 }
 0x128   :  { %12 = sbr.rel (!%p10_p5) target bundleno = 2 (0x2), region = 62 }

// kernel: _lambda_.4
= control target key start
LH: loop header
LB: loop body
LE: loop exit
PB: predicated region body
PF: predicated region fallthrough
CT: control target
= control target key end

     0   :  { %s2867_s12 = smov 0   ;;  %s3170_s0 = inlined_call_operand.vmem [shape: bf16[2,6,6,16], index: 0, kind: input, shape index: {}]   ;;  %s3171_s1 = inlined_call_operand.vmem [shape: bf16[9,16,64], index: 1, kind: input, shape index: {}]   ;;  %s3172_s2 = inlined_call_operand.vmem [shape: f32[1,64], index: 2, kind: input, shape index: {}]   ;;  %s3173_s3 = inlined_call_operand.vmem [shape: bf16[2,4,4,64], index: 3, kind: output, shape index: {}]  }
   0x1 LB: > { %s2224_s13 = sadd.s32 4294967295, %s2843_s12   ;;  %p2228_p0 = scmp.ge.s32.totalorder %s2843_s12, 1  ;;  %s2843_s12 = sphi %s2867_s12, %s13_s12  }
   0x2   : > { %p137_p1 = scmp.lt.s32.totalorder %s2843_s12, 3 }
   0x4   : > { %p138_p2 = pnand %p2228_p0, %p137_p1 }
   0x5   : > { %v2878_v0 = vld [vmem:[%s3171_s1] sm:$0xff] (!%p138_p2)   ;;  %v2845_v1 = vmov (!%p138_p2), 0.0   ;;  %p161_p3 = scmp.lt.s32.totalorder (!%p138_p2), %s2224_s13, 1  ;;  %vm2846_vm0 = vmmov (!%p138_p2), 0   ;;  %vm206_vm1 = vcmask (!%p138_p2), 130048   ;;  %v2896_v2 = vld [vmem:[%s3171_s1 + $0x8] sm:$0xff] (!%p138_p2)  }
   0x6   : > { %141 = sbr.rel (%p138_p2) target bundleno = 484 (0x1e4), region = 32  ;;  %2429 = vmatprep.subr.bf16.mxu0 (!%p138_p2), %v2845_v1  ;;  %2483 = vmatprep.subr.bf16.mxu1 (!%p138_p2), %v2845_v1  ;;  %v2920_v15 = vld [vmem:[%s3171_s1 + $0x10] sm:$0xff] (!%p138_p2)   ;;  %v2937_v20 = vld [vmem:[%s3171_s1 + $0x18] sm:$0xff] (!%p138_p2)   ;;  %v2955_v24 = vld [vmem:[%s3171_s1 + $0x20] sm:$0xff] (!%p138_p2)   ;;  %vm736_vm4 = vcmask (!%p138_p2), 517120  }
   0x7   : > { %2430 = vmatpush3.bf16.msra.mxu0 (!%p138_p2), %v2878_v0  ;;  %2484 = vmatpush3.bf16.msra.mxu1 (!%p138_p2), %v2878_v0  ;;  %v2971_v34 = vld [vmem:[%s3171_s1 + $0x28] sm:$0xff] (!%p138_p2)   ;;  %v2988_v39 = vld [vmem:[%s3171_s1 + $0x30] sm:$0xff] (!%p138_p2)   ;;  %v3006_v43 = vld [vmem:[%s3171_s1 + $0x38] sm:$0xff] (!%p138_p2)  }
   0x8   : > { %2431 = vmatprep.mubr.msk.bf16.mxu0 (!%p138_p2), %vm2846_vm0, %v2845_v1  ;;  %2435 = vmatprep.subr.bf16.mxu0 (!%p138_p2), %v2845_v1  ;;  %v3022_v53 = vld [vmem:[%s3171_s1 + $0x40] sm:$0xff] (!%p138_p2)  }
   0x9   : > { %2485 = vmatprep.mubr.msk.bf16.mxu1 (!%p138_p2), %vm2846_vm0, %v2845_v1  ;;  %2489 = vmatprep.subr.bf16.mxu1 (!%p138_p2), %v2845_v1 }
   0xd   : > { %s3175_s13 = smov (!%p161_p3, %s2224_s13), 1 }
   0xe   : > { %s2777_s16 = smul.u32 24, %s3175_s13  ;;  %s2356_s11 = sshll.u32 %s3175_s13, 3 }
  0x10   : > { %s2901_s21 = scalar_lea.vmem %s3170_s0, %s2777_s16  ;;  %s3155_s16 = scalar_lea.vmem %s3173_s3, %s2356_s11 }
  0x11   : > { %v199_v3 = vld [vmem:[%s2901_s21] sm:$0x3]  ;;  %v2279_v4 = vld [vmem:[%s2901_s21 + $0x4] sm:$0x3]  ;;  %v2287_v25 = vld [vmem:[%s2901_s21 + $0x8] sm:$0x3] }
  0x12   : > { %2432 = vmatmul.mubr.msk.bf16.vlgmr.msra.gmra.mrb[0].mxu0 %vm206_vm1, %v199_v3  ;;  %2486 = vmatmul.mubr.msk.bf16.vlgmr.msra.gmra.mrb[0].mxu1 %vm206_vm1, %v2279_v4  ;;  %v2790_v5 = vld [vmem:[%s2901_s21] ss:$0 sps:$4 sm:$0x77]   ;;  %v2792_v6 = vld [vmem:[%s2901_s21 + $0x4] ss:$0 sps:$4 sm:$0x77]  }
  0x13   : > { %2436 = vmatpush3.bf16.msra.mxu0 %v2896_v2  ;;  %2490 = vmatpush3.bf16.msra.mxu1 %v2896_v2  ;;  %v264_v7 = vshll.u32 %v2790_v5, 16  ;;  %v790_v8 = vshll.u32 %v2792_v6, 16  ;;  %v262_v9 = vshrl.u32 %v2790_v5, 16  ;;  %v788_v11 = vshrl.u32 %v2792_v6, 16  ;;  %v2257_v23 = vld [vmem:[%s2901_s21 + $0x4] sm:$0x3] }
  0x14   : > { %2437 = vmatprep.mubr.msk.bf16.mxu0 %vm2846_vm0, %v2845_v1  ;;  %2441 = vmatprep.subr.bf16.mxu0 %v2845_v1  ;;  %v2793_v16 = vld [vmem:[%s2901_s21] ss:$0 sps:$4 sm:$0x66]   ;;  %v2795_v17 = vld [vmem:[%s2901_s21 + $0x4] ss:$0 sps:$4 sm:$0x66]  }
  0x15   : > { %2491 = vmatprep.mubr.msk.bf16.mxu1 %vm2846_vm0, %v2845_v1  ;;  %2495 = vmatprep.subr.bf16.mxu1 %v2845_v1  ;;  %v266_v10 = vrot.slane %v264_v7, 1  ;;  %v792_v12 = vrot.slane %v790_v8, 1  ;;  %v322_v18 = vrot.slane %v2793_v16, 1  ;;  %v842_v19 = vrot.slane %v2795_v17, 1  ;;  %v2268_v42 = vld [vmem:[%s2901_s21 + $0x8] sm:$0x3] }
  0x16   : > { %v2797_v21 = vld [vmem:[%s2901_s21 + $0x4] ss:$0 sps:$4 sm:$0x77]   ;;  %v2799_v22 = vld [vmem:[%s2901_s21 + $0x8] ss:$0 sps:$4 sm:$0x77]  }
  0x17   : > { %v267_v13 = vor.u32 %v266_v10, %v262_v9  ;;  %v793_v14 = vor.u32 %v792_v12, %v788_v11  ;;  %v432_v26 = vshll.u32 %v2797_v21, 16  ;;  %v939_v27 = vshll.u32 %v2799_v22, 16  ;;  %v2800_v35 = vld [vmem:[%s2901_s21 + $0x4] ss:$0 sps:$4 sm:$0x66]  }
  0x18   : > { %v430_v28 = vshrl.u32 %v2797_v21, 16  ;;  %v937_v30 = vshrl.u32 %v2799_v22, 16  ;;  %v2802_v36 = vld [vmem:[%s2901_s21 + $0x8] ss:$0 sps:$4 sm:$0x66]   ;;  %v490_v37 = vrot.slane %v2800_v35, 1 }
  0x19   : > { %v434_v29 = vrot.slane %v432_v26, 1  ;;  %v941_v31 = vrot.slane %v939_v27, 1  ;;  %v991_v38 = vrot.slane %v2802_v36, 1  ;;  %v2804_v40 = vld [vmem:[%s2901_s21 + $0x8] ss:$0 sps:$4 sm:$0x77]  }
  0x1a   : > { %v2806_v41 = vld [vmem:[%s2901_s21 + $0xc] ss:$0 sps:$4 sm:$0x77]   ;;  %v600_v45 = vshll.u32 %v2804_v40, 16  ;;  %v598_v47 = vshrl.u32 %v2804_v40, 16 }
  0x1b   : > { %v435_v32 = vor.u32 %v434_v29, %v430_v28  ;;  %v942_v33 = vor.u32 %v941_v31, %v937_v30  ;;  %v2295_v44 = vld [vmem:[%s2901_s21 + $0xc] sm:$0x3]  ;;  %v1089_v46 = vshll.u32 %v2806_v41, 16  ;;  %v1087_v49 = vshrl.u32 %v2806_v41, 16  ;;  %v2304_v60 = vld [vmem:[%s2901_s21 + $0x8] sm:$0x3] }
  0x1c   : > { %v602_v48 = vrot.slane %v600_v45, 1  ;;  %v2807_v54 = vld [vmem:[%s2901_s21 + $0x8] ss:$0 sps:$4 sm:$0x66]   ;;  %v2329_v61 = vld [vmem:[%s2901_s21 + $0xc] sm:$0x3] }
  0x1d   : > { %v1091_v50 = vrot.slane %v1089_v46, 1  ;;  %v2808_v55 = vld [vmem:[%s2901_s21 + $0xc] ss:$0 sps:$4 sm:$0x66]   ;;  %v658_v56 = vrot.slane %v2807_v54, 1 }
  0x1e   : > { %2438 = vmatmul.mubr.msk.bf16.vlgmr.msra.gmra.mrb[0].mxu0 %vm206_vm1, %v267_v13  ;;  %2492 = vmatmul.mubr.msk.bf16.vlgmr.msra.gmra.mrb[0].mxu1 %vm206_vm1, %v793_v14  ;;  %v603_v51 = vor.u32 %v602_v48, %v598_v47  ;;  %v1141_v57 = vrot.slane %v2808_v55, 1  ;;  %v2809_v58 = vld [vmem:[%s2901_s21 + $0x8] ss:$0 sps:$4 sm:$0x77]   ;;  %v2312_v13 = vld [vmem:[%s2901_s21 + $0xc] sm:$0x3] }
  0x1f   : > { %2442 = vmatpush3.bf16.msra.mxu0 %v2920_v15  ;;  %2496 = vmatpush3.bf16.msra.mxu1 %v2920_v15  ;;  %v1092_v52 = vor.u32 %v1091_v50, %v1087_v49  ;;  %v2810_v59 = vld [vmem:[%s2901_s21 + $0xc] ss:$0 sps:$4 sm:$0x77]   ;;  %v1267_v62 = vshll.u32 %v2809_v58, 16  ;;  %v2337_v14 = vld [vmem:[%s2901_s21 + $0x10] sm:$0x3] }
  0x20   : > { %2443 = vmatprep.mubr.msk.bf16.mxu0 %vm2846_vm0, %v2845_v1  ;;  %2447 = vmatprep.subr.bf16.mxu0 %v2845_v1  ;;  %v1744_v63 = vshll.u32 %v2810_v59, 16  ;;  %v1742_v4 = vshrl.u32 %v2810_v59, 16  ;;  %v2812_v8 = vld [vmem:[%s2901_s21 + $0xc] ss:$0 sps:$4 sm:$0x66]  }
  0x21   : > { %2497 = vmatprep.mubr.msk.bf16.mxu1 %vm2846_vm0, %v2845_v1  ;;  %2501 = vmatprep.subr.bf16.mxu1 %v2845_v1  ;;  %v1269_v3 = vrot.slane %v1267_v62, 1  ;;  %v1796_v10 = vrot.slane %v2812_v8, 1  ;;  %v2813_v11 = vld [vmem:[%s2901_s21 + $0xc] ss:$0 sps:$4 sm:$0x77]  }
  0x22   : > { %v1746_v5 = vrot.slane %v1744_v63, 1  ;;  %v2814_v12 = vld [vmem:[%s2901_s21 + $0x10] ss:$0 sps:$4 sm:$0x77]   ;;  %v1414_v17 = vshrl.u32 %v2813_v11, 16 }
  0x23   : > { %v1893_v16 = vshll.u32 %v2814_v12, 16  ;;  %v2817_v27 = vld [vmem:[%s2901_s21 + $0x10] ss:$0 sps:$4 sm:$0x77]   ;;  %v2345_v30 = vld [vmem:[%s2901_s21 + $0x14] sm:$0x3] }
  0x24   : > { %v1747_v7 = vor.u32 %v1746_v5, %v1742_v4  ;;  %v2818_v28 = vld [vmem:[%s2901_s21 + $0x14] ss:$0 sps:$4 sm:$0x77]   ;;  %v2320_v29 = vld [vmem:[%s2901_s21 + $0x10] sm:$0x3]  ;;  %v1566_v31 = vshll.u32 %v2817_v27, 16 }
  0x25   : > { %v2041_v35 = vshrl.u32 %v2818_v28, 16  ;;  %v2820_v40 = vld [vmem:[%s2901_s21 + $0x14] ss:$0 sps:$4 sm:$0x66]  }
  0x2a   : > { %2444 = vmatmul.mubr.msk.bf16.vlgmr.msra.gmra.mrb[0].mxu0 %vm206_vm1, %v322_v18  ;;  %2498 = vmatmul.mubr.msk.bf16.vlgmr.msra.gmra.mrb[0].mxu1 %vm206_vm1, %v842_v19  ;;  %v1891_v19 = vshrl.u32 %v2814_v12, 16 }
  0x2b   : > { %2448 = vmatpush3.bf16.msra.mxu0 %v2937_v20  ;;  %2502 = vmatpush3.bf16.msra.mxu1 %v2937_v20 }
  0x2c   : > { %2449 = vmatprep.mubr.msk.bf16.mxu0 %vm2846_vm0, %v2845_v1  ;;  %2453 = vmatprep.subr.bf16.mxu0 %v2845_v1 }
  0x2d   : > { %2503 = vmatprep.mubr.msk.bf16.mxu1 %vm2846_vm0, %v2845_v1  ;;  %2507 = vmatprep.subr.bf16.mxu1 %v2845_v1 }
  0x36   : > { %2450 = vmatmul.mubr.msk.bf16.vlgmr.msra.gmra.mrb[0].mxu0 %vm206_vm1, %v2257_v23  ;;  %2504 = vmatmul.mubr.msk.bf16.vlgmr.msra.gmra.mrb[0].mxu1 %vm206_vm1, %v2287_v25  ;;  %v2815_v23 = vld [vmem:[%s2901_s21 + $0xc] ss:$0 sps:$4 sm:$0x66]  }
  0x37   : > { %2454 = vmatpush3.bf16.msra.mxu0 %v2955_v24  ;;  %2508 = vmatpush3.bf16.msra.mxu1 %v2955_v24  ;;  %v1468_v25 = vrot.slane %v2815_v23, 1 }
  0x38   : > { %2455 = vmatprep.mubr.msk.bf16.mxu0 %vm2846_vm0, %v2845_v1  ;;  %2459 = vmatprep.subr.bf16.mxu0 %v2845_v1 }
  0x39   : > { %2509 = vmatprep.mubr.msk.bf16.mxu1 %vm2846_vm0, %v2845_v1  ;;  %2513 = vmatprep.subr.bf16.mxu1 %v2845_v1 }
  0x42   : > { %2456 = vmatmul.mubr.msk.bf16.vlgmr.msra.gmra.mrb[0].mxu0 %vm206_vm1, %v435_v32  ;;  %2510 = vmatmul.mubr.msk.bf16.vlgmr.msra.gmra.mrb[0].mxu1 %vm206_vm1, %v942_v33  ;;  %v2043_v32 = vshll.u32 %v2818_v28, 16  ;;  %v1564_v33 = vshrl.u32 %v2817_v27, 16 }
  0x43   : > { %2460 = vmatpush3.bf16.msra.mxu0 %v2971_v34  ;;  %2514 = vmatpush3.bf16.msra.mxu1 %v2971_v34 }
  0x44   : > { %2461 = vmatprep.mubr.msk.bf16.mxu0 %vm2846_vm0, %v2845_v1  ;;  %2465 = vmatprep.subr.bf16.mxu0 %v2845_v1  ;;  %v2045_v36 = vrot.slane %v2043_v32, 1 }
  0x45   : > { %2515 = vmatprep.mubr.msk.bf16.mxu1 %vm2846_vm0, %v2845_v1  ;;  %2519 = vmatprep.subr.bf16.mxu1 %v2845_v1 }
  0x4e   : > { %2462 = vmatmul.mubr.msk.bf16.vlgmr.msra.gmra.mrb[0].mxu0 %vm206_vm1, %v490_v37  ;;  %2516 = vmatmul.mubr.msk.bf16.vlgmr.msra.gmra.mrb[0].mxu1 %vm206_vm1, %v991_v38  ;;  %v2046_v38 = vor.u32 %v2045_v36, %v2041_v35 }
  0x4f   : > { %2466 = vmatpush3.bf16.msra.mxu0 %v2988_v39  ;;  %2520 = vmatpush3.bf16.msra.mxu1 %v2988_v39 }
  0x50   : > { %2467 = vmatprep.mubr.msk.bf16.mxu0 %vm2846_vm0, %v2845_v1  ;;  %2471 = vmatprep.subr.bf16.mxu0 %v2845_v1 }
  0x51   : > { %2521 = vmatprep.mubr.msk.bf16.mxu1 %vm2846_vm0, %v2845_v1  ;;  %2525 = vmatprep.subr.bf16.mxu1 %v2845_v1 }
  0x5a   : > { %2468 = vmatmul.mubr.msk.bf16.vlgmr.msra.gmra.mrb[0].mxu0 %vm206_vm1, %v2268_v42  ;;  %2522 = vmatmul.mubr.msk.bf16.vlgmr.msra.gmra.mrb[0].mxu1 %vm206_vm1, %v2295_v44  ;;  %v2095_v42 = vrot.slane %v2820_v40, 1 }
  0x5b   : > { %2472 = vmatpush3.bf16.msra.mxu0 %v3006_v43  ;;  %2526 = vmatpush3.bf16.msra.mxu1 %v3006_v43 }
  0x5c   : > { %2473 = vmatprep.mubr.msk.bf16.mxu0 %vm2846_vm0, %v2845_v1  ;;  %2477 = vmatprep.subr.bf16.mxu0 %v2845_v1 }
  0x5d   : > { %2527 = vmatprep.mubr.msk.bf16.mxu1 %vm2846_vm0, %v2845_v1  ;;  %2531 = vmatprep.subr.bf16.mxu1 %v2845_v1 }
  0x66   : > { %2474 = vmatmul.mubr.msk.bf16.vlgmr.msra.gmra.mrb[0].mxu0 %vm206_vm1, %v603_v51  ;;  %2528 = vmatmul.mubr.msk.bf16.vlgmr.msra.gmra.mrb[0].mxu1 %vm206_vm1, %v1092_v52 }
  0x67   : > { %2478 = vmatpush3.bf16.msra.mxu0 %v3022_v53  ;;  %2532 = vmatpush3.bf16.msra.mxu1 %v3022_v53 }
  0x68   : > { %2479 = vmatprep.mubr.msk.bf16.mxu0 %vm2846_vm0, %v2845_v1  ;;  %2533 = vmatprep.mubr.msk.bf16.mxu1 %vm2846_vm0, %v2845_v1 }
  0x69   : > { %2537 = vmatprep.subr.bf16.mxu0 %v2845_v1  ;;  %2591 = vmatprep.subr.bf16.mxu1 %v2845_v1 }
  0x72   : > { %2480 = vmatmul.mubr.msk.bf16.vlgmr.msra.gmra.mrb[0].mxu0 %vm206_vm1, %v658_v56  ;;  %2534 = vmatmul.mubr.msk.bf16.vlgmr.msra.gmra.mrb[0].mxu1 %vm206_vm1, %v1141_v57 }
  0x73   : > { %2538 = vmatpush3.bf16.msra.mxu0 %v2878_v0  ;;  %2592 = vmatpush3.bf16.msra.mxu1 %v2878_v0  ;;  %v1265_v0 = vshrl.u32 %v2809_v58, 16 }
  0x74   : > { %2539 = vmatprep.mubr.msk.bf16.mxu0 %vm2846_vm0, %v2845_v1  ;;  %2543 = vmatprep.subr.bf16.mxu0 %v2845_v1 }
  0x75   : > { %2593 = vmatprep.mubr.msk.bf16.mxu1 %vm2846_vm0, %v2845_v1  ;;  %2597 = vmatprep.subr.bf16.mxu1 %v2845_v1  ;;  %v1270_v6 = vor.u32 %v1269_v3, %v1265_v0 }
  0x7a   : > { %2540 = vmatmul.mubr.msk.bf16.vlgmr.msra.gmra.mrb[4].mxu0 %vm206_vm1, %v2304_v60  ;;  %2594 = vmatmul.mubr.msk.bf16.vlgmr.msra.gmra.mrb[4].mxu1 %vm206_vm1, %v2329_v61 }
  0x7b   : > { %2544 = vmatpush3.bf16.msra.mxu0 %v2896_v2  ;;  %2598 = vmatpush3.bf16.msra.mxu1 %v2896_v2  ;;  %v2811_v2 = vld [vmem:[%s2901_s21 + $0x8] ss:$0 sps:$4 sm:$0x66]  }
  0x7c   : > { %2545 = vmatprep.mubr.msk.bf16.mxu0 %vm2846_vm0, %v2845_v1  ;;  %2549 = vmatprep.subr.bf16.mxu0 %v2845_v1  ;;  %v1319_v9 = vrot.slane %v2811_v2, 1 }
  0x7d   : > { %2599 = vmatprep.mubr.msk.bf16.mxu1 %vm2846_vm0, %v2845_v1  ;;  %2603 = vmatprep.subr.bf16.mxu1 %v2845_v1 }
  0x86   : > { %2546 = vmatmul.mubr.msk.bf16.vlgmr.msra.gmra.mrb[4].mxu0 %vm206_vm1, %v1270_v6  ;;  %2600 = vmatmul.mubr.msk.bf16.vlgmr.msra.gmra.mrb[4].mxu1 %vm206_vm1, %v1747_v7 }
  0x87   : > { %2550 = vmatpush3.bf16.msra.mxu0 %v2920_v15  ;;  %2604 = vmatpush3.bf16.msra.mxu1 %v2920_v15  ;;  %v1416_v15 = vshll.u32 %v2813_v11, 16 }
  0x88   : > { %2551 = vmatprep.mubr.msk.bf16.mxu0 %vm2846_vm0, %v2845_v1  ;;  %2555 = vmatprep.subr.bf16.mxu0 %v2845_v1 }
  0x89   : > { %2605 = vmatprep.mubr.msk.bf16.mxu1 %vm2846_vm0, %v2845_v1  ;;  %2609 = vmatprep.subr.bf16.mxu1 %v2845_v1  ;;  %v1418_v18 = vrot.slane %v1416_v15, 1 }
  0x8b   : > { %v1419_v21 = vor.u32 %v1418_v18, %v1414_v17 }
  0x92   : > { %2552 = vmatmul.mubr.msk.bf16.vlgmr.msra.gmra.mrb[4].mxu0 %vm206_vm1, %v1319_v9  ;;  %2606 = vmatmul.mubr.msk.bf16.vlgmr.msra.gmra.mrb[4].mxu1 %vm206_vm1, %v1796_v10 }
  0x93   : > { %2556 = vmatpush3.bf16.msra.mxu0 %v2937_v20  ;;  %2610 = vmatpush3.bf16.msra.mxu1 %v2937_v20  ;;  %v1895_v20 = vrot.slane %v1893_v16, 1 }
  0x94   : > { %2557 = vmatprep.mubr.msk.bf16.mxu0 %vm2846_vm0, %v2845_v1  ;;  %2561 = vmatprep.subr.bf16.mxu0 %v2845_v1 }
  0x95   : > { %2611 = vmatprep.mubr.msk.bf16.mxu1 %vm2846_vm0, %v2845_v1  ;;  %2615 = vmatprep.subr.bf16.mxu1 %v2845_v1  ;;  %v1896_v22 = vor.u32 %v1895_v20, %v1891_v19 }
  0x9e   : > { %2558 = vmatmul.mubr.msk.bf16.vlgmr.msra.gmra.mrb[4].mxu0 %vm206_vm1, %v2312_v13  ;;  %2612 = vmatmul.mubr.msk.bf16.vlgmr.msra.gmra.mrb[4].mxu1 %vm206_vm1, %v2337_v14 }
  0x9f   : > { %2562 = vmatpush3.bf16.msra.mxu0 %v2955_v24  ;;  %2616 = vmatpush3.bf16.msra.mxu1 %v2955_v24  ;;  %v2816_v24 = vld [vmem:[%s2901_s21 + $0x10] ss:$0 sps:$4 sm:$0x66]  }
  0xa0   : > { %2563 = vmatprep.mubr.msk.bf16.mxu0 %vm2846_vm0, %v2845_v1  ;;  %2567 = vmatprep.subr.bf16.mxu0 %v2845_v1  ;;  %v1945_v26 = vrot.slane %v2816_v24, 1 }
  0xa1   : > { %2617 = vmatprep.mubr.msk.bf16.mxu1 %vm2846_vm0, %v2845_v1  ;;  %2621 = vmatprep.subr.bf16.mxu1 %v2845_v1 }
  0xaa   : > { %2564 = vmatmul.mubr.msk.bf16.vlgmr.msra.gmra.mrb[4].mxu0 %vm206_vm1, %v1419_v21  ;;  %2618 = vmatmul.mubr.msk.bf16.vlgmr.msra.gmra.mrb[4].mxu1 %vm206_vm1, %v1896_v22 }
  0xab   : > { %2568 = vmatpush3.bf16.msra.mxu0 %v2971_v34  ;;  %2622 = vmatpush3.bf16.msra.mxu1 %v2971_v34  ;;  %v1568_v34 = vrot.slane %v1566_v31, 1 }
  0xac   : > { %2569 = vmatprep.mubr.msk.bf16.mxu0 %vm2846_vm0, %v2845_v1  ;;  %2573 = vmatprep.subr.bf16.mxu0 %v2845_v1 }
  0xad   : > { %2623 = vmatprep.mubr.msk.bf16.mxu1 %vm2846_vm0, %v2845_v1  ;;  %2627 = vmatprep.subr.bf16.mxu1 %v2845_v1  ;;  %v1569_v37 = vor.u32 %v1568_v34, %v1564_v33 }
  0xb6   : > { %2570 = vmatmul.mubr.msk.bf16.vlgmr.msra.gmra.mrb[4].mxu0 %vm206_vm1, %v1468_v25  ;;  %2624 = vmatmul.mubr.msk.bf16.vlgmr.msra.gmra.mrb[4].mxu1 %vm206_vm1, %v1945_v26 }
  0xb7   : > { %2574 = vmatpush3.bf16.msra.mxu0 %v2988_v39  ;;  %2628 = vmatpush3.bf16.msra.mxu1 %v2988_v39  ;;  %v2819_v39 = vld [vmem:[%s2901_s21 + $0x10] ss:$0 sps:$4 sm:$0x66]  }
  0xb8   : > { %2575 = vmatprep.mubr.msk.bf16.mxu0 %vm2846_vm0, %v2845_v1  ;;  %2579 = vmatprep.subr.bf16.mxu0 %v2845_v1  ;;  %v1618_v41 = vrot.slane %v2819_v39, 1 }
  0xb9   : > { %2629 = vmatprep.mubr.msk.bf16.mxu1 %vm2846_vm0, %v2845_v1  ;;  %2633 = vmatprep.subr.bf16.mxu1 %v2845_v1 }
  0xc2   : > { %2576 = vmatmul.mubr.msk.bf16.vlgmr.msra.gmra.mrb[4].mxu0 %vm206_vm1, %v2320_v29  ;;  %2630 = vmatmul.mubr.msk.bf16.vlgmr.msra.gmra.mrb[4].mxu1 %vm206_vm1, %v2345_v30 }
  0xc3   : > { %2580 = vmatpush3.bf16.msra.mxu0 %v3006_v43  ;;  %2634 = vmatpush3.bf16.msra.mxu1 %v3006_v43  ;;  %v3147_v43 = vld [vmem:[%s3172_s2] ss:$0 sm:$0xff] }
  0xc4   : > { %2581 = vmatprep.mubr.msk.bf16.mxu0 %vm2846_vm0, %v2845_v1  ;;  %2585 = vmatprep.subr.bf16.mxu0 %v2845_v1 }
  0xc5   : > { %2635 = vmatprep.mubr.msk.bf16.mxu1 %vm2846_vm0, %v2845_v1  ;;  %2639 = vmatprep.subr.bf16.mxu1 %v2845_v1 }
  0xce   : > { %2582 = vmatmul.mubr.msk.bf16.vlgmr.msra.gmra.mrb[4].mxu0 %vm206_vm1, %v1569_v37  ;;  %2636 = vmatmul.mubr.msk.bf16.vlgmr.msra.gmra.mrb[4].mxu1 %vm206_vm1, %v2046_v38 }
  0xcf   : > { %2586 = vmatpush3.bf16.msra.mxu0 %v3022_v53  ;;  %2640 = vmatpush3.bf16.msra.mxu1 %v3022_v53 }
  0xd0   : > { %2587 = vmatprep.mubr.msk.bf16.mxu0 %vm2846_vm0, %v2845_v1  ;;  %2641 = vmatprep.mubr.msk.bf16.mxu1 %vm2846_vm0, %v2845_v1 }
  0xda   : > { %2588 = vmatmul.mubr.msk.bf16.vlgmr.msra.gmra.mrb[4].mxu0 %vm206_vm1, %v1618_v41  ;;  %2642 = vmatmul.mubr.msk.bf16.vlgmr.msra.gmra.mrb[4].mxu1 %vm206_vm1, %v2095_v42 }
 0x145   : > { %v702_v44 = vpop.f32.mrb[0].mxu0  ;;  %v1179_v45 = vpop.f32.mrb[0].mxu1 }
 0x146   : > { %v2645_v46 = vadd.f32 %v3147_v43, %v702_v44  ;;  %v2646_v47 = vadd.f32 %v3147_v43, %v1179_v45  ;;  %v2481_v1 = vpop.f32.mrb[1].mxu0  ;;  %v2535_v48 = vpop.f32.mrb[1].mxu1 }
 0x147   : > { %v705_v49 = vpop.f32.mrb[2].mxu0  ;;  %v1182_v50 = vpop.f32.mrb[2].mxu1 }
 0x148   : > { %v710_v51 = vmul.f32 0.70710677, %v2645_v46  ;;  %v1187_v52 = vmul.f32 0.70710677, %v2646_v47  ;;  %v2482_v53 = vpop.f32.mrb[3].mxu0  ;;  %v2536_v54 = vpop.f32.mrb[3].mxu1 }
 0x149   : > { %v709_v33 = vmul.f32 0.5, %v2645_v46  ;;  %v1186_v36 = vmul.f32 0.5, %v2646_v47 }
 0x14a   : > { %v711_v55 = vand.u32 2147483647, %v710_v51  ;;  %v1188_v56 = vand.u32 2147483647, %v1187_v52  ;;  %vm730_vm2 = vcmp.ge.f32.partialorder %v710_v51, 0.0  ;;  %vm1207_vm3 = vcmp.ge.f32.partialorder %v1187_v52, 0.0 }
 0x14c   : > { %v712_v57 = vmul.f32 0.3275911, %v711_v55  ;;  %v1189_v58 = vmul.f32 0.3275911, %v1188_v56  ;;  %v724_v61 = vsub.f32 0.0, %v711_v55  ;;  %v1201_v62 = vsub.f32 0.0, %v1188_v56 }
 0x14e   : > { %v713_v59 = vadd.f32 1.0, %v712_v57  ;;  %v1190_v60 = vadd.f32 1.0, %v1189_v58  ;;  %v725_v0 = vmul.f32 %v724_v61, %v711_v55  ;;  %v1202_v5 = vmul.f32 %v1201_v62, %v1188_v56 }
 0x150   : > { %2821 = vrcp.f32 %v713_v59  ;;  %v726_v2 = vmul.f32 1.442695, %v725_v0  ;;  %v1203_v10 = vmul.f32 1.442695, %v1202_v5 }
 0x151   : > { %2823 = vrcp.f32 %v1190_v60 }
 0x152   : > { %2825 = vpow2.f32 %v726_v2 }
 0x153   : > { %2827 = vpow2.f32 %v1203_v10 }
 0x15a   : > { %v2822_v63 = vpop.eup %2821 }
 0x15b   : > { %v2824_v3 = vpop.eup %2823  ;;  %v715_v4 = vmul.f32 1.0614054, %v2822_v63 }
 0x15c   : > { %v1192_v6 = vmul.f32 1.0614054, %v2824_v3  ;;  %v2826_v23 = vpop.eup %2825 }
 0x15d   : > { %v716_v7 = vadd.f32 -1.4531521, %v715_v4  ;;  %v2828_v25 = vpop.eup %2827 }
 0x15e   : > { %v1193_v8 = vadd.f32 -1.4531521, %v1192_v6 }
 0x15f   : > { %v717_v9 = vmul.f32 %v2822_v63, %v716_v7 }
 0x160   : > { %v1194_v11 = vmul.f32 %v2824_v3, %v1193_v8 }
 0x161   : > { %v718_v12 = vadd.f32 1.4214138, %v717_v9 }
 0x162   : > { %v1195_v13 = vadd.f32 1.4214138, %v1194_v11 }
 0x163   : > { %v719_v14 = vmul.f32 %v2822_v63, %v718_v12 }
 0x164   : > { %v1196_v15 = vmul.f32 %v2824_v3, %v1195_v13 }
 0x165   : > { %v720_v16 = vadd.f32 -0.28449672, %v719_v14 }
 0x166   : > { %v1197_v17 = vadd.f32 -0.28449672, %v1196_v15 }
 0x167   : > { %v721_v18 = vmul.f32 %v2822_v63, %v720_v16 }
 0x168   : > { %v1198_v19 = vmul.f32 %v2824_v3, %v1197_v17 }
 0x169   : > { %v722_v20 = vadd.f32 0.2548296, %v721_v18 }
 0x16a   : > { %v1199_v21 = vadd.f32 0.2548296, %v1198_v19 }
 0x16b   : > { %v723_v22 = vmul.f32 %v2822_v63, %v722_v20 }
 0x16c   : > { %v1200_v24 = vmul.f32 %v2824_v3, %v1199_v21 }
 0x16d   : > { %v728_v26 = vmul.f32 %v2826_v23, %v723_v22 }
 0x16e   : > { %v1205_v27 = vmul.f32 %v2828_v25, %v1200_v24 }
 0x16f   : > { %v729_v28 = vsub.f32 1.0, %v728_v26 }
 0x170   : > { %v1206_v29 = vsub.f32 1.0, %v1205_v27 }
 0x171   : > { %v731_v30 = vsub.f32 0.0, %v729_v28 }
 0x172   : > { %v1208_v31 = vsub.f32 0.0, %v1206_v29 }
 0x173   : > { %v732_v32 = vsel %vm730_vm2, %v729_v28, %v731_v30 }
 0x174   : > { %v733_v34 = vadd.f32 1.0, %v732_v32  ;;  %v1209_v35 = vsel %vm1207_vm3, %v1206_v29, %v1208_v31 }
 0x175   : > { %v1210_v37 = vadd.f32 1.0, %v1209_v35 }
 0x176   : > { %v734_v38 = vmul.f32 %v733_v34, %v709_v33 }
 0x177   : > { %v1211_v39 = vmul.f32 %v1210_v37, %v1186_v36 }
 0x178   : > { %v735_v40 = vpack.c.bf16 %v734_v38, %v734_v38 }
 0x179   : > { %v1212_v41 = vpack.c.bf16 %v1211_v39, %v1211_v39 }
 0x17a   : > { %737 = vst.msk [vmem:[%s3155_s16] sm:$0x3] %vm736_vm4, %v735_v40 }
 0x17b   : > { %2303 = vst.msk [vmem:[%s3155_s16 + $0x2] sm:$0x3] %vm736_vm4, %v1212_v41 }
 0x1ad   : > { %v1656_v42 = vpop.f32.mrb[4].mxu0  ;;  %v2133_v44 = vpop.f32.mrb[4].mxu1 }
 0x1ae   : > { %v2647_v45 = vadd.f32 %v3147_v43, %v1656_v42  ;;  %v2648_v46 = vadd.f32 %v3147_v43, %v2133_v44  ;;  %v2589_v47 = vpop.f32.mrb[5].mxu0  ;;  %v2643_v1 = vpop.f32.mrb[5].mxu1 }
 0x1af   : > { %v1659_v48 = vpop.f32.mrb[6].mxu0  ;;  %v2136_v49 = vpop.f32.mrb[6].mxu1 }
 0x1b0   : > { %v1664_v50 = vmul.f32 0.70710677, %v2647_v45  ;;  %v2141_v51 = vmul.f32 0.70710677, %v2648_v46  ;;  %v2590_v52 = vpop.f32.mrb[7].mxu0  ;;  %v2644_v53 = vpop.f32.mrb[7].mxu1 }
 0x1b1   : > { %v1663_v31 = vmul.f32 0.5, %v2647_v45  ;;  %v2140_v34 = vmul.f32 0.5, %v2648_v46 }
 0x1b2   : > { %v1665_v54 = vand.u32 2147483647, %v1664_v50  ;;  %v2142_v55 = vand.u32 2147483647, %v2141_v51  ;;  %vm1684_vm5 = vcmp.ge.f32.partialorder %v1664_v50, 0.0  ;;  %vm2161_vm6 = vcmp.ge.f32.partialorder %v2141_v51, 0.0 }
 0x1b4   : > { %v1666_v56 = vmul.f32 0.3275911, %v1665_v54  ;;  %v2143_v57 = vmul.f32 0.3275911, %v2142_v55  ;;  %v1678_v60 = vsub.f32 0.0, %v1665_v54  ;;  %v2155_v61 = vsub.f32 0.0, %v2142_v55 }
 0x1b6   : > { %v1667_v58 = vadd.f32 1.0, %v1666_v56  ;;  %v2144_v59 = vadd.f32 1.0, %v2143_v57  ;;  %v1679_v43 = vmul.f32 %v1678_v60, %v1665_v54  ;;  %v2156_v3 = vmul.f32 %v2155_v61, %v2142_v55 }
 0x1b8   : > { %2829 = vrcp.f32 %v1667_v58  ;;  %v1680_v6 = vmul.f32 1.442695, %v1679_v43  ;;  %v2157_v8 = vmul.f32 1.442695, %v2156_v3 }
 0x1b9   : > { %2831 = vrcp.f32 %v2144_v59 }
 0x1ba   : > { %2833 = vpow2.f32 %v1680_v6 }
 0x1bb   : > { %2835 = vpow2.f32 %v2157_v8 }
 0x1c2   : > { %v2830_v62 = vpop.eup %2829 }
 0x1c3   : > { %v2832_v63 = vpop.eup %2831  ;;  %v1669_v0 = vmul.f32 1.0614054, %v2830_v62 }
 0x1c4   : > { %v2146_v4 = vmul.f32 1.0614054, %v2832_v63  ;;  %v2834_v21 = vpop.eup %2833 }
 0x1c5   : > { %v1670_v5 = vadd.f32 -1.4531521, %v1669_v0  ;;  %v2836_v23 = vpop.eup %2835 }
 0x1c6   : > { %v2147_v7 = vadd.f32 -1.4531521, %v2146_v4 }
 0x1c7   : > { %v1671_v2 = vmul.f32 %v2830_v62, %v1670_v5 }
 0x1c8   : > { %v2148_v9 = vmul.f32 %v2832_v63, %v2147_v7 }
 0x1c9   : > { %v1672_v10 = vadd.f32 1.4214138, %v1671_v2 }
 0x1ca   : > { %v2149_v11 = vadd.f32 1.4214138, %v2148_v9 }
 0x1cb   : > { %v1673_v12 = vmul.f32 %v2830_v62, %v1672_v10 }
 0x1cc   : > { %v2150_v13 = vmul.f32 %v2832_v63, %v2149_v11 }
 0x1cd   : > { %v1674_v14 = vadd.f32 -0.28449672, %v1673_v12 }
 0x1ce   : > { %v2151_v15 = vadd.f32 -0.28449672, %v2150_v13 }
 0x1cf   : > { %v1675_v16 = vmul.f32 %v2830_v62, %v1674_v14 }
 0x1d0   : > { %v2152_v17 = vmul.f32 %v2832_v63, %v2151_v15 }
 0x1d1   : > { %v1676_v18 = vadd.f32 0.2548296, %v1675_v16 }
 0x1d2   : > { %v2153_v19 = vadd.f32 0.2548296, %v2152_v17 }
 0x1d3   : > { %v1677_v20 = vmul.f32 %v2830_v62, %v1676_v18 }
 0x1d4   : > { %v2154_v22 = vmul.f32 %v2832_v63, %v2153_v19 }
 0x1d5   : > { %v1682_v24 = vmul.f32 %v2834_v21, %v1677_v20 }
 0x1d6   : > { %v2159_v25 = vmul.f32 %v2836_v23, %v2154_v22 }
 0x1d7   : > { %v1683_v26 = vsub.f32 1.0, %v1682_v24 }
 0x1d8   : > { %v2160_v27 = vsub.f32 1.0, %v2159_v25 }
 0x1d9   : > { %v1685_v28 = vsub.f32 0.0, %v1683_v26 }
 0x1da   : > { %v2162_v29 = vsub.f32 0.0, %v2160_v27 }
 0x1db   : > { %v1686_v30 = vsel %vm1684_vm5, %v1683_v26, %v1685_v28 }
 0x1dc   : > { %v1687_v32 = vadd.f32 1.0, %v1686_v30  ;;  %v2163_v33 = vsel %vm2161_vm6, %v2160_v27, %v2162_v29 }
 0x1dd   : > { %v2164_v35 = vadd.f32 1.0, %v2163_v33 }
 0x1de   : > { %v1688_v36 = vmul.f32 %v1687_v32, %v1663_v31 }
 0x1df   : > { %v2165_v37 = vmul.f32 %v2164_v35, %v2140_v34 }
 0x1e0   : > { %v1689_v38 = vpack.c.bf16 %v1688_v36, %v1688_v36 }
 0x1e1   : > { %v2166_v39 = vpack.c.bf16 %v2165_v37, %v2165_v37 }
 0x1e2   : > { %2328 = vst.msk [vmem:[%s3155_s16 + $0x4] sm:$0x3] %vm736_vm4, %v1689_v38 }
 0x1e3   : > { %2353 = vst.msk [vmem:[%s3155_s16 + $0x6] sm:$0x3] %vm736_vm4, %v2166_v39 }
 0x1e4 PF: > { %s13_s12 = sadd.s32 1, %s2843_s12  }
 0x1e5   : > { %p10_p4 = scmp.ge.s32.totalorder %s13_s12, 4  }
 0x1e7   :  { %12 = sbr.rel (!%p10_p4) target bundleno = 1 (0x1), region = 78 }

// kernel: _lambda_.7
= control target key start
LH: loop header
LB: loop body
LE: loop exit
PB: predicated region body
PF: predicated region fallthrough
CT: control target
= control target key end

     0   :  { %s675_s12 = smov 0   ;;  %s677_s13 = smov 0   ;;  %s754_s0 = inlined_call_operand.vmem [shape: bf16[2,256,8], index: 0, kind: input, shape index: {}]   ;;  %s755_s1 = inlined_call_operand.vmem [shape: bf16[8,8], index: 1, kind: input, shape index: {}]   ;;  %s756_s2 = inlined_call_operand.vmem [shape: f32[8,1], index: 2, kind: input, shape index: {}]   ;;  %s757_s3 = inlined_call_operand.vmem [shape: f32[2,8,256], index: 3, kind: output, shape index: {}]  }
   0x1   :  { %s679_s14 = smov 0  }
   0x2 LB: > { %s25_s15 = sadd.s32 1, %s648_s13  ;;  %p528_p0 = scmp.ge.s32.totalorder %s652_s14, 1  ;;  %s652_s14 = sphi %s679_s14, %s13_s14   ;;  %s648_s13 = sphi %s677_s13, %s759_s13   ;;  %s644_s12 = sphi %s675_s12, %s758_s12  }
   0x3   : > { %p27_p1 = scmp.ge.s32.totalorder %s25_s15, 2  ;;  %p158_p2 = scmp.lt.s32.totalorder %s652_s14, 3 }
   0x5   : > { %s761_s15 = smov (%p27_p1, %s25_s15), 0  ;;  %p159_p3 = pnand %p528_p0, %p158_p2 }
   0x6   : > { %p191_p4 = scmp.lt.s32.totalorder (!%p159_p3), %s644_s12, 1  ;;  %vm330_vm0 = vcmask (!%p159_p3), 64512   ;;  %v243_v0 = vld [vmem:[%s755_s1] sm:$0xf] (!%p159_p3)  ;;  %v654_v2 = vmov (!%p159_p3), 0  }
   0x7   : > { %162 = sbr.rel (%p159_p3) target bundleno = 327 (0x147), region = 32  ;;  %v244_v1 = vld [vmem:[%s756_s2] sm:$0xff] (!%p159_p3)  ;;  %570 = vmatprep.mubr.msk.bf16.mxu0 (!%p159_p3), %vm330_vm0, %v243_v0  ;;  %605 = vset.pattern.permute.xlu0 (!%p159_p3), %v654_v2 }
   0x8   : > { %247 = vperm.xlu0 (!%p159_p3), %605, %v244_v1  }
   0xe   : > { %s763_s12 = smov (!%p191_p4, %s644_s12), 1 }
   0xf   : > { %s552_s20 = sshll.u32 %s763_s12, 7  ;;  %s553_s24 = sshll.u32 %s763_s12, 4 }
  0x10   : > { %s706_s23 = scalar_lea.vmem %s754_s0, %s552_s20  ;;  %s208_s27 = scalar_lea.vmem %s757_s3, %s553_s24 }
  0x11   : > { %v606_v3 = vld [vmem:[%s706_s23 + $0x40] sm:$0xff]   ;;  %v608_v5 = vld [vmem:[%s706_s23 + $0x48] sm:$0xff]   ;;  %v610_v9 = vld [vmem:[%s706_s23 + $0x50] sm:$0xff]  }
  0x12   : > { %v607_v4 = vld [vmem:[%s706_s23] sm:$0xff]   ;;  %572 = vmatprep.subr.msk.bf16.mxu0 %vm330_vm0, %v606_v3  ;;  %v609_v7 = vld [vmem:[%s706_s23 + $0x8] sm:$0xff]   ;;  %v611_v10 = vld [vmem:[%s706_s23 + $0x10] sm:$0xff]  }
  0x13   : > { %v335_v6 = vsel %vm330_vm0, %v607_v4, 0  ;;  %v338_v8 = vsel %vm330_vm0, %v609_v7, 0  ;;  %v341_v11 = vsel %vm330_vm0, %v611_v10, 0  ;;  %v612_v12 = vld [vmem:[%s706_s23 + $0x58] sm:$0xff]   ;;  %v614_v15 = vld [vmem:[%s706_s23 + $0x60] sm:$0xff]   ;;  %v616_v18 = vld [vmem:[%s706_s23 + $0x68] sm:$0xff]  }
  0x14   : > { %555 = vmatpush3.bf16.xpose.msra.mxu0 %v335_v6  ;;  %v613_v13 = vld [vmem:[%s706_s23 + $0x18] sm:$0xff]   ;;  %v615_v16 = vld [vmem:[%s706_s23 + $0x20] sm:$0xff]   ;;  %v617_v19 = vld [vmem:[%s706_s23 + $0x28] sm:$0xff]  }
  0x15   : > { %573 = vmatprep.subr.msk.bf16.mxu0 %vm330_vm0, %v608_v5  ;;  %v344_v14 = vsel %vm330_vm0, %v613_v13, 0  ;;  %v347_v17 = vsel %vm330_vm0, %v615_v16, 0  ;;  %v350_v20 = vsel %vm330_vm0, %v617_v19, 0  ;;  %v618_v21 = vld [vmem:[%s706_s23 + $0x70] sm:$0xff]   ;;  %v620_v24 = vld [vmem:[%s706_s23 + $0x78] sm:$0xff]  }
  0x16   : > { %v619_v22 = vld [vmem:[%s706_s23 + $0x30] sm:$0xff]   ;;  %v621_v25 = vld [vmem:[%s706_s23 + $0x38] sm:$0xff]  }
  0x17   : > { %v353_v23 = vsel %vm330_vm0, %v619_v22, 0  ;;  %v356_v26 = vsel %vm330_vm0, %v621_v25, 0 }
  0x1c   : > { %557 = vmatpush3.bf16.xpose.msra.mxu0 %v338_v8 }
  0x1d   : > { %574 = vmatprep.subr.msk.bf16.mxu0 %vm330_vm0, %v610_v9 }
  0x24   : > { %559 = vmatpush3.bf16.xpose.msra.mxu0 %v341_v11 }
  0x25   : > { %575 = vmatprep.subr.msk.bf16.mxu0 %vm330_vm0, %v612_v12 }
  0x2c   : > { %561 = vmatpush3.bf16.xpose.msra.mxu0 %v344_v14 }
  0x2d   : > { %576 = vmatprep.subr.msk.bf16.mxu0 %vm330_vm0, %v614_v15 }
  0x34   : > { %563 = vmatpush3.bf16.xpose.msra.mxu0 %v347_v17 }
  0x35   : > { %577 = vmatprep.subr.msk.bf16.mxu0 %vm330_vm0, %v616_v18 }
  0x3c   : > { %565 = vmatpush3.bf16.xpose.msra.mxu0 %v350_v20 }
  0x3d   : > { %578 = vmatprep.subr.msk.bf16.mxu0 %vm330_vm0, %v618_v21 }
  0x44   : > { %567 = vmatpush3.bf16.xpose.msra.mxu0 %v353_v23 }
  0x45   : > { %579 = vmatprep.subr.msk.bf16.mxu0 %vm330_vm0, %v620_v24 }
  0x4c   : > { %569 = vmatpush3.bf16.xpose.msra.mxu0 %v356_v26 }
  0x53   : > { %571 = vmatmul.mubr.msk.bf16.vlgmr.msra.gmra.mrb[0].mxu0 %vm330_vm0, %v243_v0 }
  0x87   : > { %v248_v27 = vpop.permute.xlu0 %247 }
 0x126   : > { %v416_v28 = vpop.f32.mrb[0].mxu0 }
 0x127   : > { %v417_v29 = vadd.f32 %v416_v28, %v248_v27  ;;  %v418_v30 = vpop.f32.mrb[1].mxu0 }
 0x128   : > { %v419_v31 = vadd.f32 %v418_v30, %v248_v27  ;;  %v420_v32 = vpop.f32.mrb[2].mxu0 }
 0x129   : > { %v423_v33 = vsub.f32 0.0, %v417_v29  ;;  %v421_v34 = vpop.f32.mrb[3].mxu0 }
 0x12a   : > { %v424_v35 = vsub.f32 0.0, %v419_v31 }
 0x12b   : > { %v425_v36 = vmul.f32 1.442695, %v423_v33 }
 0x12c   : > { %v427_v37 = vmul.f32 1.442695, %v424_v35 }
 0x12d   : > { %622 = vpow2.f32 %v425_v36 }
 0x12e   : > { %624 = vpow2.f32 %v427_v37 }
 0x137   : > { %v623_v38 = vpop.eup %622 }
 0x138   : > { %v625_v39 = vpop.eup %624  ;;  %v429_v40 = vadd.f32 1.0, %v623_v38 }
 0x139   : > { %v430_v41 = vadd.f32 1.0, %v625_v39 }
 0x13a   : > { %626 = vrcp.f32 %v429_v40 }
 0x13b   : > { %628 = vrcp.f32 %v430_v41 }
 0x144   : > { %v627_v42 = vpop.eup %626 }
 0x145   : > { %v629_v43 = vpop.eup %628  ;;  %435 = vst [vmem:[%s208_s27] sm:$0xff] %v627_v42 }
 0x146   : > { %436 = vst [vmem:[%s208_s27 + $0x8] sm:$0xff] %v629_v43 }
 0x147 PF: > { %s13_s14 = sadd.s32 1, %s652_s14   ;;  %s758_s12 = smov %s648_s13 }
 0x148   : > { %p10_p5 = scmp.ge.s32.totalorder %s13_s14, 4   ;;  %s759_s13 = smov %s761_s15 }
 0x14a   :  { %12 = sbr.rel (!%p10_p5) target bundleno = 2 (0x2), region = 62 }

// kernel: _lambda_.6
= control target key start
LH: loop header
LB: loop body
LE: loop exit
PB: predicated region body
PF: predicated region fallthrough
CT: control target
= control target key end

     0   :  { %s5430_s12 = smov 0   ;;  %s6017_s0 = inlined_call_operand.vmem [shape: bf16[2,10,10,16], index: 0, kind: input, shape index: {}]   ;;  %s6018_s1 = inlined_call_operand.vmem [shape: bf16[9,16,32], index: 1, kind: input, shape index: {}]   ;;  %s6019_s2 = inlined_call_operand.vmem [shape: f32[1,32], index: 2, kind: input, shape index: {}]   ;;  %s6020_s3 = inlined_call_operand.vmem [shape: bf16[2,8,8,32], index: 3, kind: output, shape index: {}]  }
   0x1 LB: > { %s4204_s13 = sadd.s32 4294967295, %s5406_s12   ;;  %p4208_p0 = scmp.ge.s32.totalorder %s5406_s12, 1  ;;  %s5406_s12 = sphi %s5430_s12, %s13_s12  }
   0x2   : > { %p137_p1 = scmp.lt.s32.totalorder %s5406_s12, 3 }
   0x4   : > { %p138_p2 = pnand %p4208_p0, %p137_p1 }
   0x5   : > { %v5441_v0 = vld [vmem:[%s6018_s1] sm:$0xff] (!%p138_p2)   ;;  %v5408_v1 = vmov (!%p138_p2), 0.0   ;;  %p161_p3 = scmp.lt.s32.totalorder (!%p138_p2), %s4204_s13, 1  ;;  %vm5409_vm0 = vmmov (!%p138_p2), 0   ;;  %vm206_vm1 = vcmask (!%p138_p2), 130048   ;;  %v5459_v2 = vld [vmem:[%s6018_s1 + $0x8] sm:$0xff] (!%p138_p2)  }
   0x6   : > { %141 = sbr.rel (%p138_p2) target bundleno = 692 (0x2b4), region = 32  ;;  %4604 = vmatprep.subr.bf16.mxu0 (!%p138_p2), %v5408_v1  ;;  %4658 = vmatprep.subr.bf16.mxu1 (!%p138_p2), %v5408_v1  ;;  %v5485_v19 = vld [vmem:[%s6018_s1 + $0x10] sm:$0xff] (!%p138_p2)   ;;  %v5502_v26 = vld [vmem:[%s6018_s1 + $0x18] sm:$0xff] (!%p138_p2)   ;;  %v5522_v34 = vld [vmem:[%s6018_s1 + $0x20] sm:$0xff] (!%p138_p2)   ;;  %vm745_vm4 = vcmask (!%p138_p2), 257024  }
   0x7   : > { %4605 = vmatpush3.bf16.msra.mxu0 (!%p138_p2), %v5441_v0  ;;  %4659 = vmatpush3.bf16.msra.mxu1 (!%p138_p2), %v5441_v0  ;;  %v5538_v44 = vld [vmem:[%s6018_s1 + $0x28] sm:$0xff] (!%p138_p2)   ;;  %v5555_v51 = vld [vmem:[%s6018_s1 + $0x30] sm:$0xff] (!%p138_p2)   ;;  %v5575_v59 = vld [vmem:[%s6018_s1 + $0x38] sm:$0xff] (!%p138_p2)  }
   0x8   : > { %4606 = vmatprep.mubr.msk.bf16.mxu0 (!%p138_p2), %vm5409_vm0, %v5408_v1  ;;  %4610 = vmatprep.subr.bf16.mxu0 (!%p138_p2), %v5408_v1 }
   0x9   : > { %4660 = vmatprep.mubr.msk.bf16.mxu1 (!%p138_p2), %vm5409_vm0, %v5408_v1  ;;  %4664 = vmatprep.subr.bf16.mxu1 (!%p138_p2), %v5408_v1 }
   0xd   : > { %s6022_s13 = smov (!%p161_p3, %s4204_s13), 1 }
   0xe   : > { %s5300_s16 = smul.u32 80, %s6022_s13  ;;  %s4459_s11 = sshll.u32 %s6022_s13, 5 }
  0x10   : > { %s5464_s21 = scalar_lea.vmem %s6017_s0, %s5300_s16  ;;  %s5938_s16 = scalar_lea.vmem %s6020_s3, %s4459_s11 }
  0x11   : > { %v199_v3 = vld [vmem:[%s5464_s21] sm:$0xf]  ;;  %v4261_v4 = vld [vmem:[%s5464_s21 + $0x8] sm:$0xf]  ;;  %v258_v6 = vld [vmem:[%s5464_s21 + $0x4] sm:$0x1] }
  0x12   : > { %v257_v5 = vld [vmem:[%s5464_s21] sm:$0xf]  ;;  %4607 = vmatmul.mubr.msk.bf16.vlgmr.msra.gmra.mrb[0].mxu0 %vm206_vm1, %v199_v3  ;;  %4661 = vmatmul.mubr.msk.bf16.vlgmr.msra.gmra.mrb[0].mxu1 %vm206_vm1, %v4261_v4  ;;  %v4263_v7 = vld [vmem:[%s5464_s21 + $0x8] sm:$0xf]  ;;  %v4264_v8 = vld [vmem:[%s5464_s21 + $0xc] sm:$0x1] }
  0x13   : > { %4611 = vmatpush3.bf16.msra.mxu0 %v5459_v2  ;;  %4665 = vmatpush3.bf16.msra.mxu1 %v5459_v2  ;;  %v4231_v9 = vcombine.low %v257_v5, %v258_v6  ;;  %v4265_v10 = vcombine.low %v4263_v7, %v4264_v8  ;;  %v321_v20 = vld [vmem:[%s5464_s21] sm:$0xe]  ;;  %v4267_v21 = vld [vmem:[%s5464_s21 + $0x8] sm:$0xe]  ;;  %v4241_v28 = vld [vmem:[%s5464_s21 + $0xc] sm:$0x1] }
  0x14   : > { %4612 = vmatprep.mubr.msk.bf16.mxu0 %vm5409_vm0, %v5408_v1  ;;  %4616 = vmatprep.subr.bf16.mxu0 %v5408_v1  ;;  %v4234_v22 = vcombine.low %v321_v20, %v258_v6  ;;  %v4268_v23 = vcombine.low %v4267_v21, %v4264_v8  ;;  %v4240_v27 = vld [vmem:[%s5464_s21 + $0x8] sm:$0xf]  ;;  %v4272_v29 = vld [vmem:[%s5464_s21 + $0x10] sm:$0xf]  ;;  %v4273_v30 = vld [vmem:[%s5464_s21 + $0x14] sm:$0x1] }
  0x15   : > { %4666 = vmatprep.mubr.msk.bf16.mxu1 %vm5409_vm0, %v5408_v1  ;;  %4670 = vmatprep.subr.bf16.mxu1 %v5408_v1  ;;  %v267_v11 = vshll.u32 %v4231_v9, 16  ;;  %v802_v12 = vshll.u32 %v4265_v10, 16  ;;  %v265_v13 = vshrl.u32 %v4231_v9, 16  ;;  %v800_v14 = vshrl.u32 %v4265_v10, 16  ;;  %v4237_v33 = vld [vmem:[%s5464_s21 + $0x8] sm:$0xf] }
  0x16   : > { %v325_v24 = vrot.slane %v4234_v22, 1  ;;  %v854_v25 = vrot.slane %v4268_v23, 1  ;;  %v4242_v31 = vcombine.low %v4240_v27, %v4241_v28  ;;  %v4274_v32 = vcombine.low %v4272_v29, %v4273_v30  ;;  %v4270_v35 = vld [vmem:[%s5464_s21 + $0x10] sm:$0xf]  ;;  %v4245_v45 = vld [vmem:[%s5464_s21 + $0x8] sm:$0xe] }
  0x17   : > { %v269_v15 = vrot.slane %v267_v11, 1  ;;  %v804_v16 = vrot.slane %v802_v12, 1  ;;  %v4276_v46 = vld [vmem:[%s5464_s21 + $0x10] sm:$0xe]  ;;  %v4246_v47 = vcombine.low %v4245_v45, %v4241_v28  ;;  %v4253_v53 = vld [vmem:[%s5464_s21 + $0x14] sm:$0x1] }
  0x18   : > { %v438_v36 = vshll.u32 %v4242_v31, 16  ;;  %v954_v37 = vshll.u32 %v4274_v32, 16  ;;  %v436_v38 = vshrl.u32 %v4242_v31, 16  ;;  %v952_v40 = vshrl.u32 %v4274_v32, 16  ;;  %v4252_v52 = vld [vmem:[%s5464_s21 + $0x10] sm:$0xf] }
  0x19   : > { %v270_v17 = vor.u32 %v269_v15, %v265_v13  ;;  %v805_v18 = vor.u32 %v804_v16, %v800_v14  ;;  %v4277_v48 = vcombine.low %v4276_v46, %v4273_v30  ;;  %v496_v49 = vrot.slane %v4246_v47, 1  ;;  %v4281_v54 = vld [vmem:[%s5464_s21 + $0x18] sm:$0xf]  ;;  %v4282_v55 = vld [vmem:[%s5464_s21 + $0x1c] sm:$0x1]  ;;  %v5591_v8 = vld [vmem:[%s6018_s1 + $0x40] sm:$0xff]  }
  0x1a   : > { %v440_v39 = vrot.slane %v438_v36, 1  ;;  %v956_v41 = vrot.slane %v954_v37, 1  ;;  %v4254_v56 = vcombine.low %v4252_v52, %v4253_v53  ;;  %v4283_v57 = vcombine.low %v4281_v54, %v4282_v55  ;;  %v4249_v58 = vld [vmem:[%s5464_s21 + $0x10] sm:$0xf]  ;;  %v4279_v60 = vld [vmem:[%s5464_s21 + $0x18] sm:$0xf] }
  0x1b   : > { %v1006_v50 = vrot.slane %v4277_v48, 1  ;;  %v4257_v9 = vld [vmem:[%s5464_s21 + $0x10] sm:$0xe]  ;;  %v4285_v10 = vld [vmem:[%s5464_s21 + $0x18] sm:$0xe] }
  0x1c   : > { %v441_v42 = vor.u32 %v440_v39, %v436_v38  ;;  %v957_v43 = vor.u32 %v956_v41, %v952_v40  ;;  %v609_v61 = vshll.u32 %v4254_v56, 16  ;;  %v1107_v62 = vshll.u32 %v4283_v57, 16  ;;  %v4291_v15 = vld [vmem:[%s5464_s21 + $0x10] sm:$0xf]  ;;  %v4292_v16 = vld [vmem:[%s5464_s21 + $0x14] sm:$0x1] }
  0x1d   : > { %v607_v63 = vshrl.u32 %v4254_v56, 16  ;;  %v1105_v4 = vshrl.u32 %v4283_v57, 16  ;;  %v4258_v11 = vcombine.low %v4257_v9, %v4253_v53  ;;  %v4286_v12 = vcombine.low %v4285_v10, %v4282_v55  ;;  %v4289_v22 = vld [vmem:[%s5464_s21 + $0x10] sm:$0xf]  ;;  %v4317_v23 = vld [vmem:[%s5464_s21 + $0x18] sm:$0xf] }
  0x1e   : > { %4613 = vmatmul.mubr.msk.bf16.vlgmr.msra.gmra.mrb[0].mxu0 %vm206_vm1, %v270_v17  ;;  %4667 = vmatmul.mubr.msk.bf16.vlgmr.msra.gmra.mrb[0].mxu1 %vm206_vm1, %v805_v18  ;;  %v611_v3 = vrot.slane %v609_v61, 1  ;;  %v1109_v5 = vrot.slane %v1107_v62, 1  ;;  %v4319_v17 = vld [vmem:[%s5464_s21 + $0x18] sm:$0xf]  ;;  %v4320_v18 = vld [vmem:[%s5464_s21 + $0x1c] sm:$0x1]  ;;  %v4293_v20 = vcombine.low %v4291_v15, %v4292_v16 }
  0x1f   : > { %4617 = vmatpush3.bf16.msra.mxu0 %v5485_v19  ;;  %4671 = vmatpush3.bf16.msra.mxu1 %v5485_v19  ;;  %v667_v13 = vrot.slane %v4258_v11, 1  ;;  %v1159_v14 = vrot.slane %v4286_v12, 1  ;;  %v4321_v21 = vcombine.low %v4319_v17, %v4320_v18  ;;  %v4300_v40 = vld [vmem:[%s5464_s21 + $0x18] sm:$0xf]  ;;  %v4301_v41 = vld [vmem:[%s5464_s21 + $0x1c] sm:$0x1] }
  0x20   : > { %4618 = vmatprep.mubr.msk.bf16.mxu0 %vm5409_vm0, %v5408_v1  ;;  %4622 = vmatprep.subr.bf16.mxu0 %v5408_v1  ;;  %v612_v6 = vor.u32 %v611_v3, %v607_v63  ;;  %v1110_v7 = vor.u32 %v1109_v5, %v1105_v4  ;;  %v1286_v27 = vshrl.u32 %v4293_v20, 16  ;;  %v4302_v45 = vcombine.low %v4300_v40, %v4301_v41  ;;  %v4298_v47 = vld [vmem:[%s5464_s21 + $0x18] sm:$0xf]  ;;  %v4326_v48 = vld [vmem:[%s5464_s21 + $0x20] sm:$0xf] }
  0x21   : > { %4672 = vmatprep.mubr.msk.bf16.mxu1 %vm5409_vm0, %v5408_v1  ;;  %4676 = vmatprep.subr.bf16.mxu1 %v5408_v1  ;;  %v1772_v29 = vshrl.u32 %v4321_v21, 16  ;;  %v4309_v4 = vld [vmem:[%s5464_s21 + $0x20] sm:$0xf]  ;;  %v4310_v5 = vld [vmem:[%s5464_s21 + $0x24] sm:$0x1] }
  0x22   : > { %v1438_v52 = vshrl.u32 %v4302_v45, 16  ;;  %v4311_v9 = vcombine.low %v4309_v4, %v4310_v5  ;;  %v4307_v11 = vld [vmem:[%s5464_s21 + $0x20] sm:$0xf]  ;;  %v4335_v12 = vld [vmem:[%s5464_s21 + $0x28] sm:$0xf] }
  0x24   : > { %v1591_v15 = vshrl.u32 %v4311_v9, 16 }
  0x2a   : > { %4619 = vmatmul.mubr.msk.bf16.vlgmr.msra.gmra.mrb[0].mxu0 %vm206_vm1, %v325_v24  ;;  %4673 = vmatmul.mubr.msk.bf16.vlgmr.msra.gmra.mrb[0].mxu1 %vm206_vm1, %v854_v25  ;;  %v1288_v24 = vshll.u32 %v4293_v20, 16  ;;  %v1774_v25 = vshll.u32 %v4321_v21, 16 }
  0x2b   : > { %4623 = vmatpush3.bf16.msra.mxu0 %v5502_v26  ;;  %4677 = vmatpush3.bf16.msra.mxu1 %v5502_v26 }
  0x2c   : > { %4624 = vmatprep.mubr.msk.bf16.mxu0 %vm5409_vm0, %v5408_v1  ;;  %4628 = vmatprep.subr.bf16.mxu0 %v5408_v1  ;;  %v1290_v28 = vrot.slane %v1288_v24, 1  ;;  %v1776_v30 = vrot.slane %v1774_v25, 1 }
  0x2d   : > { %4678 = vmatprep.mubr.msk.bf16.mxu1 %vm5409_vm0, %v5408_v1  ;;  %4682 = vmatprep.subr.bf16.mxu1 %v5408_v1 }
  0x2e   : > { %v1291_v31 = vor.u32 %v1290_v28, %v1286_v27  ;;  %v1777_v32 = vor.u32 %v1776_v30, %v1772_v29  ;;  %v4347_v29 = vld [vmem:[%s5464_s21 + $0x20] sm:$0xf]  ;;  %v4348_v30 = vld [vmem:[%s5464_s21 + $0x24] sm:$0x1] }
  0x36   : > { %4625 = vmatmul.mubr.msk.bf16.vlgmr.msra.gmra.mrb[0].mxu0 %vm206_vm1, %v4237_v33  ;;  %4679 = vmatmul.mubr.msk.bf16.vlgmr.msra.gmra.mrb[0].mxu1 %vm206_vm1, %v4270_v35  ;;  %v4295_v33 = vld [vmem:[%s5464_s21 + $0x10] sm:$0xe]  ;;  %v4323_v35 = vld [vmem:[%s5464_s21 + $0x18] sm:$0xe] }
  0x37   : > { %4629 = vmatpush3.bf16.msra.mxu0 %v5522_v34  ;;  %4683 = vmatpush3.bf16.msra.mxu1 %v5522_v34  ;;  %v4296_v36 = vcombine.low %v4295_v33, %v4292_v16  ;;  %v4324_v37 = vcombine.low %v4323_v35, %v4320_v18  ;;  %v4349_v33 = vcombine.low %v4347_v29, %v4348_v30 }
  0x38   : > { %4630 = vmatprep.mubr.msk.bf16.mxu0 %vm5409_vm0, %v5408_v1  ;;  %4634 = vmatprep.subr.bf16.mxu0 %v5408_v1 }
  0x39   : > { %4684 = vmatprep.mubr.msk.bf16.mxu1 %vm5409_vm0, %v5408_v1  ;;  %4688 = vmatprep.subr.bf16.mxu1 %v5408_v1  ;;  %v1340_v38 = vrot.slane %v4296_v36, 1  ;;  %v1826_v39 = vrot.slane %v4324_v37, 1  ;;  %v4345_v36 = vld [vmem:[%s5464_s21 + $0x20] sm:$0xf]  ;;  %v4373_v37 = vld [vmem:[%s5464_s21 + $0x28] sm:$0xf] }
  0x3a   : > { %v2258_v40 = vshrl.u32 %v4349_v33, 16 }
  0x42   : > { %4631 = vmatmul.mubr.msk.bf16.vlgmr.msra.gmra.mrb[0].mxu0 %vm206_vm1, %v441_v42  ;;  %4685 = vmatmul.mubr.msk.bf16.vlgmr.msra.gmra.mrb[0].mxu1 %vm206_vm1, %v957_v43  ;;  %v4328_v42 = vld [vmem:[%s5464_s21 + $0x20] sm:$0xf]  ;;  %v4329_v43 = vld [vmem:[%s5464_s21 + $0x24] sm:$0x1] }
  0x43   : > { %4635 = vmatpush3.bf16.msra.mxu0 %v5538_v44  ;;  %4689 = vmatpush3.bf16.msra.mxu1 %v5538_v44  ;;  %v4330_v46 = vcombine.low %v4328_v42, %v4329_v43 }
  0x44   : > { %4636 = vmatprep.mubr.msk.bf16.mxu0 %vm5409_vm0, %v5408_v1  ;;  %4640 = vmatprep.subr.bf16.mxu0 %v5408_v1 }
  0x45   : > { %4690 = vmatprep.mubr.msk.bf16.mxu1 %vm5409_vm0, %v5408_v1  ;;  %4694 = vmatprep.subr.bf16.mxu1 %v5408_v1  ;;  %v1924_v54 = vshrl.u32 %v4330_v46, 16 }
  0x4e   : > { %4637 = vmatmul.mubr.msk.bf16.vlgmr.msra.gmra.mrb[0].mxu0 %vm206_vm1, %v496_v49  ;;  %4691 = vmatmul.mubr.msk.bf16.vlgmr.msra.gmra.mrb[0].mxu1 %vm206_vm1, %v1006_v50  ;;  %v1440_v49 = vshll.u32 %v4302_v45, 16  ;;  %v1926_v50 = vshll.u32 %v4330_v46, 16 }
  0x4f   : > { %4641 = vmatpush3.bf16.msra.mxu0 %v5555_v51  ;;  %4695 = vmatpush3.bf16.msra.mxu1 %v5555_v51 }
  0x50   : > { %4642 = vmatprep.mubr.msk.bf16.mxu0 %vm5409_vm0, %v5408_v1  ;;  %4646 = vmatprep.subr.bf16.mxu0 %v5408_v1  ;;  %v1442_v53 = vrot.slane %v1440_v49, 1  ;;  %v1928_v55 = vrot.slane %v1926_v50, 1 }
  0x51   : > { %4696 = vmatprep.mubr.msk.bf16.mxu1 %vm5409_vm0, %v5408_v1  ;;  %4700 = vmatprep.subr.bf16.mxu1 %v5408_v1 }
  0x52   : > { %v1443_v56 = vor.u32 %v1442_v53, %v1438_v52  ;;  %v1929_v57 = vor.u32 %v1928_v55, %v1924_v54  ;;  %v4356_v54 = vld [vmem:[%s5464_s21 + $0x28] sm:$0xf]  ;;  %v4357_v55 = vld [vmem:[%s5464_s21 + $0x2c] sm:$0x1] }
  0x5a   : > { %4643 = vmatmul.mubr.msk.bf16.vlgmr.msra.gmra.mrb[0].mxu0 %vm206_vm1, %v4249_v58  ;;  %4697 = vmatmul.mubr.msk.bf16.vlgmr.msra.gmra.mrb[0].mxu1 %vm206_vm1, %v4279_v60  ;;  %v4304_v58 = vld [vmem:[%s5464_s21 + $0x18] sm:$0xe]  ;;  %v4332_v60 = vld [vmem:[%s5464_s21 + $0x20] sm:$0xe] }
  0x5b   : > { %4647 = vmatpush3.bf16.msra.mxu0 %v5575_v59  ;;  %4701 = vmatpush3.bf16.msra.mxu1 %v5575_v59  ;;  %v4305_v61 = vcombine.low %v4304_v58, %v4301_v41  ;;  %v4333_v62 = vcombine.low %v4332_v60, %v4329_v43  ;;  %v4358_v58 = vcombine.low %v4356_v54, %v4357_v55 }
  0x5c   : > { %4648 = vmatprep.mubr.msk.bf16.mxu0 %vm5409_vm0, %v5408_v1  ;;  %4652 = vmatprep.subr.bf16.mxu0 %v5408_v1 }
  0x5d   : > { %4702 = vmatprep.mubr.msk.bf16.mxu1 %vm5409_vm0, %v5408_v1  ;;  %4706 = vmatprep.subr.bf16.mxu1 %v5408_v1  ;;  %v1492_v63 = vrot.slane %v4305_v61, 1  ;;  %v1978_v3 = vrot.slane %v4333_v62, 1  ;;  %v4354_v61 = vld [vmem:[%s5464_s21 + $0x28] sm:$0xf]  ;;  %v4382_v62 = vld [vmem:[%s5464_s21 + $0x30] sm:$0xf] }
  0x5e   : > { %v2410_v4 = vshrl.u32 %v4358_v58, 16 }
  0x66   : > { %4649 = vmatmul.mubr.msk.bf16.vlgmr.msra.gmra.mrb[0].mxu0 %vm206_vm1, %v612_v6  ;;  %4703 = vmatmul.mubr.msk.bf16.vlgmr.msra.gmra.mrb[0].mxu1 %vm206_vm1, %v1110_v7  ;;  %v4337_v6 = vld [vmem:[%s5464_s21 + $0x28] sm:$0xf]  ;;  %v4338_v7 = vld [vmem:[%s5464_s21 + $0x2c] sm:$0x1] }
  0x67   : > { %4653 = vmatpush3.bf16.msra.mxu0 %v5591_v8  ;;  %4707 = vmatpush3.bf16.msra.mxu1 %v5591_v8  ;;  %v4339_v10 = vcombine.low %v4337_v6, %v4338_v7 }
  0x68   : > { %4654 = vmatprep.mubr.msk.bf16.mxu0 %vm5409_vm0, %v5408_v1  ;;  %4708 = vmatprep.mubr.msk.bf16.mxu1 %vm5409_vm0, %v5408_v1 }
  0x69   : > { %4712 = vmatprep.subr.bf16.mxu0 %v5408_v1  ;;  %4766 = vmatprep.subr.bf16.mxu1 %v5408_v1  ;;  %v2077_v17 = vshrl.u32 %v4339_v10, 16 }
  0x72   : > { %4655 = vmatmul.mubr.msk.bf16.vlgmr.msra.gmra.mrb[0].mxu0 %vm206_vm1, %v667_v13  ;;  %4709 = vmatmul.mubr.msk.bf16.vlgmr.msra.gmra.mrb[0].mxu1 %vm206_vm1, %v1159_v14  ;;  %v1593_v13 = vshll.u32 %v4311_v9, 16  ;;  %v2079_v14 = vshll.u32 %v4339_v10, 16 }
  0x73   : > { %4713 = vmatpush3.bf16.msra.mxu0 %v5441_v0  ;;  %4767 = vmatpush3.bf16.msra.mxu1 %v5441_v0 }
  0x74   : > { %4714 = vmatprep.mubr.msk.bf16.mxu0 %vm5409_vm0, %v5408_v1  ;;  %4718 = vmatprep.subr.bf16.mxu0 %v5408_v1  ;;  %v1595_v16 = vrot.slane %v1593_v13, 1  ;;  %v2081_v18 = vrot.slane %v2079_v14, 1 }
  0x75   : > { %4768 = vmatprep.mubr.msk.bf16.mxu1 %vm5409_vm0, %v5408_v1  ;;  %4772 = vmatprep.subr.bf16.mxu1 %v5408_v1 }
  0x76   : > { %v1596_v20 = vor.u32 %v1595_v16, %v1591_v15  ;;  %v2082_v21 = vor.u32 %v2081_v18, %v2077_v17  ;;  %v4365_v17 = vld [vmem:[%s5464_s21 + $0x30] sm:$0xf]  ;;  %v4366_v18 = vld [vmem:[%s5464_s21 + $0x34] sm:$0x1] }
  0x7a   : > { %4715 = vmatmul.mubr.msk.bf16.vlgmr.msra.gmra.mrb[4].mxu0 %vm206_vm1, %v4289_v22  ;;  %4769 = vmatmul.mubr.msk.bf16.vlgmr.msra.gmra.mrb[4].mxu1 %vm206_vm1, %v4317_v23  ;;  %v4313_v22 = vld [vmem:[%s5464_s21 + $0x20] sm:$0xe]  ;;  %v4341_v23 = vld [vmem:[%s5464_s21 + $0x28] sm:$0xe] }
  0x7b   : > { %4719 = vmatpush3.bf16.msra.mxu0 %v5459_v2  ;;  %4773 = vmatpush3.bf16.msra.mxu1 %v5459_v2  ;;  %v4314_v24 = vcombine.low %v4313_v22, %v4310_v5  ;;  %v4342_v25 = vcombine.low %v4341_v23, %v4338_v7  ;;  %v4367_v22 = vcombine.low %v4365_v17, %v4366_v18 }
  0x7c   : > { %4720 = vmatprep.mubr.msk.bf16.mxu0 %vm5409_vm0, %v5408_v1  ;;  %4724 = vmatprep.subr.bf16.mxu0 %v5408_v1 }
  0x7d   : > { %4774 = vmatprep.mubr.msk.bf16.mxu1 %vm5409_vm0, %v5408_v1  ;;  %4778 = vmatprep.subr.bf16.mxu1 %v5408_v1  ;;  %v1645_v27 = vrot.slane %v4314_v24, 1  ;;  %v2131_v28 = vrot.slane %v4342_v25, 1  ;;  %v4363_v24 = vld [vmem:[%s5464_s21 + $0x30] sm:$0xf]  ;;  %v4391_v25 = vld [vmem:[%s5464_s21 + $0x38] sm:$0xf] }
  0x7e   : > { %v2563_v29 = vshrl.u32 %v4367_v22, 16 }
  0x86   : > { %4721 = vmatmul.mubr.msk.bf16.vlgmr.msra.gmra.mrb[4].mxu0 %vm206_vm1, %v1291_v31  ;;  %4775 = vmatmul.mubr.msk.bf16.vlgmr.msra.gmra.mrb[4].mxu1 %vm206_vm1, %v1777_v32  ;;  %v4375_v31 = vld [vmem:[%s5464_s21 + $0x28] sm:$0xf]  ;;  %v4376_v32 = vld [vmem:[%s5464_s21 + $0x2c] sm:$0x1] }
  0x87   : > { %4725 = vmatpush3.bf16.msra.mxu0 %v5485_v19  ;;  %4779 = vmatpush3.bf16.msra.mxu1 %v5485_v19  ;;  %v4377_v35 = vcombine.low %v4375_v31, %v4376_v32 }
  0x88   : > { %4726 = vmatprep.mubr.msk.bf16.mxu0 %vm5409_vm0, %v5408_v1  ;;  %4730 = vmatprep.subr.bf16.mxu0 %v5408_v1 }
  0x89   : > { %4780 = vmatprep.mubr.msk.bf16.mxu1 %vm5409_vm0, %v5408_v1  ;;  %4784 = vmatprep.subr.bf16.mxu1 %v5408_v1  ;;  %v2744_v42 = vshrl.u32 %v4377_v35, 16 }
  0x92   : > { %4727 = vmatmul.mubr.msk.bf16.vlgmr.msra.gmra.mrb[4].mxu0 %vm206_vm1, %v1340_v38  ;;  %4781 = vmatmul.mubr.msk.bf16.vlgmr.msra.gmra.mrb[4].mxu1 %vm206_vm1, %v1826_v39  ;;  %v2260_v38 = vshll.u32 %v4349_v33, 16  ;;  %v2746_v39 = vshll.u32 %v4377_v35, 16 }
  0x93   : > { %4731 = vmatpush3.bf16.msra.mxu0 %v5502_v26  ;;  %4785 = vmatpush3.bf16.msra.mxu1 %v5502_v26 }
  0x94   : > { %4732 = vmatprep.mubr.msk.bf16.mxu0 %vm5409_vm0, %v5408_v1  ;;  %4736 = vmatprep.subr.bf16.mxu0 %v5408_v1  ;;  %v2262_v41 = vrot.slane %v2260_v38, 1  ;;  %v2748_v43 = vrot.slane %v2746_v39, 1 }
  0x95   : > { %4786 = vmatprep.mubr.msk.bf16.mxu1 %vm5409_vm0, %v5408_v1  ;;  %4790 = vmatprep.subr.bf16.mxu1 %v5408_v1 }
  0x96   : > { %v2263_v45 = vor.u32 %v2262_v41, %v2258_v40  ;;  %v2749_v46 = vor.u32 %v2748_v43, %v2744_v42  ;;  %v4403_v42 = vld [vmem:[%s5464_s21 + $0x30] sm:$0xf]  ;;  %v5837_v43 = vld [vmem:[%s5464_s21 + $0x34] sm:$0x1] }
  0x9e   : > { %4733 = vmatmul.mubr.msk.bf16.vlgmr.msra.gmra.mrb[4].mxu0 %vm206_vm1, %v4298_v47  ;;  %4787 = vmatmul.mubr.msk.bf16.vlgmr.msra.gmra.mrb[4].mxu1 %vm206_vm1, %v4326_v48  ;;  %v4351_v47 = vld [vmem:[%s5464_s21 + $0x20] sm:$0xe]  ;;  %v4379_v48 = vld [vmem:[%s5464_s21 + $0x28] sm:$0xe] }
  0x9f   : > { %4737 = vmatpush3.bf16.msra.mxu0 %v5522_v34  ;;  %4791 = vmatpush3.bf16.msra.mxu1 %v5522_v34  ;;  %v4352_v49 = vcombine.low %v4351_v47, %v4348_v30  ;;  %v4380_v50 = vcombine.low %v4379_v48, %v4376_v32  ;;  %v5848_v47 = vld [vmem:[%s5464_s21 + $0x3c] sm:$0x1] }
  0xa0   : > { %4738 = vmatprep.mubr.msk.bf16.mxu0 %vm5409_vm0, %v5408_v1  ;;  %4742 = vmatprep.subr.bf16.mxu0 %v5408_v1 }
  0xa1   : > { %4792 = vmatprep.mubr.msk.bf16.mxu1 %vm5409_vm0, %v5408_v1  ;;  %4796 = vmatprep.subr.bf16.mxu1 %v5408_v1  ;;  %v2312_v52 = vrot.slane %v4352_v49, 1  ;;  %v2798_v53 = vrot.slane %v4380_v50, 1 }
  0xaa   : > { %4739 = vmatmul.mubr.msk.bf16.vlgmr.msra.gmra.mrb[4].mxu0 %vm206_vm1, %v1443_v56  ;;  %4793 = vmatmul.mubr.msk.bf16.vlgmr.msra.gmra.mrb[4].mxu1 %vm206_vm1, %v1929_v57  ;;  %v4384_v56 = vld [vmem:[%s5464_s21 + $0x30] sm:$0xf]  ;;  %v4385_v57 = vld [vmem:[%s5464_s21 + $0x34] sm:$0x1] }
  0xab   : > { %4743 = vmatpush3.bf16.msra.mxu0 %v5538_v44  ;;  %4797 = vmatpush3.bf16.msra.mxu1 %v5538_v44  ;;  %v4386_v60 = vcombine.low %v4384_v56, %v4385_v57 }
  0xac   : > { %4744 = vmatprep.mubr.msk.bf16.mxu0 %vm5409_vm0, %v5408_v1  ;;  %4748 = vmatprep.subr.bf16.mxu0 %v5408_v1 }
  0xad   : > { %4798 = vmatprep.mubr.msk.bf16.mxu1 %vm5409_vm0, %v5408_v1  ;;  %4802 = vmatprep.subr.bf16.mxu1 %v5408_v1  ;;  %v2896_v6 = vshrl.u32 %v4386_v60, 16 }
  0xb6   : > { %4745 = vmatmul.mubr.msk.bf16.vlgmr.msra.gmra.mrb[4].mxu0 %vm206_vm1, %v1492_v63  ;;  %4799 = vmatmul.mubr.msk.bf16.vlgmr.msra.gmra.mrb[4].mxu1 %vm206_vm1, %v1978_v3  ;;  %v2412_v63 = vshll.u32 %v4358_v58, 16  ;;  %v2898_v3 = vshll.u32 %v4386_v60, 16  ;;  %v4401_v58 = vld [vmem:[%s5464_s21 + $0x30] sm:$0xf]  ;;  %v4429_v60 = vld [vmem:[%s5464_s21 + $0x38] sm:$0xf] }
  0xb7   : > { %4749 = vmatpush3.bf16.msra.mxu0 %v5555_v51  ;;  %4803 = vmatpush3.bf16.msra.mxu1 %v5555_v51 }
  0xb8   : > { %4750 = vmatprep.mubr.msk.bf16.mxu0 %vm5409_vm0, %v5408_v1  ;;  %4754 = vmatprep.subr.bf16.mxu0 %v5408_v1  ;;  %v2414_v5 = vrot.slane %v2412_v63, 1  ;;  %v2900_v7 = vrot.slane %v2898_v3, 1 }
  0xb9   : > { %4804 = vmatprep.mubr.msk.bf16.mxu1 %vm5409_vm0, %v5408_v1  ;;  %4808 = vmatprep.subr.bf16.mxu1 %v5408_v1 }
  0xba   : > { %v2415_v9 = vor.u32 %v2414_v5, %v2410_v4  ;;  %v2901_v10 = vor.u32 %v2900_v7, %v2896_v6 }
  0xc2   : > { %4751 = vmatmul.mubr.msk.bf16.vlgmr.msra.gmra.mrb[4].mxu0 %vm206_vm1, %v4307_v11  ;;  %4805 = vmatmul.mubr.msk.bf16.vlgmr.msra.gmra.mrb[4].mxu1 %vm206_vm1, %v4335_v12  ;;  %v4360_v11 = vld [vmem:[%s5464_s21 + $0x28] sm:$0xe]  ;;  %v4388_v12 = vld [vmem:[%s5464_s21 + $0x30] sm:$0xe] }
  0xc3   : > { %4755 = vmatpush3.bf16.msra.mxu0 %v5575_v59  ;;  %4809 = vmatpush3.bf16.msra.mxu1 %v5575_v59  ;;  %v4361_v13 = vcombine.low %v4360_v11, %v4357_v55  ;;  %v4389_v14 = vcombine.low %v4388_v12, %v4385_v57 }
  0xc4   : > { %4756 = vmatprep.mubr.msk.bf16.mxu0 %vm5409_vm0, %v5408_v1  ;;  %4760 = vmatprep.subr.bf16.mxu0 %v5408_v1 }
  0xc5   : > { %4810 = vmatprep.mubr.msk.bf16.mxu1 %vm5409_vm0, %v5408_v1  ;;  %4814 = vmatprep.subr.bf16.mxu1 %v5408_v1  ;;  %v2464_v15 = vrot.slane %v4361_v13, 1  ;;  %v2950_v16 = vrot.slane %v4389_v14, 1 }
  0xce   : > { %4757 = vmatmul.mubr.msk.bf16.vlgmr.msra.gmra.mrb[4].mxu0 %vm206_vm1, %v1596_v20  ;;  %4811 = vmatmul.mubr.msk.bf16.vlgmr.msra.gmra.mrb[4].mxu1 %vm206_vm1, %v2082_v21  ;;  %v4393_v20 = vld [vmem:[%s5464_s21 + $0x38] sm:$0xf]  ;;  %v4394_v21 = vld [vmem:[%s5464_s21 + $0x3c] sm:$0x1] }
  0xcf   : > { %4761 = vmatpush3.bf16.msra.mxu0 %v5591_v8  ;;  %4815 = vmatpush3.bf16.msra.mxu1 %v5591_v8  ;;  %v4395_v23 = vcombine.low %v4393_v20, %v4394_v21 }
  0xd0   : > { %4762 = vmatprep.mubr.msk.bf16.mxu0 %vm5409_vm0, %v5408_v1  ;;  %4816 = vmatprep.mubr.msk.bf16.mxu1 %vm5409_vm0, %v5408_v1 }
  0xd1   : > { %4820 = vmatprep.subr.bf16.mxu0 %v5408_v1  ;;  %4874 = vmatprep.subr.bf16.mxu1 %v5408_v1  ;;  %v3049_v31 = vshrl.u32 %v4395_v23, 16 }
  0xda   : > { %4763 = vmatmul.mubr.msk.bf16.vlgmr.msra.gmra.mrb[4].mxu0 %vm206_vm1, %v1645_v27  ;;  %4817 = vmatmul.mubr.msk.bf16.vlgmr.msra.gmra.mrb[4].mxu1 %vm206_vm1, %v2131_v28  ;;  %v2565_v27 = vshll.u32 %v4367_v22, 16  ;;  %v3051_v28 = vshll.u32 %v4395_v23, 16  ;;  %v4435_v22 = vld [vmem:[%s5464_s21 + $0x38] sm:$0xe] }
  0xdb   : > { %4821 = vmatpush3.bf16.msra.mxu0 %v5441_v0  ;;  %4875 = vmatpush3.bf16.msra.mxu1 %v5441_v0 }
  0xdc   : > { %4822 = vmatprep.mubr.msk.bf16.mxu0 %vm5409_vm0, %v5408_v1  ;;  %4826 = vmatprep.subr.bf16.mxu0 %v5408_v1  ;;  %v2567_v30 = vrot.slane %v2565_v27, 1  ;;  %v3053_v32 = vrot.slane %v3051_v28, 1  ;;  %v4436_v27 = vcombine.low %v4435_v22, %v5848_v47 }
  0xdd   : > { %4876 = vmatprep.mubr.msk.bf16.mxu1 %vm5409_vm0, %v5408_v1  ;;  %4880 = vmatprep.subr.bf16.mxu1 %v5408_v1 }
  0xde   : > { %v2568_v33 = vor.u32 %v2567_v30, %v2563_v29  ;;  %v3054_v35 = vor.u32 %v3053_v32, %v3049_v31 }
  0xe2   : > { %4823 = vmatmul.mubr.msk.bf16.vlgmr.msra.gmra.mrb[8].mxu0 %vm206_vm1, %v4345_v36  ;;  %4877 = vmatmul.mubr.msk.bf16.vlgmr.msra.gmra.mrb[8].mxu1 %vm206_vm1, %v4373_v37  ;;  %v4369_v36 = vld [vmem:[%s5464_s21 + $0x30] sm:$0xe]  ;;  %v4397_v37 = vld [vmem:[%s5464_s21 + $0x38] sm:$0xe] }
  0xe3   : > { %4827 = vmatpush3.bf16.msra.mxu0 %v5459_v2  ;;  %4881 = vmatpush3.bf16.msra.mxu1 %v5459_v2  ;;  %v4370_v38 = vcombine.low %v4369_v36, %v4366_v18  ;;  %v4398_v39 = vcombine.low %v4397_v37, %v4394_v21  ;;  %v4407_v21 = vld [vmem:[%s5464_s21 + $0x30] sm:$0xe]  ;;  %v3770_v36 = vrot.slane %v4436_v27, 1 }
  0xe4   : > { %4828 = vmatprep.mubr.msk.bf16.mxu0 %vm5409_vm0, %v5408_v1  ;;  %4832 = vmatprep.subr.bf16.mxu0 %v5408_v1 }
  0xe5   : > { %4882 = vmatprep.mubr.msk.bf16.mxu1 %vm5409_vm0, %v5408_v1  ;;  %4886 = vmatprep.subr.bf16.mxu1 %v5408_v1  ;;  %v2617_v40 = vrot.slane %v4370_v38, 1  ;;  %v3103_v41 = vrot.slane %v4398_v39, 1 }
  0xee   : > { %4829 = vmatmul.mubr.msk.bf16.vlgmr.msra.gmra.mrb[8].mxu0 %vm206_vm1, %v2263_v45  ;;  %4883 = vmatmul.mubr.msk.bf16.vlgmr.msra.gmra.mrb[8].mxu1 %vm206_vm1, %v2749_v46  ;;  %v5844_v45 = vld [vmem:[%s6019_s2] ss:$0 sm:$0xff]  ;;  %v4431_v46 = vld [vmem:[%s5464_s21 + $0x38] sm:$0xf] }
  0xef   : > { %4833 = vmatpush3.bf16.msra.mxu0 %v5485_v19  ;;  %4887 = vmatpush3.bf16.msra.mxu1 %v5485_v19  ;;  %v4433_v55 = vcombine.low %v4431_v46, %v5848_v47 }
  0xf0   : > { %4834 = vmatprep.mubr.msk.bf16.mxu0 %vm5409_vm0, %v5408_v1  ;;  %4838 = vmatprep.subr.bf16.mxu0 %v5408_v1 }
  0xf1   : > { %4888 = vmatprep.mubr.msk.bf16.mxu1 %vm5409_vm0, %v5408_v1  ;;  %4892 = vmatprep.subr.bf16.mxu1 %v5408_v1  ;;  %v3718_v7 = vshll.u32 %v4433_v55, 16 }
  0xfa   : > { %4835 = vmatmul.mubr.msk.bf16.vlgmr.msra.gmra.mrb[8].mxu0 %vm206_vm1, %v2312_v52  ;;  %4889 = vmatmul.mubr.msk.bf16.vlgmr.msra.gmra.mrb[8].mxu1 %vm206_vm1, %v2798_v53 }
  0xfb   : > { %4839 = vmatpush3.bf16.msra.mxu0 %v5502_v26  ;;  %4893 = vmatpush3.bf16.msra.mxu1 %v5502_v26 }
  0xfc   : > { %4840 = vmatprep.mubr.msk.bf16.mxu0 %vm5409_vm0, %v5408_v1  ;;  %4844 = vmatprep.subr.bf16.mxu0 %v5408_v1 }
  0xfd   : > { %4894 = vmatprep.mubr.msk.bf16.mxu1 %vm5409_vm0, %v5408_v1  ;;  %4898 = vmatprep.subr.bf16.mxu1 %v5408_v1 }
 0x106   : > { %4841 = vmatmul.mubr.msk.bf16.vlgmr.msra.gmra.mrb[8].mxu0 %vm206_vm1, %v4354_v61  ;;  %4895 = vmatmul.mubr.msk.bf16.vlgmr.msra.gmra.mrb[8].mxu1 %vm206_vm1, %v4382_v62 }
 0x107   : > { %4845 = vmatpush3.bf16.msra.mxu0 %v5522_v34  ;;  %4899 = vmatpush3.bf16.msra.mxu1 %v5522_v34 }
 0x108   : > { %4846 = vmatprep.mubr.msk.bf16.mxu0 %vm5409_vm0, %v5408_v1  ;;  %4850 = vmatprep.subr.bf16.mxu0 %v5408_v1 }
 0x109   : > { %4900 = vmatprep.mubr.msk.bf16.mxu1 %vm5409_vm0, %v5408_v1  ;;  %4904 = vmatprep.subr.bf16.mxu1 %v5408_v1 }
 0x112   : > { %4847 = vmatmul.mubr.msk.bf16.vlgmr.msra.gmra.mrb[8].mxu0 %vm206_vm1, %v2415_v9  ;;  %4901 = vmatmul.mubr.msk.bf16.vlgmr.msra.gmra.mrb[8].mxu1 %vm206_vm1, %v2901_v10 }
 0x113   : > { %4851 = vmatpush3.bf16.msra.mxu0 %v5538_v44  ;;  %4905 = vmatpush3.bf16.msra.mxu1 %v5538_v44 }
 0x114   : > { %4852 = vmatprep.mubr.msk.bf16.mxu0 %vm5409_vm0, %v5408_v1  ;;  %4856 = vmatprep.subr.bf16.mxu0 %v5408_v1 }
 0x115   : > { %4906 = vmatprep.mubr.msk.bf16.mxu1 %vm5409_vm0, %v5408_v1  ;;  %4910 = vmatprep.subr.bf16.mxu1 %v5408_v1 }
 0x11e   : > { %4853 = vmatmul.mubr.msk.bf16.vlgmr.msra.gmra.mrb[8].mxu0 %vm206_vm1, %v2464_v15  ;;  %4907 = vmatmul.mubr.msk.bf16.vlgmr.msra.gmra.mrb[8].mxu1 %vm206_vm1, %v2950_v16  ;;  %v3716_v15 = vshrl.u32 %v4433_v55, 16 }
 0x11f   : > { %4857 = vmatpush3.bf16.msra.mxu0 %v5555_v51  ;;  %4911 = vmatpush3.bf16.msra.mxu1 %v5555_v51 }
 0x120   : > { %4858 = vmatprep.mubr.msk.bf16.mxu0 %vm5409_vm0, %v5408_v1  ;;  %4862 = vmatprep.subr.bf16.mxu0 %v5408_v1 }
 0x121   : > { %4912 = vmatprep.mubr.msk.bf16.mxu1 %vm5409_vm0, %v5408_v1  ;;  %4916 = vmatprep.subr.bf16.mxu1 %v5408_v1 }
 0x12a   : > { %4859 = vmatmul.mubr.msk.bf16.vlgmr.msra.gmra.mrb[8].mxu0 %vm206_vm1, %v4363_v24  ;;  %4913 = vmatmul.mubr.msk.bf16.vlgmr.msra.gmra.mrb[8].mxu1 %vm206_vm1, %v4391_v25  ;;  %v4408_v25 = vcombine.low %v4407_v21, %v5837_v43 }
 0x12b   : > { %4863 = vmatpush3.bf16.msra.mxu0 %v5575_v59  ;;  %4917 = vmatpush3.bf16.msra.mxu1 %v5575_v59 }
 0x12c   : > { %4864 = vmatprep.mubr.msk.bf16.mxu0 %vm5409_vm0, %v5408_v1  ;;  %4868 = vmatprep.subr.bf16.mxu0 %v5408_v1 }
 0x12d   : > { %4918 = vmatprep.mubr.msk.bf16.mxu1 %vm5409_vm0, %v5408_v1  ;;  %4922 = vmatprep.subr.bf16.mxu1 %v5408_v1 }
 0x136   : > { %4865 = vmatmul.mubr.msk.bf16.vlgmr.msra.gmra.mrb[8].mxu0 %vm206_vm1, %v2568_v33  ;;  %4919 = vmatmul.mubr.msk.bf16.vlgmr.msra.gmra.mrb[8].mxu1 %vm206_vm1, %v3054_v35  ;;  %v3284_v35 = vrot.slane %v4408_v25, 1 }
 0x137   : > { %4869 = vmatpush3.bf16.msra.mxu0 %v5591_v8  ;;  %4923 = vmatpush3.bf16.msra.mxu1 %v5591_v8 }
 0x138   : > { %4870 = vmatprep.mubr.msk.bf16.mxu0 %vm5409_vm0, %v5408_v1  ;;  %4924 = vmatprep.mubr.msk.bf16.mxu1 %vm5409_vm0, %v5408_v1 }
 0x139   : > { %4928 = vmatprep.subr.bf16.mxu0 %v5408_v1  ;;  %4982 = vmatprep.subr.bf16.mxu1 %v5408_v1 }
 0x142   : > { %4871 = vmatmul.mubr.msk.bf16.vlgmr.msra.gmra.mrb[8].mxu0 %vm206_vm1, %v2617_v40  ;;  %4925 = vmatmul.mubr.msk.bf16.vlgmr.msra.gmra.mrb[8].mxu1 %vm206_vm1, %v3103_v41 }
 0x143   : > { %4929 = vmatpush3.bf16.msra.mxu0 %v5441_v0  ;;  %4983 = vmatpush3.bf16.msra.mxu1 %v5441_v0  ;;  %v4405_v0 = vcombine.low %v4403_v42, %v5837_v43 }
 0x144   : > { %4930 = vmatprep.mubr.msk.bf16.mxu0 %vm5409_vm0, %v5408_v1  ;;  %4934 = vmatprep.subr.bf16.mxu0 %v5408_v1 }
 0x145   : > { %v711_v48 = vpop.f32.mrb[0].mxu0  ;;  %v1197_v49 = vpop.f32.mrb[0].mxu1  ;;  %4984 = vmatprep.mubr.msk.bf16.mxu1 %vm5409_vm0, %v5408_v1  ;;  %4988 = vmatprep.subr.bf16.mxu1 %v5408_v1  ;;  %v3232_v4 = vshll.u32 %v4405_v0, 16  ;;  %v3230_v11 = vshrl.u32 %v4405_v0, 16 }
 0x146   : > { %v5858_v50 = vadd.f32 %v5844_v45, %v711_v48  ;;  %v5861_v52 = vadd.f32 %v5844_v45, %v1197_v49  ;;  %v4656_v53 = vpop.f32.mrb[1].mxu0  ;;  %v4710_v54 = vpop.f32.mrb[1].mxu1  ;;  %v4412_v48 = vld [vmem:[%s5464_s21 + $0x38] sm:$0xf]  ;;  %v5910_v49 = vld [vmem:[%s5464_s21 + $0x3c] sm:$0x1] }
 0x147   : > { %v714_v56 = vpop.f32.mrb[2].mxu0  ;;  %v1200_v57 = vpop.f32.mrb[2].mxu1  ;;  %v3234_v12 = vrot.slane %v3232_v4, 1  ;;  %v5914_v53 = vld [vmem:[%s5464_s21 + $0x44] sm:$0x1] }
 0x148   : > { %v5867_v61 = vmul.f32 0.70710677, %v5858_v50  ;;  %v5870_v62 = vmul.f32 0.70710677, %v5861_v52  ;;  %v4657_v63 = vpop.f32.mrb[3].mxu0  ;;  %v4711_v3 = vpop.f32.mrb[3].mxu1  ;;  %v4414_v56 = vcombine.low %v4412_v48, %v5910_v49 }
 0x149   : > { %v3235_v16 = vor.u32 %v3234_v12, %v3230_v11  ;;  %v4410_v63 = vld [vmem:[%s5464_s21 + $0x38] sm:$0xf]  ;;  %v4438_v3 = vld [vmem:[%s5464_s21 + $0x40] sm:$0xf] }
 0x14a   : > { %v720_v5 = vand.u32 2147483647, %v5867_v61  ;;  %v1206_v6 = vand.u32 2147483647, %v5870_v62  ;;  %4931 = vmatmul.mubr.msk.bf16.vlgmr.msra.gmra.mrb[12].mxu0 %vm206_vm1, %v4401_v58  ;;  %4985 = vmatmul.mubr.msk.bf16.vlgmr.msra.gmra.mrb[12].mxu1 %vm206_vm1, %v4429_v60  ;;  %vm739_vm2 = vcmp.ge.f32.partialorder %v5867_v61, 0.0  ;;  %vm1225_vm3 = vcmp.ge.f32.partialorder %v5870_v62, 0.0 }
 0x14b   : > { %4935 = vmatpush3.bf16.msra.mxu0 %v5459_v2  ;;  %4989 = vmatpush3.bf16.msra.mxu1 %v5459_v2  ;;  %v3720_v2 = vrot.slane %v3718_v7, 1 }
 0x14c   : > { %v721_v9 = vmul.f32 0.3275911, %v720_v5  ;;  %v1207_v10 = vmul.f32 0.3275911, %v1206_v6  ;;  %4936 = vmatprep.mubr.msk.bf16.mxu0 %vm5409_vm0, %v5408_v1  ;;  %4940 = vmatprep.subr.bf16.mxu0 %v5408_v1  ;;  %v733_v18 = vsub.f32 0.0, %v720_v5  ;;  %v1219_v20 = vsub.f32 0.0, %v1206_v6 }
 0x14d   : > { %4990 = vmatprep.mubr.msk.bf16.mxu1 %vm5409_vm0, %v5408_v1  ;;  %4994 = vmatprep.subr.bf16.mxu1 %v5408_v1  ;;  %v3721_v17 = vor.u32 %v3720_v2, %v3716_v15  ;;  %v3382_v15 = vshrl.u32 %v4414_v56, 16 }
 0x14e   : > { %v722_v13 = vadd.f32 1.0, %v721_v9  ;;  %v1208_v14 = vadd.f32 1.0, %v1207_v10  ;;  %v734_v24 = vmul.f32 %v733_v18, %v720_v5  ;;  %v1220_v29 = vmul.f32 %v1219_v20, %v1206_v6 }
 0x14f   : > { %v3384_v9 = vshll.u32 %v4414_v56, 16  ;;  %v718_v20 = vmul.f32 0.5, %v5858_v50 }
 0x150   : > { %5368 = vrcp.f32 %v722_v13  ;;  %v735_v32 = vmul.f32 1.442695, %v734_v24  ;;  %v1221_v38 = vmul.f32 1.442695, %v1220_v29 }
 0x151   : > { %5370 = vrcp.f32 %v1208_v14  ;;  %v3386_v2 = vrot.slane %v3384_v9, 1 }
 0x152   : > { %5372 = vpow2.f32 %v735_v32  ;;  %v4421_v32 = vld [vmem:[%s5464_s21 + $0x40] sm:$0xf] }
 0x153   : > { %5374 = vpow2.f32 %v1221_v38  ;;  %v3387_v27 = vor.u32 %v3386_v2, %v3382_v15 }
 0x156   : > { %4937 = vmatmul.mubr.msk.bf16.vlgmr.msra.gmra.mrb[12].mxu0 %vm206_vm1, %v3235_v16  ;;  %4991 = vmatmul.mubr.msk.bf16.vlgmr.msra.gmra.mrb[12].mxu1 %vm206_vm1, %v3721_v17 }
 0x157   : > { %4941 = vmatpush3.bf16.msra.mxu0 %v5485_v19  ;;  %4995 = vmatpush3.bf16.msra.mxu1 %v5485_v19 }
 0x158   : > { %4942 = vmatprep.mubr.msk.bf16.mxu0 %vm5409_vm0, %v5408_v1  ;;  %4946 = vmatprep.subr.bf16.mxu0 %v5408_v1 }
 0x159   : > { %4996 = vmatprep.mubr.msk.bf16.mxu1 %vm5409_vm0, %v5408_v1  ;;  %5000 = vmatprep.subr.bf16.mxu1 %v5408_v1 }
 0x15a   : > { %v5369_v23 = vpop.eup %5368 }
 0x15b   : > { %v5371_v28 = vpop.eup %5370  ;;  %v724_v19 = vmul.f32 1.0614054, %v5369_v23 }
 0x15c   : > { %v1210_v30 = vmul.f32 1.0614054, %v5371_v28  ;;  %v5373_v4 = vpop.eup %5372 }
 0x15d   : > { %v725_v31 = vadd.f32 -1.4531521, %v724_v19  ;;  %v5375_v6 = vpop.eup %5374  ;;  %v4444_v19 = vld [vmem:[%s5464_s21 + $0x40] sm:$0xe] }
 0x15e   : > { %v1211_v33 = vadd.f32 -1.4531521, %v1210_v30 }
 0x15f   : > { %v726_v37 = vmul.f32 %v5369_v23, %v725_v31 }
 0x160   : > { %v1212_v39 = vmul.f32 %v5371_v28, %v1211_v33  ;;  %v4422_v33 = vld [vmem:[%s5464_s21 + $0x44] sm:$0x1] }
 0x161   : > { %v727_v40 = vadd.f32 1.4214138, %v726_v37  ;;  %v4423_v37 = vcombine.low %v4421_v32, %v4422_v33 }
 0x162   : > { %v1213_v41 = vadd.f32 1.4214138, %v1212_v39  ;;  %4943 = vmatmul.mubr.msk.bf16.vlgmr.msra.gmra.mrb[12].mxu0 %vm206_vm1, %v3284_v35  ;;  %4997 = vmatmul.mubr.msk.bf16.vlgmr.msra.gmra.mrb[12].mxu1 %vm206_vm1, %v3770_v36  ;;  %v4449_v35 = vld [vmem:[%s5464_s21 + $0x48] sm:$0xf]  ;;  %v4450_v36 = vld [vmem:[%s5464_s21 + $0x4c] sm:$0x1] }
 0x163   : > { %v728_v42 = vmul.f32 %v5369_v23, %v727_v40  ;;  %4947 = vmatpush3.bf16.msra.mxu0 %v5502_v26  ;;  %5001 = vmatpush3.bf16.msra.mxu1 %v5502_v26  ;;  %v4440_v26 = vld [vmem:[%s5464_s21 + $0x40] sm:$0xf]  ;;  %v4451_v38 = vcombine.low %v4449_v35, %v4450_v36  ;;  %v4447_v40 = vld [vmem:[%s5464_s21 + $0x48] sm:$0xf] }
 0x164   : > { %v1214_v43 = vmul.f32 %v5371_v28, %v1213_v41  ;;  %4948 = vmatprep.mubr.msk.bf16.mxu0 %vm5409_vm0, %v5408_v1  ;;  %4952 = vmatprep.subr.bf16.mxu0 %v5408_v1  ;;  %v4442_v58 = vcombine.low %v4440_v26, %v5914_v53  ;;  %v4419_v39 = vld [vmem:[%s5464_s21 + $0x40] sm:$0xf] }
 0x165   : > { %v729_v46 = vadd.f32 -0.28449672, %v728_v42  ;;  %5002 = vmatprep.mubr.msk.bf16.mxu1 %vm5409_vm0, %v5408_v1  ;;  %5006 = vmatprep.subr.bf16.mxu1 %v5408_v1  ;;  %v4023_v41 = vshll.u32 %v4451_v38, 16  ;;  %v3535_v42 = vshrl.u32 %v4423_v37, 16 }
 0x166   : > { %v1215_v47 = vadd.f32 -0.28449672, %v1214_v43  ;;  %v3870_v11 = vshll.u32 %v4442_v58, 16  ;;  %v3868_v17 = vshrl.u32 %v4442_v58, 16 }
 0x167   : > { %v730_v0 = vmul.f32 %v5369_v23, %v729_v46  ;;  %v4021_v46 = vshrl.u32 %v4451_v38, 16 }
 0x168   : > { %v1216_v54 = vmul.f32 %v5371_v28, %v1215_v47  ;;  %v3872_v18 = vrot.slane %v3870_v11, 1  ;;  %v4025_v47 = vrot.slane %v4023_v41, 1 }
 0x169   : > { %v731_v55 = vadd.f32 0.2548296, %v730_v0  ;;  %v4453_v0 = vld [vmem:[%s5464_s21 + $0x48] sm:$0xe] }
 0x16a   : > { %v1217_v57 = vadd.f32 0.2548296, %v1216_v54 }
 0x16b   : > { %v732_v60 = vmul.f32 %v5369_v23, %v731_v55  ;;  %v1204_v23 = vmul.f32 0.5, %v5861_v52  ;;  %v4416_v52 = vld [vmem:[%s5464_s21 + $0x38] sm:$0xe] }
 0x16c   : > { %v1218_v5 = vmul.f32 %v5371_v28, %v1217_v57  ;;  %v3873_v28 = vor.u32 %v3872_v18, %v3868_v17  ;;  %v4417_v29 = vcombine.low %v4416_v52, %v5910_v49  ;;  %v4026_v49 = vor.u32 %v4025_v47, %v4021_v46 }
 0x16d   : > { %v737_v7 = vmul.f32 %v5373_v4, %v732_v60 }
 0x16e   : > { %v1223_v10 = vmul.f32 %v5375_v6, %v1218_v5  ;;  %4949 = vmatmul.mubr.msk.bf16.vlgmr.msra.gmra.mrb[12].mxu0 %vm206_vm1, %v4410_v63  ;;  %5003 = vmatmul.mubr.msk.bf16.vlgmr.msra.gmra.mrb[12].mxu1 %vm206_vm1, %v4438_v3  ;;  %v3436_v30 = vrot.slane %v4417_v29, 1 }
 0x16f   : > { %v738_v12 = vsub.f32 1.0, %v737_v7  ;;  %4953 = vmatpush3.bf16.msra.mxu0 %v5522_v34  ;;  %5007 = vmatpush3.bf16.msra.mxu1 %v5522_v34 }
 0x170   : > { %v1224_v13 = vsub.f32 1.0, %v1223_v10  ;;  %4954 = vmatprep.mubr.msk.bf16.mxu0 %vm5409_vm0, %v5408_v1  ;;  %4958 = vmatprep.subr.bf16.mxu0 %v5408_v1 }
 0x171   : > { %v740_v14 = vsub.f32 0.0, %v738_v12  ;;  %5008 = vmatprep.mubr.msk.bf16.mxu1 %vm5409_vm0, %v5408_v1  ;;  %5012 = vmatprep.subr.bf16.mxu1 %v5408_v1 }
 0x172   : > { %v1226_v16 = vsub.f32 0.0, %v1224_v13 }
 0x173   : > { %v741_v34 = vsel %vm739_vm2, %v738_v12, %v740_v14 }
 0x174   : > { %v742_v21 = vadd.f32 1.0, %v741_v34  ;;  %v1227_v22 = vsel %vm1225_vm3, %v1224_v13, %v1226_v16 }
 0x175   : > { %v1228_v24 = vadd.f32 1.0, %v1227_v22 }
 0x176   : > { %v743_v25 = vmul.f32 %v742_v21, %v718_v20 }
 0x177   : > { %v1229_v61 = vmul.f32 %v1228_v24, %v1204_v23 }
 0x178   : > { %v744_v50 = vpack.c.bf16 %v743_v25, %v743_v25 }
 0x179   : > { %v1230_v62 = vpack.c.bf16 %v1229_v61, %v1229_v61 }
 0x17a   : > { %746 = vst.msk [vmem:[%s5938_s16] sm:$0xf] %vm745_vm4, %v744_v50  ;;  %4955 = vmatmul.mubr.msk.bf16.vlgmr.msra.gmra.mrb[12].mxu0 %vm206_vm1, %v3387_v27  ;;  %5009 = vmatmul.mubr.msk.bf16.vlgmr.msra.gmra.mrb[12].mxu1 %vm206_vm1, %v3873_v28 }
 0x17b   : > { %4288 = vst.msk [vmem:[%s5938_s16 + $0x4] sm:$0xf] %vm745_vm4, %v1230_v62  ;;  %4959 = vmatpush3.bf16.msra.mxu0 %v5538_v44  ;;  %5013 = vmatpush3.bf16.msra.mxu1 %v5538_v44  ;;  %v4445_v44 = vcombine.low %v4444_v19, %v5914_v53  ;;  %v4454_v53 = vcombine.low %v4453_v0, %v4450_v36 }
 0x17c   : > { %4960 = vmatprep.mubr.msk.bf16.mxu0 %vm5409_vm0, %v5408_v1  ;;  %4964 = vmatprep.subr.bf16.mxu0 %v5408_v1 }
 0x17d   : > { %5014 = vmatprep.mubr.msk.bf16.mxu1 %vm5409_vm0, %v5408_v1  ;;  %5018 = vmatprep.subr.bf16.mxu1 %v5408_v1  ;;  %v3922_v31 = vrot.slane %v4445_v44, 1  ;;  %v4075_v55 = vrot.slane %v4454_v53, 1 }
 0x186   : > { %4961 = vmatmul.mubr.msk.bf16.vlgmr.msra.gmra.mrb[12].mxu0 %vm206_vm1, %v3436_v30  ;;  %5015 = vmatmul.mubr.msk.bf16.vlgmr.msra.gmra.mrb[12].mxu1 %vm206_vm1, %v3922_v31 }
 0x187   : > { %4965 = vmatpush3.bf16.msra.mxu0 %v5555_v51  ;;  %5019 = vmatpush3.bf16.msra.mxu1 %v5555_v51  ;;  %v3537_v51 = vshll.u32 %v4423_v37, 16 }
 0x188   : > { %4966 = vmatprep.mubr.msk.bf16.mxu0 %vm5409_vm0, %v5408_v1  ;;  %4970 = vmatprep.subr.bf16.mxu0 %v5408_v1 }
 0x189   : > { %5020 = vmatprep.mubr.msk.bf16.mxu1 %vm5409_vm0, %v5408_v1  ;;  %5024 = vmatprep.subr.bf16.mxu1 %v5408_v1  ;;  %v3539_v43 = vrot.slane %v3537_v51, 1 }
 0x18b   : > { %v3540_v48 = vor.u32 %v3539_v43, %v3535_v42 }
 0x192   : > { %4967 = vmatmul.mubr.msk.bf16.vlgmr.msra.gmra.mrb[12].mxu0 %vm206_vm1, %v4419_v39  ;;  %5021 = vmatmul.mubr.msk.bf16.vlgmr.msra.gmra.mrb[12].mxu1 %vm206_vm1, %v4447_v40 }
 0x193   : > { %4971 = vmatpush3.bf16.msra.mxu0 %v5575_v59  ;;  %5025 = vmatpush3.bf16.msra.mxu1 %v5575_v59  ;;  %v4425_v59 = vld [vmem:[%s5464_s21 + $0x40] sm:$0xe] }
 0x194   : > { %4972 = vmatprep.mubr.msk.bf16.mxu0 %vm5409_vm0, %v5408_v1  ;;  %4976 = vmatprep.subr.bf16.mxu0 %v5408_v1  ;;  %v4426_v26 = vcombine.low %v4425_v59, %v4422_v33 }
 0x195   : > { %5026 = vmatprep.mubr.msk.bf16.mxu1 %vm5409_vm0, %v5408_v1  ;;  %5030 = vmatprep.subr.bf16.mxu1 %v5408_v1 }
 0x196   : > { %v3589_v54 = vrot.slane %v4426_v26, 1 }
 0x19e   : > { %4973 = vmatmul.mubr.msk.bf16.vlgmr.msra.gmra.mrb[12].mxu0 %vm206_vm1, %v3540_v48  ;;  %5027 = vmatmul.mubr.msk.bf16.vlgmr.msra.gmra.mrb[12].mxu1 %vm206_vm1, %v4026_v49 }
 0x19f   : > { %4977 = vmatpush3.bf16.msra.mxu0 %v5591_v8  ;;  %5031 = vmatpush3.bf16.msra.mxu1 %v5591_v8 }
 0x1a0   : > { %4978 = vmatprep.mubr.msk.bf16.mxu0 %vm5409_vm0, %v5408_v1  ;;  %5032 = vmatprep.mubr.msk.bf16.mxu1 %vm5409_vm0, %v5408_v1 }
 0x1aa   : > { %4979 = vmatmul.mubr.msk.bf16.vlgmr.msra.gmra.mrb[12].mxu0 %vm206_vm1, %v3589_v54  ;;  %5033 = vmatmul.mubr.msk.bf16.vlgmr.msra.gmra.mrb[12].mxu1 %vm206_vm1, %v4075_v55 }
 0x1ad   : > { %v1683_v56 = vpop.f32.mrb[4].mxu0  ;;  %v2169_v57 = vpop.f32.mrb[4].mxu1 }
 0x1ae   : > { %v5038_v8 = vadd.f32 %v5844_v45, %v1683_v56  ;;  %v5039_v58 = vadd.f32 %v5844_v45, %v2169_v57  ;;  %v4764_v60 = vpop.f32.mrb[5].mxu0  ;;  %v4818_v63 = vpop.f32.mrb[5].mxu1 }
 0x1af   : > { %v1686_v3 = vpop.f32.mrb[6].mxu0  ;;  %v2172_v4 = vpop.f32.mrb[6].mxu1 }
 0x1b0   : > { %v1691_v5 = vmul.f32 0.70710677, %v5038_v8  ;;  %v2177_v1 = vmul.f32 0.70710677, %v5039_v58  ;;  %v4765_v6 = vpop.f32.mrb[7].mxu0  ;;  %v4819_v7 = vpop.f32.mrb[7].mxu1 }
 0x1b1   : > { %v1690_v46 = vmul.f32 0.5, %v5038_v8  ;;  %v2176_v49 = vmul.f32 0.5, %v5039_v58 }
 0x1b2   : > { %v1692_v9 = vand.u32 2147483647, %v1691_v5  ;;  %v2178_v10 = vand.u32 2147483647, %v2177_v1  ;;  %vm1711_vm5 = vcmp.ge.f32.partialorder %v1691_v5, 0.0  ;;  %vm2197_vm6 = vcmp.ge.f32.partialorder %v2177_v1, 0.0 }
 0x1b4   : > { %v1693_v11 = vmul.f32 0.3275911, %v1692_v9  ;;  %v2179_v12 = vmul.f32 0.3275911, %v2178_v10  ;;  %v1705_v15 = vsub.f32 0.0, %v1692_v9  ;;  %v2191_v2 = vsub.f32 0.0, %v2178_v10 }
 0x1b6   : > { %v1694_v13 = vadd.f32 1.0, %v1693_v11  ;;  %v2180_v14 = vadd.f32 1.0, %v2179_v12  ;;  %v1706_v17 = vmul.f32 %v1705_v15, %v1692_v9  ;;  %v2192_v20 = vmul.f32 %v2191_v2, %v2178_v10 }
 0x1b8   : > { %5376 = vrcp.f32 %v1694_v13  ;;  %v1707_v23 = vmul.f32 1.442695, %v1706_v17  ;;  %v2193_v27 = vmul.f32 1.442695, %v2192_v20 }
 0x1b9   : > { %5378 = vrcp.f32 %v2180_v14 }
 0x1ba   : > { %5380 = vpow2.f32 %v1707_v23 }
 0x1bb   : > { %5382 = vpow2.f32 %v2193_v27 }
 0x1c2   : > { %v5377_v16 = vpop.eup %5376 }
 0x1c3   : > { %v5379_v18 = vpop.eup %5378  ;;  %v1696_v34 = vmul.f32 1.0614054, %v5377_v16 }
 0x1c4   : > { %v2182_v21 = vmul.f32 1.0614054, %v5379_v18  ;;  %v5381_v35 = vpop.eup %5380 }
 0x1c5   : > { %v1697_v22 = vadd.f32 -1.4531521, %v1696_v34  ;;  %v5383_v37 = vpop.eup %5382 }
 0x1c6   : > { %v2183_v24 = vadd.f32 -1.4531521, %v2182_v21 }
 0x1c7   : > { %v1698_v25 = vmul.f32 %v5377_v16, %v1697_v22 }
 0x1c8   : > { %v2184_v28 = vmul.f32 %v5379_v18, %v2183_v24 }
 0x1c9   : > { %v1699_v61 = vadd.f32 1.4214138, %v1698_v25 }
 0x1ca   : > { %v2185_v50 = vadd.f32 1.4214138, %v2184_v28 }
 0x1cb   : > { %v1700_v62 = vmul.f32 %v5377_v16, %v1699_v61 }
 0x1cc   : > { %v2186_v52 = vmul.f32 %v5379_v18, %v2185_v50 }
 0x1cd   : > { %v1701_v19 = vadd.f32 -0.28449672, %v1700_v62 }
 0x1ce   : > { %v2187_v29 = vadd.f32 -0.28449672, %v2186_v52 }
 0x1cf   : > { %v1702_v44 = vmul.f32 %v5377_v16, %v1701_v19 }
 0x1d0   : > { %v2188_v30 = vmul.f32 %v5379_v18, %v2187_v29 }
 0x1d1   : > { %v1703_v31 = vadd.f32 0.2548296, %v1702_v44 }
 0x1d2   : > { %v2189_v32 = vadd.f32 0.2548296, %v2188_v30 }
 0x1d3   : > { %v1704_v33 = vmul.f32 %v5377_v16, %v1703_v31 }
 0x1d4   : > { %v2190_v36 = vmul.f32 %v5379_v18, %v2189_v32 }
 0x1d5   : > { %v1709_v38 = vmul.f32 %v5381_v35, %v1704_v33 }
 0x1d6   : > { %v2195_v39 = vmul.f32 %v5383_v37, %v2190_v36 }
 0x1d7   : > { %v1710_v40 = vsub.f32 1.0, %v1709_v38 }
 0x1d8   : > { %v2196_v51 = vsub.f32 1.0, %v2195_v39 }
 0x1d9   : > { %v1712_v41 = vsub.f32 0.0, %v1710_v40 }
 0x1da   : > { %v2198_v42 = vsub.f32 0.0, %v2196_v51 }
 0x1db   : > { %v1713_v43 = vsel %vm1711_vm5, %v1710_v40, %v1712_v41 }
 0x1dc   : > { %v1714_v47 = vadd.f32 1.0, %v1713_v43  ;;  %v2199_v48 = vsel %vm2197_vm6, %v2196_v51, %v2198_v42 }
 0x1dd   : > { %v2200_v59 = vadd.f32 1.0, %v2199_v48 }
 0x1de   : > { %v1715_v0 = vmul.f32 %v1714_v47, %v1690_v46 }
 0x1df   : > { %v2201_v26 = vmul.f32 %v2200_v59, %v2176_v49 }
 0x1e0   : > { %v1716_v53 = vpack.c.bf16 %v1715_v0, %v1715_v0 }
 0x1e1   : > { %v2202_v54 = vpack.c.bf16 %v2201_v26, %v2201_v26 }
 0x1e2   : > { %4316 = vst.msk [vmem:[%s5938_s16 + $0x8] sm:$0xf] %vm745_vm4, %v1716_v53 }
 0x1e3   : > { %4344 = vst.msk [vmem:[%s5938_s16 + $0xc] sm:$0xf] %vm745_vm4, %v2202_v54 }
 0x215   : > { %v2655_v55 = vpop.f32.mrb[8].mxu0  ;;  %v3141_v56 = vpop.f32.mrb[8].mxu1 }
 0x216   : > { %v5040_v57 = vadd.f32 %v5844_v45, %v2655_v55  ;;  %v5041_v60 = vadd.f32 %v5844_v45, %v3141_v56  ;;  %v4872_v63 = vpop.f32.mrb[9].mxu0  ;;  %v4926_v8 = vpop.f32.mrb[9].mxu1 }
 0x217   : > { %v2658_v3 = vpop.f32.mrb[10].mxu0  ;;  %v3144_v4 = vpop.f32.mrb[10].mxu1 }
 0x218   : > { %v2663_v58 = vmul.f32 0.70710677, %v5040_v57  ;;  %v3149_v5 = vmul.f32 0.70710677, %v5041_v60  ;;  %v4873_v1 = vpop.f32.mrb[11].mxu0  ;;  %v4927_v6 = vpop.f32.mrb[11].mxu1 }
 0x219   : > { %v2662_v43 = vmul.f32 0.5, %v5040_v57  ;;  %v3148_v48 = vmul.f32 0.5, %v5041_v60 }
 0x21a   : > { %v2664_v7 = vand.u32 2147483647, %v2663_v58  ;;  %v3150_v9 = vand.u32 2147483647, %v3149_v5  ;;  %vm2683_vm7 = vcmp.ge.f32.partialorder %v2663_v58, 0.0  ;;  %vm3169_vm8 = vcmp.ge.f32.partialorder %v3149_v5, 0.0 }
 0x21c   : > { %v2665_v10 = vmul.f32 0.3275911, %v2664_v7  ;;  %v3151_v11 = vmul.f32 0.3275911, %v3150_v9  ;;  %v2677_v14 = vsub.f32 0.0, %v2664_v7  ;;  %v3163_v15 = vsub.f32 0.0, %v3150_v9 }
 0x21e   : > { %v2666_v12 = vadd.f32 1.0, %v2665_v10  ;;  %v3152_v13 = vadd.f32 1.0, %v3151_v11  ;;  %v2678_v16 = vmul.f32 %v2677_v14, %v2664_v7  ;;  %v3164_v34 = vmul.f32 %v3163_v15, %v3150_v9 }
 0x220   : > { %5384 = vrcp.f32 %v2666_v12  ;;  %v2679_v22 = vmul.f32 1.442695, %v2678_v16  ;;  %v3165_v25 = vmul.f32 1.442695, %v3164_v34 }
 0x221   : > { %5386 = vrcp.f32 %v3152_v13 }
 0x222   : > { %5388 = vpow2.f32 %v2679_v22 }
 0x223   : > { %5390 = vpow2.f32 %v3165_v25 }
 0x22a   : > { %v5385_v2 = vpop.eup %5384 }
 0x22b   : > { %v5387_v17 = vpop.eup %5386  ;;  %v2668_v18 = vmul.f32 1.0614054, %v5385_v2 }
 0x22c   : > { %v3154_v20 = vmul.f32 1.0614054, %v5387_v17  ;;  %v5389_v33 = vpop.eup %5388 }
 0x22d   : > { %v2669_v21 = vadd.f32 -1.4531521, %v2668_v18  ;;  %v5391_v36 = vpop.eup %5390 }
 0x22e   : > { %v3155_v23 = vadd.f32 -1.4531521, %v3154_v20 }
 0x22f   : > { %v2670_v24 = vmul.f32 %v5385_v2, %v2669_v21 }
 0x230   : > { %v3156_v27 = vmul.f32 %v5387_v17, %v3155_v23 }
 0x231   : > { %v2671_v28 = vadd.f32 1.4214138, %v2670_v24 }
 0x232   : > { %v3157_v61 = vadd.f32 1.4214138, %v3156_v27 }
 0x233   : > { %v2672_v50 = vmul.f32 %v5385_v2, %v2671_v28 }
 0x234   : > { %v3158_v62 = vmul.f32 %v5387_v17, %v3157_v61 }
 0x235   : > { %v2673_v52 = vadd.f32 -0.28449672, %v2672_v50 }
 0x236   : > { %v3159_v19 = vadd.f32 -0.28449672, %v3158_v62 }
 0x237   : > { %v2674_v29 = vmul.f32 %v5385_v2, %v2673_v52 }
 0x238   : > { %v3160_v44 = vmul.f32 %v5387_v17, %v3159_v19 }
 0x239   : > { %v2675_v30 = vadd.f32 0.2548296, %v2674_v29 }
 0x23a   : > { %v3161_v31 = vadd.f32 0.2548296, %v3160_v44 }
 0x23b   : > { %v2676_v32 = vmul.f32 %v5385_v2, %v2675_v30 }
 0x23c   : > { %v3162_v35 = vmul.f32 %v5387_v17, %v3161_v31 }
 0x23d   : > { %v2681_v37 = vmul.f32 %v5389_v33, %v2676_v32 }
 0x23e   : > { %v3167_v38 = vmul.f32 %v5391_v36, %v3162_v35 }
 0x23f   : > { %v2682_v39 = vsub.f32 1.0, %v2681_v37 }
 0x240   : > { %v3168_v40 = vsub.f32 1.0, %v3167_v38 }
 0x241   : > { %v2684_v51 = vsub.f32 0.0, %v2682_v39 }
 0x242   : > { %v3170_v41 = vsub.f32 0.0, %v3168_v40 }
 0x243   : > { %v2685_v42 = vsel %vm2683_vm7, %v2682_v39, %v2684_v51 }
 0x244   : > { %v2686_v46 = vadd.f32 1.0, %v2685_v42  ;;  %v3171_v47 = vsel %vm3169_vm8, %v3168_v40, %v3170_v41 }
 0x245   : > { %v3172_v49 = vadd.f32 1.0, %v3171_v47 }
 0x246   : > { %v2687_v59 = vmul.f32 %v2686_v46, %v2662_v43 }
 0x247   : > { %v3173_v0 = vmul.f32 %v3172_v49, %v3148_v48 }
 0x248   : > { %v2688_v26 = vpack.c.bf16 %v2687_v59, %v2687_v59 }
 0x249   : > { %v3174_v53 = vpack.c.bf16 %v3173_v0, %v3173_v0 }
 0x24a   : > { %4372 = vst.msk [vmem:[%s5938_s16 + $0x10] sm:$0xf] %vm745_vm4, %v2688_v26 }
 0x24b   : > { %4400 = vst.msk [vmem:[%s5938_s16 + $0x14] sm:$0xf] %vm745_vm4, %v3174_v53 }
 0x27d   : > { %v3627_v54 = vpop.f32.mrb[12].mxu0  ;;  %v4113_v55 = vpop.f32.mrb[12].mxu1 }
 0x27e   : > { %v5042_v56 = vadd.f32 %v5844_v45, %v3627_v54  ;;  %v5043_v63 = vadd.f32 %v5844_v45, %v4113_v55  ;;  %v4980_v8 = vpop.f32.mrb[13].mxu0  ;;  %v5034_v57 = vpop.f32.mrb[13].mxu1 }
 0x27f   : > { %v3630_v3 = vpop.f32.mrb[14].mxu0  ;;  %v4116_v4 = vpop.f32.mrb[14].mxu1 }
 0x280   : > { %v3635_v60 = vmul.f32 0.70710677, %v5042_v56  ;;  %v4121_v58 = vmul.f32 0.70710677, %v5043_v63  ;;  %v4981_v5 = vpop.f32.mrb[15].mxu0  ;;  %v5035_v1 = vpop.f32.mrb[15].mxu1 }
 0x281   : > { %v3634_v41 = vmul.f32 0.5, %v5042_v56  ;;  %v4120_v46 = vmul.f32 0.5, %v5043_v63 }
 0x282   : > { %v3636_v6 = vand.u32 2147483647, %v3635_v60  ;;  %v4122_v7 = vand.u32 2147483647, %v4121_v58  ;;  %vm3655_vm9 = vcmp.ge.f32.partialorder %v3635_v60, 0.0  ;;  %vm4141_vm10 = vcmp.ge.f32.partialorder %v4121_v58, 0.0 }
 0x284   : > { %v3637_v9 = vmul.f32 0.3275911, %v3636_v6  ;;  %v4123_v10 = vmul.f32 0.3275911, %v4122_v7  ;;  %v3649_v13 = vsub.f32 0.0, %v3636_v6  ;;  %v4135_v14 = vsub.f32 0.0, %v4122_v7 }
 0x286   : > { %v3638_v11 = vadd.f32 1.0, %v3637_v9  ;;  %v4124_v12 = vadd.f32 1.0, %v4123_v10  ;;  %v3650_v45 = vmul.f32 %v3649_v13, %v3636_v6  ;;  %v4136_v17 = vmul.f32 %v4135_v14, %v4122_v7 }
 0x288   : > { %5392 = vrcp.f32 %v3638_v11  ;;  %v3651_v20 = vmul.f32 1.442695, %v3650_v45  ;;  %v4137_v23 = vmul.f32 1.442695, %v4136_v17 }
 0x289   : > { %5394 = vrcp.f32 %v4124_v12 }
 0x28a   : > { %5396 = vpow2.f32 %v3651_v20 }
 0x28b   : > { %5398 = vpow2.f32 %v4137_v23 }
 0x292   : > { %v5393_v15 = vpop.eup %5392 }
 0x293   : > { %v5395_v2 = vpop.eup %5394  ;;  %v3640_v16 = vmul.f32 1.0614054, %v5393_v15 }
 0x294   : > { %v4126_v18 = vmul.f32 1.0614054, %v5395_v2  ;;  %v5397_v31 = vpop.eup %5396 }
 0x295   : > { %v3641_v34 = vadd.f32 -1.4531521, %v3640_v16  ;;  %v5399_v33 = vpop.eup %5398 }
 0x296   : > { %v4127_v21 = vadd.f32 -1.4531521, %v4126_v18 }
 0x297   : > { %v3642_v22 = vmul.f32 %v5393_v15, %v3641_v34 }
 0x298   : > { %v4128_v24 = vmul.f32 %v5395_v2, %v4127_v21 }
 0x299   : > { %v3643_v25 = vadd.f32 1.4214138, %v3642_v22 }
 0x29a   : > { %v4129_v27 = vadd.f32 1.4214138, %v4128_v24 }
 0x29b   : > { %v3644_v28 = vmul.f32 %v5393_v15, %v3643_v25 }
 0x29c   : > { %v4130_v61 = vmul.f32 %v5395_v2, %v4129_v27 }
 0x29d   : > { %v3645_v50 = vadd.f32 -0.28449672, %v3644_v28 }
 0x29e   : > { %v4131_v62 = vadd.f32 -0.28449672, %v4130_v61 }
 0x29f   : > { %v3646_v52 = vmul.f32 %v5393_v15, %v3645_v50 }
 0x2a0   : > { %v4132_v19 = vmul.f32 %v5395_v2, %v4131_v62 }
 0x2a1   : > { %v3647_v29 = vadd.f32 0.2548296, %v3646_v52 }
 0x2a2   : > { %v4133_v44 = vadd.f32 0.2548296, %v4132_v19 }
 0x2a3   : > { %v3648_v30 = vmul.f32 %v5393_v15, %v3647_v29 }
 0x2a4   : > { %v4134_v32 = vmul.f32 %v5395_v2, %v4133_v44 }
 0x2a5   : > { %v3653_v35 = vmul.f32 %v5397_v31, %v3648_v30 }
 0x2a6   : > { %v4139_v36 = vmul.f32 %v5399_v33, %v4134_v32 }
 0x2a7   : > { %v3654_v37 = vsub.f32 1.0, %v3653_v35 }
 0x2a8   : > { %v4140_v38 = vsub.f32 1.0, %v4139_v36 }
 0x2a9   : > { %v3656_v39 = vsub.f32 0.0, %v3654_v37 }
 0x2aa   : > { %v4142_v40 = vsub.f32 0.0, %v4140_v38 }
 0x2ab   : > { %v3657_v51 = vsel %vm3655_vm9, %v3654_v37, %v3656_v39 }
 0x2ac   : > { %v3658_v42 = vadd.f32 1.0, %v3657_v51  ;;  %v4143_v43 = vsel %vm4141_vm10, %v4140_v38, %v4142_v40 }
 0x2ad   : > { %v4144_v47 = vadd.f32 1.0, %v4143_v43 }
 0x2ae   : > { %v3659_v48 = vmul.f32 %v3658_v42, %v3634_v41 }
 0x2af   : > { %v4145_v49 = vmul.f32 %v4144_v47, %v4120_v46 }
 0x2b0   : > { %v3660_v59 = vpack.c.bf16 %v3659_v48, %v3659_v48 }
 0x2b1   : > { %v4146_v0 = vpack.c.bf16 %v4145_v49, %v4145_v49 }
 0x2b2   : > { %4428 = vst.msk [vmem:[%s5938_s16 + $0x18] sm:$0xf] %vm745_vm4, %v3660_v59 }
 0x2b3   : > { %4456 = vst.msk [vmem:[%s5938_s16 + $0x1c] sm:$0xf] %vm745_vm4, %v4146_v0 }
 0x2b4 PF: > { %s13_s12 = sadd.s32 1, %s5406_s12  }
 0x2b5   : > { %p10_p4 = scmp.ge.s32.totalorder %s13_s12, 4  }
 0x2b7   :  { %12 = sbr.rel (!%p10_p4) target bundleno = 1 (0x1), region = 86 }

</bundles_post_ra>
